<compile_context>
chip_gen: v7x
topology: tpu7x:2x2x1
jax: 0.10.0
libtpu: 0.0.40
codegen_flags: <defaults>
</compile_context>

<pallas_src>
import math
from functools import partial

import jax
import jax.numpy as jnp
from jax.experimental import pallas as pl
from jax.experimental.pallas import tpu as pltpu

_BN_EPS = 1e-5
_VMEM_LIMIT = 32 * 1024 * 1024   # safe on v5e/v6e/v7x


def _round_up(x, m):
    return ((x + m - 1) // m) * m


def _pick_tile(dim, candidates):
    for c in candidates:
        if dim % c == 0:
            return c
    return dim


# ---------------------------------------------------------------------------
# Kernel 1: fused single-pass matmul + BN bias + optional residual + ReLU
#           (used for all 1x1 convolutions, incl. the downsample branch)
# ---------------------------------------------------------------------------
def _make_mm_kernel(relu, has_res):
    def kernel(*refs):
        if has_res:
            a_ref, b_ref, bias_ref, r_ref, o_ref = refs
        else:
            a_ref, b_ref, bias_ref, o_ref = refs
        y = jnp.dot(a_ref[...], b_ref[...], preferred_element_type=jnp.float32)
        y = y + bias_ref[...]
        if has_res:
            y = y + r_ref[...].astype(jnp.float32)
        if relu:
            y = jnp.maximum(y, 0.0)
        o_ref[...] = y.astype(o_ref.dtype)
    return kernel


def fused_matmul(a, b, bias, *, relu, residual=None, out_dtype=jnp.float32):
    """act((a @ b) + bias [+ residual]); a, b are bf16, f32 accumulation."""
    M, K = a.shape
    _, Nc = b.shape

    Mp = _round_up(M, 16)
    if Mp != M:                      # rare fallback; demo shapes divide evenly
        a = jnp.pad(a, ((0, Mp - M), (0, 0)))
        if residual is not None:
            residual = jnp.pad(residual, ((0, Mp - M), (0, 0)))

    tm = _pick_tile(Mp, (1024, 512, 256, 128))
    tn = _pick_tile(Nc, (512, 256, 128))
    grid = (Mp // tm, Nc // tn)

    in_specs = [
        pl.BlockSpec((tm, K), lambda i, j: (i, 0)),   # activations (full K)
        pl.BlockSpec((K, tn), lambda i, j: (0, j)),   # BN-folded weight
        pl.BlockSpec((1, tn), lambda i, j: (0, j)),   # BN bias
    ]
    args = [a, b, bias]
    if residual is not None:
        in_specs.append(pl.BlockSpec((tm, tn), lambda i, j: (i, j)))
        args.append(residual)

    out = pl.pallas_call(
        _make_mm_kernel(relu, residual is not None),
        out_shape=jax.ShapeDtypeStruct((Mp, Nc), out_dtype),
        grid=grid,
        in_specs=in_specs,
        out_specs=pl.BlockSpec((tm, tn), lambda i, j: (i, j)),
        compiler_params=pltpu.CompilerParams(
            dimension_semantics=("parallel", "parallel"),
            vmem_limit_bytes=_VMEM_LIMIT),
    )(*args)
    return out[:M] if Mp != M else out


# ---------------------------------------------------------------------------
# Kernel 2: 3x3 stride-1 conv + BN bias + ReLU with in-kernel 9-tap
#           accumulation over the padded NHWC block (no im2col in HBM).
#           For the small demo shapes the full per-image block fits in VMEM;
#           larger spatial sizes would additionally tile the row dimension.
# ---------------------------------------------------------------------------
def _make_conv3x3_kernel(H, W, C):
    def kernel(x_ref, w_ref, bias_ref, o_ref):
        cout_t = o_ref.shape[-1]
        acc = jnp.zeros((H * W, cout_t), jnp.float32)
        t = 0
        for dy in range(3):
            for dx in range(3):
                a = x_ref[0, dy:dy + H, dx:dx + W, :].reshape(H * W, C)
                acc = acc + jnp.dot(a, w_ref[t],
                                    preferred_element_type=jnp.float32)
                t += 1
        y = jnp.maximum(acc + bias_ref[...], 0.0)
        o_ref[0] = y.astype(o_ref.dtype)
    return kernel


def conv3x3_bn_relu(x, w9, bias):
    """3x3 conv (stride 1, pad 1) + folded-BN bias + ReLU; bf16 in/out."""
    N, H, W, C = x.shape
    Cout = w9.shape[-1]
    xp = jnp.pad(x, ((0, 0), (1, 1), (1, 1), (0, 0)))
    tn = _pick_tile(Cout, (256, 128))
    out = pl.pallas_call(
        _make_conv3x3_kernel(H, W, C),
        out_shape=jax.ShapeDtypeStruct((N, H * W, Cout), jnp.bfloat16),
        grid=(N, Cout // tn),
        in_specs=[
            pl.BlockSpec((1, H + 2, W + 2, C), lambda b, j: (b, 0, 0, 0)),
            pl.BlockSpec((9, C, tn), lambda b, j: (0, 0, j)),
            pl.BlockSpec((1, tn), lambda b, j: (0, j)),
        ],
        out_specs=pl.BlockSpec((1, H * W, tn), lambda b, j: (b, 0, j)),
        compiler_params=pltpu.CompilerParams(
            dimension_semantics=("parallel", "parallel"),
            vmem_limit_bytes=_VMEM_LIMIT),
    )(xp, w9, bias)
    return out.reshape(N, H, W, Cout)


# ---------------------------------------------------------------------------
# Bottleneck forward (whole thing jitted; stride is a static argument)
# ---------------------------------------------------------------------------
@partial(jax.jit, static_argnames=("stride",))
def bottleneck_forward(x_nchw, params, *, stride=1):
    x = jnp.transpose(x_nchw, (0, 2, 3, 1))          # NCHW -> NHWC, f32
    N, H, W, Cin = x.shape
    x_bf = x.astype(jnp.bfloat16)

    planes = params["w1"].shape[1]
    cout = params["w3"].shape[1]

    # conv1 (1x1) + bn1 + relu
    h = fused_matmul(x_bf.reshape(N * H * W, Cin), params["w1"], params["b1"],
                     relu=True, out_dtype=jnp.bfloat16)
    h = h.reshape(N, H, W, planes)

    # conv2 (3x3, stride) + bn2 + relu
    h = conv3x3_bn_relu(h, params["w2"], params["b2"])
    if stride > 1:
        h = h[:, ::stride, ::stride, :]              # exact stride subsampling
    Ho, Wo = h.shape[1], h.shape[2]

    # residual branch
    if "wd" in params:                               # downsample: 1x1 conv + BN
        xs = x_bf[:, ::stride, ::stride, :].reshape(N * Ho * Wo, Cin)
        res = fused_matmul(xs, params["wd"], params["bd"],
                           relu=False, out_dtype=jnp.float32)
    else:                                            # identity residual
        res = x.reshape(N * Ho * Wo, cout)

    # conv3 (1x1) + bn3 + residual add + relu (all fused in the epilogue)
    out = fused_matmul(h.reshape(N * Ho * Wo, planes), params["w3"],
                       params["b3"], relu=True, residual=res,
                       out_dtype=jnp.float32)
    out = out.reshape(N, Ho, Wo, cout)
    return jnp.transpose(out, (0, 3, 1, 2))          # NHWC -> NCHW


# ---------------------------------------------------------------------------
# Parameter construction (deterministic) and one-time weight preparation
# ---------------------------------------------------------------------------
def _init_conv(key, cout, cin, kh, kw):
    n = kh * kw * cout
    return jax.random.normal(key, (cout, cin, kh, kw), jnp.float32) * math.sqrt(2.0 / n)


def _init_bn(key, c):
    k1, k2, k3, k4 = jax.random.split(key, 4)
    return dict(
        gamma=1.0 + 0.1 * jax.random.normal(k1, (c,), jnp.float32),
        beta=0.1 * jax.random.normal(k2, (c,), jnp.float32),
        mean=0.1 * jax.random.normal(k3, (c,), jnp.float32),
        var=1.0 + 0.1 * jnp.abs(jax.random.normal(k4, (c,), jnp.float32)),
    )


def build_raw_bottleneck(key, inplanes, planes, with_downsample):
    keys = jax.random.split(key, 8)
    raw = {
        "conv1": _init_conv(keys[0], planes, inplanes, 1, 1),
        "bn1": _init_bn(keys[1], planes),
        "conv2": _init_conv(keys[2], planes, planes, 3, 3),
        "bn2": _init_bn(keys[3], planes),
        "conv3": _init_conv(keys[4], planes * 4, planes, 1, 1),
        "bn3": _init_bn(keys[5], planes * 4),
    }
    if with_downsample:
        raw["down_conv"] = _init_conv(keys[6], planes * 4, inplanes, 1, 1)
        raw["down_bn"] = _init_bn(keys[7], planes * 4)
    return raw


def _fold_bn(w_oihw, bn):
    scale = bn["gamma"] / jnp.sqrt(bn["var"] + _BN_EPS)
    bias = bn["beta"] - bn["mean"] * scale
    w = w_oihw * scale[:, None, None, None]
    return w, bias.reshape(1, -1).astype(jnp.float32)


def _prep_1x1(w_oihw, bn):
    w, bias = _fold_bn(w_oihw, bn)
    wk = jnp.transpose(w[:, :, 0, 0], (1, 0)).astype(jnp.bfloat16)   # (Cin, Cout)
    return wk, bias


def _prep_3x3(w_oihw, bn):
    w, bias = _fold_bn(w_oihw, bn)
    cout, cin = w.shape[0], w.shape[1]
    w9 = jnp.transpose(w, (2, 3, 1, 0)).reshape(9, cin, cout).astype(jnp.bfloat16)
    return w9, bias


def prep_bottleneck_params(raw):
    p = {}
    p["w1"], p["b1"] = _prep_1x1(raw["conv1"], raw["bn1"])
    p["w2"], p["b2"] = _prep_3x3(raw["conv2"], raw["bn2"])
    p["w3"], p["b3"] = _prep_1x1(raw["conv3"], raw["bn3"])
    if "down_conv" in raw:
        p["wd"], p["bd"] = _prep_1x1(raw["down_conv"], raw["down_bn"])
    return p


# ---------------------------------------------------------------------------
# Pure-JAX reference (f32) for verification
# ---------------------------------------------------------------------------
def _bn_ref(x, bn):
    return (x - bn["mean"]) / jnp.sqrt(bn["var"] + _BN_EPS) * bn["gamma"] + bn["beta"]


def _conv_ref(x, w, stride, pad):
    return jax.lax.conv_general_dilated(
        x, jnp.transpose(w, (2, 3, 1, 0)),
        window_strides=(stride, stride),
        padding=[(pad, pad), (pad, pad)],
        dimension_numbers=("NHWC", "HWIO", "NHWC"))


def bottleneck_reference(x_nchw, raw, stride):
    x = jnp.transpose(x_nchw, (0, 2, 3, 1))
    out = jax.nn.relu(_bn_ref(_conv_ref(x, raw["conv1"], 1, 0), raw["bn1"]))
    out = jax.nn.relu(_bn_ref(_conv_ref(out, raw["conv2"], stride, 1), raw["bn2"]))
    out = _bn_ref(_conv_ref(out, raw["conv3"], 1, 0), raw["bn3"])
    if "down_conv" in raw:
        res = _bn_ref(_conv_ref(x, raw["down_conv"], stride, 0), raw["down_bn"])
    else:
        res = x
    out = jax.nn.relu(out + res)
    return jnp.transpose(out, (0, 3, 1, 2))


def _rel_err(a, b):
    a = a.astype(jnp.float32)
    b = b.astype(jnp.float32)
    return float(jnp.linalg.norm(a - b) / (jnp.linalg.norm(b) + 1e-12))


# ---------------------------------------------------------------------------
if __name__ == "__main__":
    key = jax.random.PRNGKey(0)
    k_x, k_a, k_b = jax.random.split(key, 3)

    # Config A: Bottleneck(inplanes=16, planes=4), stride=1, identity residual.
    inplanes, planes = 16, 4
    x = jax.random.normal(k_x, (2, inplanes, 16, 16), jnp.float32)

    raw_a = build_raw_bottleneck(k_a, inplanes, planes, with_downsample=False)
    prm_a = prep_bottleneck_params(raw_a)
    out_a = jax.block_until_ready(bottleneck_forward(x, prm_a, stride=1))
    ref_a = bottleneck_reference(x, raw_a, stride=1)
    assert out_a.shape == (2, planes * 4, 16, 16), out_a.shape
    assert bool(jnp.all(jnp.isfinite(out_a)))
    err_a = _rel_err(out_a, ref_a)
    assert err_a < 5e-2, err_a

    # Config B: Bottleneck(inplanes=16, planes=8, stride=2) with a 1x1-conv
    # downsample branch (exercises the strided conv and fused residual path).
    planes_b = 8
    raw_b = build_raw_bottleneck(k_b, inplanes, planes_b, with_downsample=True)
    prm_b = prep_bottleneck_params(raw_b)
    out_b = jax.block_until_ready(bottleneck_forward(x, prm_b, stride=2))
    ref_b = bottleneck_reference(x, raw_b, stride=2)
    assert out_b.shape == (2, planes_b * 4, 8, 8), out_b.shape
    assert bool(jnp.all(jnp.isfinite(out_b)))
    err_b = _rel_err(out_b, ref_b)
    assert err_b < 5e-2, err_b

    print("KERNEL_OK")
</pallas_src>

<mosaic_0001>
module attributes {stable_mosaic.version = 11 : i64} {
  func.func @kernel(%arg0: i32, %arg1: i32, %arg2: memref<512x16xbf16, #tpu.memory_space<vmem>>, %arg3: memref<16x4xbf16, #tpu.memory_space<vmem>>, %arg4: memref<1x4xf32, #tpu.memory_space<vmem>>, %arg5: memref<512x4xbf16, #tpu.memory_space<vmem>>) attributes {dimension_semantics = [#tpu.dimension_semantics<parallel>, #tpu.dimension_semantics<parallel>], iteration_bounds = array<i64: 1, 1>, scalar_prefetch = 0 : i64, scratch_operands = 0 : i64, tpu.core_type = #tpu.core_type<tc>, window_params = [{transform_indices = @transform_0, window_bounds = array<i64: 512, 16>}, {transform_indices = @transform_1, window_bounds = array<i64: 16, 4>}, {transform_indices = @transform_2, window_bounds = array<i64: 1, 4>}, {transform_indices = @transform_3, window_bounds = array<i64: 512, 4>}]} {
    %c0 = arith.constant 0 : index
    %c0_0 = arith.constant 0 : index
    %0 = vector.load %arg2[%c0, %c0_0] : memref<512x16xbf16, #tpu.memory_space<vmem>>, vector<512x16xbf16>
    %c0_1 = arith.constant 0 : index
    %c0_2 = arith.constant 0 : index
    %1 = vector.load %arg3[%c0_1, %c0_2] : memref<16x4xbf16, #tpu.memory_space<vmem>>, vector<16x4xbf16>
    %cst = arith.constant dense<0.000000e+00> : vector<512x4xf32>
    %2 = tpu.matmul %0, %1, %cst {dimension_numbers = #tpu.dot_dimension_numbers<[1], [0], [0], [1], [0, 0, 1, 1], [], []>} : vector<512x16xbf16>, vector<16x4xbf16>, vector<512x4xf32> -> vector<512x4xf32>
    %c0_3 = arith.constant 0 : index
    %c0_4 = arith.constant 0 : index
    %3 = vector.load %arg4[%c0_3, %c0_4] : memref<1x4xf32, #tpu.memory_space<vmem>>, vector<1x4xf32>
    %4 = vector.broadcast %3 : vector<1x4xf32> to vector<512x4xf32>
    %5 = arith.addf %2, %4 : vector<512x4xf32>
    %cst_5 = arith.constant 0.000000e+00 : f32
    %6 = vector.broadcast %cst_5 : f32 to vector<512x4xf32>
    %7 = arith.maximumf %5, %6 : vector<512x4xf32>
    %8 = arith.truncf %7 : vector<512x4xf32> to vector<512x4xbf16>
    %c0_6 = arith.constant 0 : index
    %c0_7 = arith.constant 0 : index
    %9 = vector.load %arg5[%c0_6, %c0_7] : memref<512x4xbf16, #tpu.memory_space<vmem>>, vector<512x4xbf16>
    tpu.vector_store %arg5[%c0_6, %c0_7], %8 {strides = array<i32>} : memref<512x4xbf16, #tpu.memory_space<vmem>>, vector<512x4xbf16>,
    return
  }
  func.func @transform_0(%arg0: i32, %arg1: i32) -> (i32, i32) {
    %c0_i32 = arith.constant 0 : i32
    %c0_i32_0 = arith.constant 0 : i32
    return %arg0, %c0_i32 : i32, i32
  }
  func.func @transform_1(%arg0: i32, %arg1: i32) -> (i32, i32) {
    %c0_i32 = arith.constant 0 : i32
    %c0_i32_0 = arith.constant 0 : i32
    return %c0_i32, %arg1 : i32, i32
  }
  func.func @transform_2(%arg0: i32, %arg1: i32) -> (i32, i32) {
    %c0_i32 = arith.constant 0 : i32
    %c0_i32_0 = arith.constant 0 : i32
    return %c0_i32, %arg1 : i32, i32
  }
  func.func @transform_3(%arg0: i32, %arg1: i32) -> (i32, i32) {
    %c0_i32 = arith.constant 0 : i32
    return %arg0, %arg1 : i32, i32
  }
}

module attributes {stable_mosaic.version = 11 : i64} {
  func.func @kernel(%arg0: i32, %arg1: i32, %arg2: memref<1x18x18x4xbf16, #tpu.memory_space<vmem>>, %arg3: memref<9x4x4xbf16, #tpu.memory_space<vmem>>, %arg4: memref<1x4xf32, #tpu.memory_space<vmem>>, %arg5: memref<1x256x4xbf16, #tpu.memory_space<vmem>>) attributes {dimension_semantics = [#tpu.dimension_semantics<parallel>, #tpu.dimension_semantics<parallel>], iteration_bounds = array<i64: 2, 1>, scalar_prefetch = 0 : i64, scratch_operands = 0 : i64, tpu.core_type = #tpu.core_type<tc>, window_params = [{transform_indices = @transform_0, window_bounds = array<i64: 1, 18, 18, 4>}, {transform_indices = @transform_1, window_bounds = array<i64: 9, 4, 4>}, {transform_indices = @transform_2, window_bounds = array<i64: 1, 4>}, {transform_indices = @transform_3, window_bounds = array<i64: 1, 256, 4>}]} {
    %cst = arith.constant 0.000000e+00 : f32
    %0 = vector.broadcast %cst : f32 to vector<256x4xf32>
    %c0 = arith.constant 0 : index
    %c0_0 = arith.constant 0 : index
    %c0_1 = arith.constant 0 : index
    %c0_2 = arith.constant 0 : index
    %1 = vector.load %arg2[%c0, %c0_0, %c0_1, %c0_2] : memref<1x18x18x4xbf16, #tpu.memory_space<vmem>>, vector<1x16x16x4xbf16>
    %2 = vector.shape_cast %1 : vector<1x16x16x4xbf16> to vector<16x16x4xbf16>
    %3 = vector.shape_cast %2 : vector<16x16x4xbf16> to vector<256x4xbf16>
    %c0_3 = arith.constant 0 : index
    %c0_4 = arith.constant 0 : index
    %c0_5 = arith.constant 0 : index
    %4 = vector.load %arg3[%c0_3, %c0_4, %c0_5] : memref<9x4x4xbf16, #tpu.memory_space<vmem>>, vector<1x4x4xbf16>
    %5 = vector.shape_cast %4 : vector<1x4x4xbf16> to vector<4x4xbf16>
    %cst_6 = arith.constant dense<0.000000e+00> : vector<256x4xf32>
    %6 = tpu.matmul %3, %5, %cst_6 {dimension_numbers = #tpu.dot_dimension_numbers<[1], [0], [0], [1], [0, 0, 1, 1], [], []>} : vector<256x4xbf16>, vector<4x4xbf16>, vector<256x4xf32> -> vector<256x4xf32>
    %7 = arith.addf %0, %6 : vector<256x4xf32>
    %c0_7 = arith.constant 0 : index
    %c0_8 = arith.constant 0 : index
    %c1 = arith.constant 1 : index
    %c0_9 = arith.constant 0 : index
    %8 = vector.load %arg2[%c0_7, %c0_8, %c1, %c0_9] : memref<1x18x18x4xbf16, #tpu.memory_space<vmem>>, vector<1x16x16x4xbf16>
    %9 = vector.shape_cast %8 : vector<1x16x16x4xbf16> to vector<16x16x4xbf16>
    %10 = vector.shape_cast %9 : vector<16x16x4xbf16> to vector<256x4xbf16>
    %c1_10 = arith.constant 1 : index
    %c0_11 = arith.constant 0 : index
    %c0_12 = arith.constant 0 : index
    %11 = vector.load %arg3[%c1_10, %c0_11, %c0_12] : memref<9x4x4xbf16, #tpu.memory_space<vmem>>, vector<1x4x4xbf16>
    %12 = vector.shape_cast %11 : vector<1x4x4xbf16> to vector<4x4xbf16>
    %cst_13 = arith.constant dense<0.000000e+00> : vector<256x4xf32>
    %13 = tpu.matmul %10, %12, %cst_13 {dimension_numbers = #tpu.dot_dimension_numbers<[1], [0], [0], [1], [0, 0, 1, 1], [], []>} : vector<256x4xbf16>, vector<4x4xbf16>, vector<256x4xf32> -> vector<256x4xf32>
    %14 = arith.addf %7, %13 : vector<256x4xf32>
    %c0_14 = arith.constant 0 : index
    %c0_15 = arith.constant 0 : index
    %c2 = arith.constant 2 : index
    %c0_16 = arith.constant 0 : index
    %15 = vector.load %arg2[%c0_14, %c0_15, %c2, %c0_16] : memref<1x18x18x4xbf16, #tpu.memory_space<vmem>>, vector<1x16x16x4xbf16>
    %16 = vector.shape_cast %15 : vector<1x16x16x4xbf16> to vector<16x16x4xbf16>
    %17 = vector.shape_cast %16 : vector<16x16x4xbf16> to vector<256x4xbf16>
    %c2_17 = arith.constant 2 : index
    %c0_18 = arith.constant 0 : index
    %c0_19 = arith.constant 0 : index
    %18 = vector.load %arg3[%c2_17, %c0_18, %c0_19] : memref<9x4x4xbf16, #tpu.memory_space<vmem>>, vector<1x4x4xbf16>
    %19 = vector.shape_cast %18 : vector<1x4x4xbf16> to vector<4x4xbf16>
    %cst_20 = arith.constant dense<0.000000e+00> : vector<256x4xf32>
    %20 = tpu.matmul %17, %19, %cst_20 {dimension_numbers = #tpu.dot_dimension_numbers<[1], [0], [0], [1], [0, 0, 1, 1], [], []>} : vector<256x4xbf16>, vector<4x4xbf16>, vector<256x4xf32> -> vector<256x4xf32>
    %21 = arith.addf %14, %20 : vector<256x4xf32>
    %c0_21 = arith.constant 0 : index
    %c1_22 = arith.constant 1 : index
    %c0_23 = arith.constant 0 : index
    %c0_24 = arith.constant 0 : index
    %22 = vector.load %arg2[%c0_21, %c1_22, %c0_23, %c0_24] : memref<1x18x18x4xbf16, #tpu.memory_space<vmem>>, vector<1x16x16x4xbf16>
    %23 = vector.shape_cast %22 : vector<1x16x16x4xbf16> to vector<16x16x4xbf16>
    %24 = vector.shape_cast %23 : vector<16x16x4xbf16> to vector<256x4xbf16>
    %c3 = arith.constant 3 : index
    %c0_25 = arith.constant 0 : index
    %c0_26 = arith.constant 0 : index
    %25 = vector.load %arg3[%c3, %c0_25, %c0_26] : memref<9x4x4xbf16, #tpu.memory_space<vmem>>, vector<1x4x4xbf16>
    %26 = vector.shape_cast %25 : vector<1x4x4xbf16> to vector<4x4xbf16>
    %cst_27 = arith.constant dense<0.000000e+00> : vector<256x4xf32>
    %27 = tpu.matmul %24, %26, %cst_27 {dimension_numbers = #tpu.dot_dimension_numbers<[1], [0], [0], [1], [0, 0, 1, 1], [], []>} : vector<256x4xbf16>, vector<4x4xbf16>, vector<256x4xf32> -> vector<256x4xf32>
    %28 = arith.addf %21, %27 : vector<256x4xf32>
    %c0_28 = arith.constant 0 : index
    %c1_29 = arith.constant 1 : index
    %c1_30 = arith.constant 1 : index
    %c0_31 = arith.constant 0 : index
    %29 = vector.load %arg2[%c0_28, %c1_29, %c1_30, %c0_31] : memref<1x18x18x4xbf16, #tpu.memory_space<vmem>>, vector<1x16x16x4xbf16>
    %30 = vector.shape_cast %29 : vector<1x16x16x4xbf16> to vector<16x16x4xbf16>
    %31 = vector.shape_cast %30 : vector<16x16x4xbf16> to vector<256x4xbf16>
    %c4 = arith.constant 4 : index
    %c0_32 = arith.constant 0 : index
    %c0_33 = arith.constant 0 : index
    %32 = vector.load %arg3[%c4, %c0_32, %c0_33] : memref<9x4x4xbf16, #tpu.memory_space<vmem>>, vector<1x4x4xbf16>
    %33 = vector.shape_cast %32 : vector<1x4x4xbf16> to vector<4x4xbf16>
    %cst_34 = arith.constant dense<0.000000e+00> : vector<256x4xf32>
    %34 = tpu.matmul %31, %33, %cst_34 {dimension_numbers = #tpu.dot_dimension_numbers<[1], [0], [0], [1], [0, 0, 1, 1], [], []>} : vector<256x4xbf16>, vector<4x4xbf16>, vector<256x4xf32> -> vector<256x4xf32>
    %35 = arith.addf %28, %34 : vector<256x4xf32>
    %c0_35 = arith.constant 0 : index
    %c1_36 = arith.constant 1 : index
    %c2_37 = arith.constant 2 : index
    %c0_38 = arith.constant 0 : index
    %36 = vector.load %arg2[%c0_35, %c1_36, %c2_37, %c0_38] : memref<1x18x18x4xbf16, #tpu.memory_space<vmem>>, vector<1x16x16x4xbf16>
    %37 = vector.shape_cast %36 : vector<1x16x16x4xbf16> to vector<16x16x4xbf16>
    %38 = vector.shape_cast %37 : vector<16x16x4xbf16> to vector<256x4xbf16>
    %c5 = arith.constant 5 : index
    %c0_39 = arith.constant 0 : index
    %c0_40 = arith.constant 0 : index
    %39 = vector.load %arg3[%c5, %c0_39, %c0_40] : memref<9x4x4xbf16, #tpu.memory_space<vmem>>, vector<1x4x4xbf16>
    %40 = vector.shape_cast %39 : vector<1x4x4xbf16> to vector<4x4xbf16>
    %cst_41 = arith.constant dense<0.000000e+00> : vector<256x4xf32>
    %41 = tpu.matmul %38, %40, %cst_41 {dimension_numbers = #tpu.dot_dimension_numbers<[1], [0], [0], [1], [0, 0, 1, 1], [], []>} : vector<256x4xbf16>, vector<4x4xbf16>, vector<256x4xf32> -> vector<256x4xf32>
    %42 = arith.addf %35, %41 : vector<256x4xf32>
    %c0_42 = arith.constant 0 : index
    %c2_43 = arith.constant 2 : index
    %c0_44 = arith.constant 0 : index
    %c0_45 = arith.constant 0 : index
    %43 = vector.load %arg2[%c0_42, %c2_43, %c0_44, %c0_45] : memref<1x18x18x4xbf16, #tpu.memory_space<vmem>>, vector<1x16x16x4xbf16>
    %44 = vector.shape_cast %43 : vector<1x16x16x4xbf16> to vector<16x16x4xbf16>
    %45 = vector.shape_cast %44 : vector<16x16x4xbf16> to vector<256x4xbf16>
    %c6 = arith.constant 6 : index
    %c0_46 = arith.constant 0 : index
    %c0_47 = arith.constant 0 : index
    %46 = vector.load %arg3[%c6, %c0_46, %c0_47] : memref<9x4x4xbf16, #tpu.memory_space<vmem>>, vector<1x4x4xbf16>
    %47 = vector.shape_cast %46 : vector<1x4x4xbf16> to vector<4x4xbf16>
    %cst_48 = arith.constant dense<0.000000e+00> : vector<256x4xf32>
    %48 = tpu.matmul %45, %47, %cst_48 {dimension_numbers = #tpu.dot_dimension_numbers<[1], [0], [0], [1], [0, 0, 1, 1], [], []>} : vector<256x4xbf16>, vector<4x4xbf16>, vector<256x4xf32> -> vector<256x4xf32>
    %49 = arith.addf %42, %48 : vector<256x4xf32>
    %c0_49 = arith.constant 0 : index
    %c2_50 = arith.constant 2 : index
    %c1_51 = arith.constant 1 : index
    %c0_52 = arith.constant 0 : index
    %50 = vector.load %arg2[%c0_49, %c2_50, %c1_51, %c0_52] : memref<1x18x18x4xbf16, #tpu.memory_space<vmem>>, vector<1x16x16x4xbf16>
    %51 = vector.shape_cast %50 : vector<1x16x16x4xbf16> to vector<16x16x4xbf16>
    %52 = vector.shape_cast %51 : vector<16x16x4xbf16> to vector<256x4xbf16>
    %c7 = arith.constant 7 : index
    %c0_53 = arith.constant 0 : index
    %c0_54 = arith.constant 0 : index
    %53 = vector.load %arg3[%c7, %c0_53, %c0_54] : memref<9x4x4xbf16, #tpu.memory_space<vmem>>, vector<1x4x4xbf16>
    %54 = vector.shape_cast %53 : vector<1x4x4xbf16> to vector<4x4xbf16>
    %cst_55 = arith.constant dense<0.000000e+00> : vector<256x4xf32>
    %55 = tpu.matmul %52, %54, %cst_55 {dimension_numbers = #tpu.dot_dimension_numbers<[1], [0], [0], [1], [0, 0, 1, 1], [], []>} : vector<256x4xbf16>, vector<4x4xbf16>, vector<256x4xf32> -> vector<256x4xf32>
    %56 = arith.addf %49, %55 : vector<256x4xf32>
    %c0_56 = arith.constant 0 : index
    %c2_57 = arith.constant 2 : index
    %c2_58 = arith.constant 2 : index
    %c0_59 = arith.constant 0 : index
    %57 = vector.load %arg2[%c0_56, %c2_57, %c2_58, %c0_59] : memref<1x18x18x4xbf16, #tpu.memory_space<vmem>>, vector<1x16x16x4xbf16>
    %58 = vector.shape_cast %57 : vector<1x16x16x4xbf16> to vector<16x16x4xbf16>
    %59 = vector.shape_cast %58 : vector<16x16x4xbf16> to vector<256x4xbf16>
    %c8 = arith.constant 8 : index
    %c0_60 = arith.constant 0 : index
    %c0_61 = arith.constant 0 : index
    %60 = vector.load %arg3[%c8, %c0_60, %c0_61] : memref<9x4x4xbf16, #tpu.memory_space<vmem>>, vector<1x4x4xbf16>
    %61 = vector.shape_cast %60 : vector<1x4x4xbf16> to vector<4x4xbf16>
    %cst_62 = arith.constant dense<0.000000e+00> : vector<256x4xf32>
    %62 = tpu.matmul %59, %61, %cst_62 {dimension_numbers = #tpu.dot_dimension_numbers<[1], [0], [0], [1], [0, 0, 1, 1], [], []>} : vector<256x4xbf16>, vector<4x4xbf16>, vector<256x4xf32> -> vector<256x4xf32>
    %63 = arith.addf %56, %62 : vector<256x4xf32>
    %c0_63 = arith.constant 0 : index
    %c0_64 = arith.constant 0 : index
    %64 = vector.load %arg4[%c0_63, %c0_64] : memref<1x4xf32, #tpu.memory_space<vmem>>, vector<1x4xf32>
    %65 = vector.broadcast %64 : vector<1x4xf32> to vector<256x4xf32>
    %66 = arith.addf %63, %65 : vector<256x4xf32>
    %cst_65 = arith.constant 0.000000e+00 : f32
    %67 = vector.broadcast %cst_65 : f32 to vector<256x4xf32>
    %68 = arith.maximumf %66, %67 : vector<256x4xf32>
    %69 = arith.truncf %68 : vector<256x4xf32> to vector<256x4xbf16>
    %c0_66 = arith.constant 0 : index
    %c0_67 = arith.constant 0 : index
    %c0_68 = arith.constant 0 : index
    %70 = vector.load %arg5[%c0_66, %c0_67, %c0_68] : memref<1x256x4xbf16, #tpu.memory_space<vmem>>, vector<1x256x4xbf16>
    %71 = vector.shape_cast %70 : vector<1x256x4xbf16> to vector<256x4xbf16>
    %72 = vector.shape_cast %69 : vector<256x4xbf16> to vector<1x256x4xbf16>
    tpu.vector_store %arg5[%c0_66, %c0_67, %c0_68], %72 {strides = array<i32>} : memref<1x256x4xbf16, #tpu.memory_space<vmem>>, vector<1x256x4xbf16>,
    return
  }
  func.func @transform_0(%arg0: i32, %arg1: i32) -> (i32, i32, i32, i32) {
    %c0_i32 = arith.constant 0 : i32
    %c0_i32_0 = arith.constant 0 : i32
    %c0_i32_1 = arith.constant 0 : i32
    %c0_i32_2 = arith.constant 0 : i32
    return %arg0, %c0_i32, %c0_i32_0, %c0_i32_1 : i32, i32, i32, i32
  }
  func.func @transform_1(%arg0: i32, %arg1: i32) -> (i32, i32, i32) {
    %c0_i32 = arith.constant 0 : i32
    %c0_i32_0 = arith.constant 0 : i32
    %c0_i32_1 = arith.constant 0 : i32
    return %c0_i32, %c0_i32_0, %arg1 : i32, i32, i32
  }
  func.func @transform_2(%arg0: i32, %arg1: i32) -> (i32, i32) {
    %c0_i32 = arith.constant 0 : i32
    %c0_i32_0 = arith.constant 0 : i32
    return %c0_i32, %arg1 : i32, i32
  }
  func.func @transform_3(%arg0: i32, %arg1: i32) -> (i32, i32, i32) {
    %c0_i32 = arith.constant 0 : i32
    %c0_i32_0 = arith.constant 0 : i32
    return %arg0, %c0_i32, %arg1 : i32, i32, i32
  }
}

module attributes {stable_mosaic.version = 11 : i64} {
  func.func @kernel(%arg0: i32, %arg1: i32, %arg2: memref<512x4xbf16, #tpu.memory_space<vmem>>, %arg3: memref<4x16xbf16, #tpu.memory_space<vmem>>, %arg4: memref<1x16xf32, #tpu.memory_space<vmem>>, %arg5: memref<512x16xf32, #tpu.memory_space<vmem>>, %arg6: memref<512x16xf32, #tpu.memory_space<vmem>>) attributes {dimension_semantics = [#tpu.dimension_semantics<parallel>, #tpu.dimension_semantics<parallel>], iteration_bounds = array<i64: 1, 1>, scalar_prefetch = 0 : i64, scratch_operands = 0 : i64, tpu.core_type = #tpu.core_type<tc>, window_params = [{transform_indices = @transform_0, window_bounds = array<i64: 512, 4>}, {transform_indices = @transform_1, window_bounds = array<i64: 4, 16>}, {transform_indices = @transform_2, window_bounds = array<i64: 1, 16>}, {transform_indices = @transform_3, window_bounds = array<i64: 512, 16>}, {transform_indices = @transform_4, window_bounds = array<i64: 512, 16>}]} {
    %c0 = arith.constant 0 : index
    %c0_0 = arith.constant 0 : index
    %0 = vector.load %arg2[%c0, %c0_0] : memref<512x4xbf16, #tpu.memory_space<vmem>>, vector<512x4xbf16>
    %c0_1 = arith.constant 0 : index
    %c0_2 = arith.constant 0 : index
    %1 = vector.load %arg3[%c0_1, %c0_2] : memref<4x16xbf16, #tpu.memory_space<vmem>>, vector<4x16xbf16>
    %cst = arith.constant dense<0.000000e+00> : vector<512x16xf32>
    %2 = tpu.matmul %0, %1, %cst {dimension_numbers = #tpu.dot_dimension_numbers<[1], [0], [0], [1], [0, 0, 1, 1], [], []>} : vector<512x4xbf16>, vector<4x16xbf16>, vector<512x16xf32> -> vector<512x16xf32>
    %c0_3 = arith.constant 0 : index
    %c0_4 = arith.constant 0 : index
    %3 = vector.load %arg4[%c0_3, %c0_4] : memref<1x16xf32, #tpu.memory_space<vmem>>, vector<1x16xf32>
    %4 = vector.broadcast %3 : vector<1x16xf32> to vector<512x16xf32>
    %5 = arith.addf %2, %4 : vector<512x16xf32>
    %c0_5 = arith.constant 0 : index
    %c0_6 = arith.constant 0 : index
    %6 = vector.load %arg5[%c0_5, %c0_6] : memref<512x16xf32, #tpu.memory_space<vmem>>, vector<512x16xf32>
    %7 = arith.addf %5, %6 : vector<512x16xf32>
    %cst_7 = arith.constant 0.000000e+00 : f32
    %8 = vector.broadcast %cst_7 : f32 to vector<512x16xf32>
    %9 = arith.maximumf %7, %8 : vector<512x16xf32>
    %c0_8 = arith.constant 0 : index
    %c0_9 = arith.constant 0 : index
    %10 = vector.load %arg6[%c0_8, %c0_9] : memref<512x16xf32, #tpu.memory_space<vmem>>, vector<512x16xf32>
    tpu.vector_store %arg6[%c0_8, %c0_9], %9 {strides = array<i32>} : memref<512x16xf32, #tpu.memory_space<vmem>>, vector<512x16xf32>,
    return
  }
  func.func @transform_0(%arg0: i32, %arg1: i32) -> (i32, i32) {
    %c0_i32 = arith.constant 0 : i32
    %c0_i32_0 = arith.constant 0 : i32
    return %arg0, %c0_i32 : i32, i32
  }
  func.func @transform_1(%arg0: i32, %arg1: i32) -> (i32, i32) {
    %c0_i32 = arith.constant 0 : i32
    %c0_i32_0 = arith.constant 0 : i32
    return %c0_i32, %arg1 : i32, i32
  }
  func.func @transform_2(%arg0: i32, %arg1: i32) -> (i32, i32) {
    %c0_i32 = arith.constant 0 : i32
    %c0_i32_0 = arith.constant 0 : i32
    return %c0_i32, %arg1 : i32, i32
  }
  func.func @transform_3(%arg0: i32, %arg1: i32) -> (i32, i32) {
    %c0_i32 = arith.constant 0 : i32
    return %arg0, %arg1 : i32, i32
  }
  func.func @transform_4(%arg0: i32, %arg1: i32) -> (i32, i32) {
    %c0_i32 = arith.constant 0 : i32
    return %arg0, %arg1 : i32, i32
  }
}

</mosaic_0001>

<bundles_post_ra>
// kernel: bottleneck_forward.3
= control target key start
LH: loop header
LB: loop body
LE: loop exit
PB: predicated region body
PF: predicated region fallthrough
CT: control target
= control target key end

     0   :  { %vm254_vm0 = vcmask 130048   ;;  %vm960_vm1 = vcmask 27648   ;;  %s1833_s1 = inlined_call_operand.vmem [shape: bf16[16,4], index: 1, kind: input, shape index: {}]   ;;  %s1834_s0 = inlined_call_operand.vmem [shape: bf16[512,16], index: 0, kind: input, shape index: {}]   ;;  %s1835_s2 = inlined_call_operand.vmem [shape: f32[1,4], index: 2, kind: input, shape index: {}]   ;;  %s1836_s3 = inlined_call_operand.vmem [shape: bf16[512,4], index: 3, kind: output, shape index: {}]  }
   0x1   :  { %v1324_v0 = vld [vmem:[%s1833_s1] sm:$0xff]   ;;  %v1327_v3 = vld [vmem:[%s1834_s0 + $0x8] sm:$0xff]   ;;  %v1329_v5 = vld [vmem:[%s1834_s0 + $0x10] sm:$0xff]  }
   0x2   :  { %v1325_v1 = vld [vmem:[%s1834_s0] sm:$0xff]   ;;  %1256 = vmatprep.subr.bf16.mxu0 %v1324_v0  ;;  %1322 = vmatprep.subr.bf16.mxu1 %v1324_v0  ;;  %v1328_v4 = vld [vmem:[%s1834_s0 + $0x88] sm:$0xff]   ;;  %v1330_v6 = vld [vmem:[%s1834_s0 + $0x90] sm:$0xff]  }
   0x3   :  { %v1326_v2 = vld [vmem:[%s1834_s0 + $0x80] sm:$0xff]   ;;  %1257 = vmatpush3.bf16.msra.mxu0 %v1324_v0  ;;  %1323 = vmatpush3.bf16.msra.mxu1 %v1324_v0  ;;  %v1331_v7 = vld [vmem:[%s1834_s0 + $0x18] sm:$0xff]   ;;  %v1335_v11 = vld [vmem:[%s1834_s0 + $0x28] sm:$0xff]  }
   0x4   :  { %1258 = vmatprep.mubr.msk.bf16.mxu0 %vm254_vm0, %v1325_v1  ;;  %1290 = vmatprep.mubr.msk.bf16.mxu1 %vm254_vm0, %v1326_v2  ;;  %v1332_v8 = vld [vmem:[%s1834_s0 + $0x98] sm:$0xff]   ;;  %v1333_v9 = vld [vmem:[%s1834_s0 + $0x20] sm:$0xff]   ;;  %v1336_v12 = vld [vmem:[%s1834_s0 + $0xa8] sm:$0xff]  }
   0x5   :  { %v1334_v10 = vld [vmem:[%s1834_s0 + $0xa0] sm:$0xff]   ;;  %v1337_v13 = vld [vmem:[%s1834_s0 + $0x30] sm:$0xff]   ;;  %v1339_v15 = vld [vmem:[%s1834_s0 + $0x38] sm:$0xff]  }
   0x6   :  { %1259 = vmatmul.mubr.msk.bf16.vlgmr.msra.gmra.mrb[0].mxu0 %vm254_vm0, %v1327_v3  ;;  %1291 = vmatmul.mubr.msk.bf16.vlgmr.msra.gmra.mrb[0].mxu1 %vm254_vm0, %v1328_v4  ;;  %v1338_v14 = vld [vmem:[%s1834_s0 + $0xb0] sm:$0xff]   ;;  %v1340_v16 = vld [vmem:[%s1834_s0 + $0xb8] sm:$0xff]   ;;  %v1341_v17 = vld [vmem:[%s1834_s0 + $0x40] sm:$0xff]  }
   0x7   :  { %1262 = vmatprep.mubr.msk.bf16.mxu0 %vm254_vm0, %v1329_v5  ;;  %1294 = vmatprep.mubr.msk.bf16.mxu1 %vm254_vm0, %v1330_v6  ;;  %v1342_v18 = vld [vmem:[%s1834_s0 + $0xc0] sm:$0xff]   ;;  %v1343_v19 = vld [vmem:[%s1834_s0 + $0x48] sm:$0xff]   ;;  %v1345_v21 = vld [vmem:[%s1834_s0 + $0x50] sm:$0xff]  }
   0x8   :  { %v1344_v20 = vld [vmem:[%s1834_s0 + $0xc8] sm:$0xff]   ;;  %v1346_v22 = vld [vmem:[%s1834_s0 + $0xd0] sm:$0xff]   ;;  %v1347_v23 = vld [vmem:[%s1834_s0 + $0x58] sm:$0xff]  }
   0x9   :  { %v1348_v24 = vld [vmem:[%s1834_s0 + $0xd8] sm:$0xff]   ;;  %v1349_v25 = vld [vmem:[%s1834_s0 + $0x60] sm:$0xff]   ;;  %v1351_v27 = vld [vmem:[%s1834_s0 + $0x68] sm:$0xff]  }
   0xa   :  { %v1350_v26 = vld [vmem:[%s1834_s0 + $0xe0] sm:$0xff]   ;;  %v1352_v28 = vld [vmem:[%s1834_s0 + $0xe8] sm:$0xff]   ;;  %v1353_v29 = vld [vmem:[%s1834_s0 + $0x70] sm:$0xff]  }
   0xb   :  { %v1354_v30 = vld [vmem:[%s1834_s0 + $0xf0] sm:$0xff]   ;;  %v1355_v31 = vld [vmem:[%s1834_s0 + $0x78] sm:$0xff]   ;;  %v1511_v33 = vld [vmem:[%s1835_s2] ss:$0 sm:$0xff] }
   0xc   :  { %v1356_v32 = vld [vmem:[%s1834_s0 + $0xf8] sm:$0xff]  }
   0xe   :  { %1263 = vmatmul.mubr.msk.bf16.gmra.mrb[4].mxu0 %vm254_vm0, %v1331_v7  ;;  %1295 = vmatmul.mubr.msk.bf16.gmra.mrb[4].mxu1 %vm254_vm0, %v1332_v8 }
   0xf   :  { %1266 = vmatprep.mubr.msk.bf16.mxu0 %vm254_vm0, %v1333_v9  ;;  %1298 = vmatprep.mubr.msk.bf16.mxu1 %vm254_vm0, %v1334_v10 }
  0x16   :  { %1267 = vmatmul.mubr.msk.bf16.gmra.mrb[8].mxu0 %vm254_vm0, %v1335_v11  ;;  %1299 = vmatmul.mubr.msk.bf16.gmra.mrb[8].mxu1 %vm254_vm0, %v1336_v12 }
  0x17   :  { %1270 = vmatprep.mubr.msk.bf16.mxu0 %vm254_vm0, %v1337_v13  ;;  %1302 = vmatprep.mubr.msk.bf16.mxu1 %vm254_vm0, %v1338_v14 }
  0x1e   :  { %1271 = vmatmul.mubr.msk.bf16.gmra.mrb[12].mxu0 %vm254_vm0, %v1339_v15  ;;  %1303 = vmatmul.mubr.msk.bf16.gmra.mrb[12].mxu1 %vm254_vm0, %v1340_v16 }
  0x1f   :  { %1274 = vmatprep.mubr.msk.bf16.mxu0 %vm254_vm0, %v1341_v17  ;;  %1306 = vmatprep.mubr.msk.bf16.mxu1 %vm254_vm0, %v1342_v18 }
  0x26   :  { %1275 = vmatmul.mubr.msk.bf16.gmra.mrb[16].mxu0 %vm254_vm0, %v1343_v19  ;;  %1307 = vmatmul.mubr.msk.bf16.gmra.mrb[16].mxu1 %vm254_vm0, %v1344_v20 }
  0x27   :  { %1278 = vmatprep.mubr.msk.bf16.mxu0 %vm254_vm0, %v1345_v21  ;;  %1310 = vmatprep.mubr.msk.bf16.mxu1 %vm254_vm0, %v1346_v22 }
  0x2e   :  { %1279 = vmatmul.mubr.msk.bf16.gmra.mrb[20].mxu0 %vm254_vm0, %v1347_v23  ;;  %1311 = vmatmul.mubr.msk.bf16.gmra.mrb[20].mxu1 %vm254_vm0, %v1348_v24 }
  0x2f   :  { %1282 = vmatprep.mubr.msk.bf16.mxu0 %vm254_vm0, %v1349_v25  ;;  %1314 = vmatprep.mubr.msk.bf16.mxu1 %vm254_vm0, %v1350_v26 }
  0x36   :  { %1283 = vmatmul.mubr.msk.bf16.gmra.mrb[24].mxu0 %vm254_vm0, %v1351_v27  ;;  %1315 = vmatmul.mubr.msk.bf16.gmra.mrb[24].mxu1 %vm254_vm0, %v1352_v28 }
  0x37   :  { %1286 = vmatprep.mubr.msk.bf16.mxu0 %vm254_vm0, %v1353_v29  ;;  %1318 = vmatprep.mubr.msk.bf16.mxu1 %vm254_vm0, %v1354_v30 }
  0x3e   :  { %1287 = vmatmul.mubr.msk.bf16.gmra.mrb[28].mxu0 %vm254_vm0, %v1355_v31  ;;  %1319 = vmatmul.mubr.msk.bf16.gmra.mrb[28].mxu1 %vm254_vm0, %v1356_v32 }
  0xd9   :  { %v1260_v34 = vpop.f32.mrb[0].mxu0  ;;  %v1292_v35 = vpop.f32.mrb[0].mxu1 }
  0xda   :  { %v394_v36 = vadd.f32 %v1260_v34, %v1511_v33  ;;  %v522_v37 = vadd.f32 %v1292_v35, %v1511_v33  ;;  %v385_v38 = vpop.f32.mrb[1].mxu0  ;;  %v513_v39 = vpop.f32.mrb[1].mxu1 }
  0xdb   :  { %v386_v40 = vadd.f32 %v1511_v33, %v385_v38  ;;  %v514_v41 = vadd.f32 %v1511_v33, %v513_v39  ;;  %v1261_v42 = vpop.f32.mrb[2].mxu0  ;;  %v1293_v43 = vpop.f32.mrb[2].mxu1 }
  0xdc   :  { %v642_v44 = vmax.f32 %v394_v36, 0.0  ;;  %v674_v45 = vmax.f32 %v522_v37, 0.0  ;;  %v397_v46 = vadd.f32 %v1261_v42, %v1511_v33  ;;  %v525_v47 = vadd.f32 %v1293_v43, %v1511_v33  ;;  %v388_v48 = vpop.f32.mrb[3].mxu0  ;;  %v516_v49 = vpop.f32.mrb[3].mxu1 }
  0xdd   :  { %v640_v50 = vmax.f32 %v386_v40, 0.0  ;;  %v672_v51 = vmax.f32 %v514_v41, 0.0  ;;  %v389_v52 = vadd.f32 %v1511_v33, %v388_v48  ;;  %v517_v53 = vadd.f32 %v1511_v33, %v516_v49 }
  0xde   :  { %v1161_v54 = vpack.c.bf16 %v642_v44, %v642_v44  ;;  %v1193_v55 = vpack.c.bf16 %v674_v45, %v674_v45  ;;  %v643_v56 = vmax.f32 %v397_v46, 0.0  ;;  %v675_v57 = vmax.f32 %v525_v47, 0.0 }
  0xdf   :  { %v1159_v58 = vpack.c.bf16 %v640_v50, %v640_v50  ;;  %v1191_v59 = vpack.c.bf16 %v672_v51, %v672_v51  ;;  %v641_v60 = vmax.f32 %v389_v52, 0.0  ;;  %v673_v61 = vmax.f32 %v517_v53, 0.0 }
  0xe0   :  { %963 = vst.msk [vmem:[%s1836_s3 + $0x8] sm:$0xf] %vm960_vm1, %v1161_v54  ;;  %995 = vst.msk [vmem:[%s1836_s3 + $0x88] sm:$0xf] %vm960_vm1, %v1193_v55  ;;  %v1162_v62 = vpack.c.bf16 %v643_v56, %v643_v56  ;;  %v1194_v63 = vpack.c.bf16 %v675_v57, %v675_v57 }
  0xe1   :  { %961 = vst.msk [vmem:[%s1836_s3] sm:$0xf] %vm960_vm1, %v1159_v58  ;;  %993 = vst.msk [vmem:[%s1836_s3 + $0x80] sm:$0xf] %vm960_vm1, %v1191_v59  ;;  %v1160_v0 = vpack.c.bf16 %v641_v60, %v641_v60  ;;  %v1192_v1 = vpack.c.bf16 %v673_v61, %v673_v61  ;;  %v1264_v2 = vpop.f32.mrb[4].mxu0  ;;  %v1296_v3 = vpop.f32.mrb[4].mxu1 }
  0xe2   :  { %964 = vst.msk [vmem:[%s1836_s3 + $0xc] sm:$0xf] %vm960_vm1, %v1162_v62  ;;  %996 = vst.msk [vmem:[%s1836_s3 + $0x8c] sm:$0xf] %vm960_vm1, %v1194_v63  ;;  %v410_v4 = vadd.f32 %v1264_v2, %v1511_v33  ;;  %v538_v5 = vadd.f32 %v1296_v3, %v1511_v33  ;;  %v401_v6 = vpop.f32.mrb[5].mxu0  ;;  %v529_v7 = vpop.f32.mrb[5].mxu1 }
  0xe3   :  { %962 = vst.msk [vmem:[%s1836_s3 + $0x4] sm:$0xf] %vm960_vm1, %v1160_v0  ;;  %994 = vst.msk [vmem:[%s1836_s3 + $0x84] sm:$0xf] %vm960_vm1, %v1192_v1  ;;  %v402_v8 = vadd.f32 %v1511_v33, %v401_v6  ;;  %v530_v9 = vadd.f32 %v1511_v33, %v529_v7  ;;  %v1265_v10 = vpop.f32.mrb[6].mxu0  ;;  %v1297_v11 = vpop.f32.mrb[6].mxu1 }
  0xe4   :  { %v646_v12 = vmax.f32 %v410_v4, 0.0  ;;  %v678_v13 = vmax.f32 %v538_v5, 0.0  ;;  %v413_v14 = vadd.f32 %v1265_v10, %v1511_v33  ;;  %v541_v15 = vadd.f32 %v1297_v11, %v1511_v33  ;;  %v404_v16 = vpop.f32.mrb[7].mxu0  ;;  %v532_v17 = vpop.f32.mrb[7].mxu1 }
  0xe5   :  { %v644_v18 = vmax.f32 %v402_v8, 0.0  ;;  %v676_v19 = vmax.f32 %v530_v9, 0.0  ;;  %v405_v20 = vadd.f32 %v1511_v33, %v404_v16  ;;  %v533_v21 = vadd.f32 %v1511_v33, %v532_v17 }
  0xe6   :  { %v1165_v22 = vpack.c.bf16 %v646_v12, %v646_v12  ;;  %v1197_v23 = vpack.c.bf16 %v678_v13, %v678_v13  ;;  %v647_v24 = vmax.f32 %v413_v14, 0.0  ;;  %v679_v25 = vmax.f32 %v541_v15, 0.0 }
  0xe7   :  { %v1163_v26 = vpack.c.bf16 %v644_v18, %v644_v18  ;;  %v1195_v27 = vpack.c.bf16 %v676_v19, %v676_v19  ;;  %v645_v28 = vmax.f32 %v405_v20, 0.0  ;;  %v677_v29 = vmax.f32 %v533_v21, 0.0 }
  0xe8   :  { %967 = vst.msk [vmem:[%s1836_s3 + $0x18] sm:$0xf] %vm960_vm1, %v1165_v22  ;;  %999 = vst.msk [vmem:[%s1836_s3 + $0x98] sm:$0xf] %vm960_vm1, %v1197_v23  ;;  %v1166_v30 = vpack.c.bf16 %v647_v24, %v647_v24  ;;  %v1198_v31 = vpack.c.bf16 %v679_v25, %v679_v25 }
  0xe9   :  { %965 = vst.msk [vmem:[%s1836_s3 + $0x10] sm:$0xf] %vm960_vm1, %v1163_v26  ;;  %997 = vst.msk [vmem:[%s1836_s3 + $0x90] sm:$0xf] %vm960_vm1, %v1195_v27  ;;  %v1164_v32 = vpack.c.bf16 %v645_v28, %v645_v28  ;;  %v1196_v34 = vpack.c.bf16 %v677_v29, %v677_v29  ;;  %v1268_v35 = vpop.f32.mrb[8].mxu0  ;;  %v1300_v36 = vpop.f32.mrb[8].mxu1 }
  0xea   :  { %968 = vst.msk [vmem:[%s1836_s3 + $0x1c] sm:$0xf] %vm960_vm1, %v1166_v30  ;;  %1000 = vst.msk [vmem:[%s1836_s3 + $0x9c] sm:$0xf] %vm960_vm1, %v1198_v31  ;;  %v426_v37 = vadd.f32 %v1268_v35, %v1511_v33  ;;  %v554_v38 = vadd.f32 %v1300_v36, %v1511_v33  ;;  %v417_v39 = vpop.f32.mrb[9].mxu0  ;;  %v545_v40 = vpop.f32.mrb[9].mxu1 }
  0xeb   :  { %966 = vst.msk [vmem:[%s1836_s3 + $0x14] sm:$0xf] %vm960_vm1, %v1164_v32  ;;  %998 = vst.msk [vmem:[%s1836_s3 + $0x94] sm:$0xf] %vm960_vm1, %v1196_v34  ;;  %v418_v41 = vadd.f32 %v1511_v33, %v417_v39  ;;  %v546_v42 = vadd.f32 %v1511_v33, %v545_v40  ;;  %v1269_v43 = vpop.f32.mrb[10].mxu0  ;;  %v1301_v44 = vpop.f32.mrb[10].mxu1 }
  0xec   :  { %v650_v45 = vmax.f32 %v426_v37, 0.0  ;;  %v682_v46 = vmax.f32 %v554_v38, 0.0  ;;  %v429_v47 = vadd.f32 %v1269_v43, %v1511_v33  ;;  %v557_v48 = vadd.f32 %v1301_v44, %v1511_v33  ;;  %v420_v49 = vpop.f32.mrb[11].mxu0  ;;  %v548_v50 = vpop.f32.mrb[11].mxu1 }
  0xed   :  { %v648_v51 = vmax.f32 %v418_v41, 0.0  ;;  %v680_v52 = vmax.f32 %v546_v42, 0.0  ;;  %v421_v53 = vadd.f32 %v1511_v33, %v420_v49  ;;  %v549_v54 = vadd.f32 %v1511_v33, %v548_v50 }
  0xee   :  { %v1169_v55 = vpack.c.bf16 %v650_v45, %v650_v45  ;;  %v1201_v56 = vpack.c.bf16 %v682_v46, %v682_v46  ;;  %v651_v57 = vmax.f32 %v429_v47, 0.0  ;;  %v683_v58 = vmax.f32 %v557_v48, 0.0 }
  0xef   :  { %v1167_v59 = vpack.c.bf16 %v648_v51, %v648_v51  ;;  %v1199_v60 = vpack.c.bf16 %v680_v52, %v680_v52  ;;  %v649_v61 = vmax.f32 %v421_v53, 0.0  ;;  %v681_v62 = vmax.f32 %v549_v54, 0.0 }
  0xf0   :  { %971 = vst.msk [vmem:[%s1836_s3 + $0x28] sm:$0xf] %vm960_vm1, %v1169_v55  ;;  %1003 = vst.msk [vmem:[%s1836_s3 + $0xa8] sm:$0xf] %vm960_vm1, %v1201_v56  ;;  %v1170_v63 = vpack.c.bf16 %v651_v57, %v651_v57  ;;  %v1202_v0 = vpack.c.bf16 %v683_v58, %v683_v58 }
  0xf1   :  { %969 = vst.msk [vmem:[%s1836_s3 + $0x20] sm:$0xf] %vm960_vm1, %v1167_v59  ;;  %1001 = vst.msk [vmem:[%s1836_s3 + $0xa0] sm:$0xf] %vm960_vm1, %v1199_v60  ;;  %v1168_v1 = vpack.c.bf16 %v649_v61, %v649_v61  ;;  %v1200_v2 = vpack.c.bf16 %v681_v62, %v681_v62  ;;  %v1272_v3 = vpop.f32.mrb[12].mxu0  ;;  %v1304_v4 = vpop.f32.mrb[12].mxu1 }
  0xf2   :  { %972 = vst.msk [vmem:[%s1836_s3 + $0x2c] sm:$0xf] %vm960_vm1, %v1170_v63  ;;  %1004 = vst.msk [vmem:[%s1836_s3 + $0xac] sm:$0xf] %vm960_vm1, %v1202_v0  ;;  %v442_v5 = vadd.f32 %v1272_v3, %v1511_v33  ;;  %v570_v6 = vadd.f32 %v1304_v4, %v1511_v33  ;;  %v433_v7 = vpop.f32.mrb[13].mxu0  ;;  %v561_v8 = vpop.f32.mrb[13].mxu1 }
  0xf3   :  { %970 = vst.msk [vmem:[%s1836_s3 + $0x24] sm:$0xf] %vm960_vm1, %v1168_v1  ;;  %1002 = vst.msk [vmem:[%s1836_s3 + $0xa4] sm:$0xf] %vm960_vm1, %v1200_v2  ;;  %v434_v9 = vadd.f32 %v1511_v33, %v433_v7  ;;  %v562_v10 = vadd.f32 %v1511_v33, %v561_v8  ;;  %v1273_v11 = vpop.f32.mrb[14].mxu0  ;;  %v1305_v12 = vpop.f32.mrb[14].mxu1 }
  0xf4   :  { %v654_v13 = vmax.f32 %v442_v5, 0.0  ;;  %v686_v14 = vmax.f32 %v570_v6, 0.0  ;;  %v445_v15 = vadd.f32 %v1273_v11, %v1511_v33  ;;  %v573_v16 = vadd.f32 %v1305_v12, %v1511_v33  ;;  %v436_v17 = vpop.f32.mrb[15].mxu0  ;;  %v564_v18 = vpop.f32.mrb[15].mxu1 }
  0xf5   :  { %v652_v19 = vmax.f32 %v434_v9, 0.0  ;;  %v684_v20 = vmax.f32 %v562_v10, 0.0  ;;  %v437_v21 = vadd.f32 %v1511_v33, %v436_v17  ;;  %v565_v22 = vadd.f32 %v1511_v33, %v564_v18 }
  0xf6   :  { %v1173_v23 = vpack.c.bf16 %v654_v13, %v654_v13  ;;  %v1205_v24 = vpack.c.bf16 %v686_v14, %v686_v14  ;;  %v655_v25 = vmax.f32 %v445_v15, 0.0  ;;  %v687_v26 = vmax.f32 %v573_v16, 0.0 }
  0xf7   :  { %v1171_v27 = vpack.c.bf16 %v652_v19, %v652_v19  ;;  %v1203_v28 = vpack.c.bf16 %v684_v20, %v684_v20  ;;  %v653_v29 = vmax.f32 %v437_v21, 0.0  ;;  %v685_v30 = vmax.f32 %v565_v22, 0.0 }
  0xf8   :  { %975 = vst.msk [vmem:[%s1836_s3 + $0x38] sm:$0xf] %vm960_vm1, %v1173_v23  ;;  %1007 = vst.msk [vmem:[%s1836_s3 + $0xb8] sm:$0xf] %vm960_vm1, %v1205_v24  ;;  %v1174_v31 = vpack.c.bf16 %v655_v25, %v655_v25  ;;  %v1206_v32 = vpack.c.bf16 %v687_v26, %v687_v26 }
  0xf9   :  { %973 = vst.msk [vmem:[%s1836_s3 + $0x30] sm:$0xf] %vm960_vm1, %v1171_v27  ;;  %1005 = vst.msk [vmem:[%s1836_s3 + $0xb0] sm:$0xf] %vm960_vm1, %v1203_v28  ;;  %v1172_v34 = vpack.c.bf16 %v653_v29, %v653_v29  ;;  %v1204_v35 = vpack.c.bf16 %v685_v30, %v685_v30  ;;  %v1276_v36 = vpop.f32.mrb[16].mxu0  ;;  %v1308_v37 = vpop.f32.mrb[16].mxu1 }
  0xfa   :  { %976 = vst.msk [vmem:[%s1836_s3 + $0x3c] sm:$0xf] %vm960_vm1, %v1174_v31  ;;  %1008 = vst.msk [vmem:[%s1836_s3 + $0xbc] sm:$0xf] %vm960_vm1, %v1206_v32  ;;  %v458_v38 = vadd.f32 %v1276_v36, %v1511_v33  ;;  %v586_v39 = vadd.f32 %v1308_v37, %v1511_v33  ;;  %v449_v40 = vpop.f32.mrb[17].mxu0  ;;  %v577_v41 = vpop.f32.mrb[17].mxu1 }
  0xfb   :  { %974 = vst.msk [vmem:[%s1836_s3 + $0x34] sm:$0xf] %vm960_vm1, %v1172_v34  ;;  %1006 = vst.msk [vmem:[%s1836_s3 + $0xb4] sm:$0xf] %vm960_vm1, %v1204_v35  ;;  %v450_v42 = vadd.f32 %v1511_v33, %v449_v40  ;;  %v578_v43 = vadd.f32 %v1511_v33, %v577_v41  ;;  %v1277_v44 = vpop.f32.mrb[18].mxu0  ;;  %v1309_v45 = vpop.f32.mrb[18].mxu1 }
  0xfc   :  { %v658_v46 = vmax.f32 %v458_v38, 0.0  ;;  %v690_v47 = vmax.f32 %v586_v39, 0.0  ;;  %v461_v48 = vadd.f32 %v1277_v44, %v1511_v33  ;;  %v589_v49 = vadd.f32 %v1309_v45, %v1511_v33  ;;  %v452_v50 = vpop.f32.mrb[19].mxu0  ;;  %v580_v51 = vpop.f32.mrb[19].mxu1 }
  0xfd   :  { %v656_v52 = vmax.f32 %v450_v42, 0.0  ;;  %v688_v53 = vmax.f32 %v578_v43, 0.0  ;;  %v453_v54 = vadd.f32 %v1511_v33, %v452_v50  ;;  %v581_v55 = vadd.f32 %v1511_v33, %v580_v51 }
  0xfe   :  { %v1177_v56 = vpack.c.bf16 %v658_v46, %v658_v46  ;;  %v1209_v57 = vpack.c.bf16 %v690_v47, %v690_v47  ;;  %v659_v58 = vmax.f32 %v461_v48, 0.0  ;;  %v691_v59 = vmax.f32 %v589_v49, 0.0 }
  0xff   :  { %v1175_v60 = vpack.c.bf16 %v656_v52, %v656_v52  ;;  %v1207_v61 = vpack.c.bf16 %v688_v53, %v688_v53  ;;  %v657_v62 = vmax.f32 %v453_v54, 0.0  ;;  %v689_v63 = vmax.f32 %v581_v55, 0.0 }
 0x100   :  { %979 = vst.msk [vmem:[%s1836_s3 + $0x48] sm:$0xf] %vm960_vm1, %v1177_v56  ;;  %1011 = vst.msk [vmem:[%s1836_s3 + $0xc8] sm:$0xf] %vm960_vm1, %v1209_v57  ;;  %v1178_v0 = vpack.c.bf16 %v659_v58, %v659_v58  ;;  %v1210_v1 = vpack.c.bf16 %v691_v59, %v691_v59 }
 0x101   :  { %977 = vst.msk [vmem:[%s1836_s3 + $0x40] sm:$0xf] %vm960_vm1, %v1175_v60  ;;  %1009 = vst.msk [vmem:[%s1836_s3 + $0xc0] sm:$0xf] %vm960_vm1, %v1207_v61  ;;  %v1176_v2 = vpack.c.bf16 %v657_v62, %v657_v62  ;;  %v1208_v3 = vpack.c.bf16 %v689_v63, %v689_v63  ;;  %v1280_v4 = vpop.f32.mrb[20].mxu0  ;;  %v1312_v5 = vpop.f32.mrb[20].mxu1 }
 0x102   :  { %980 = vst.msk [vmem:[%s1836_s3 + $0x4c] sm:$0xf] %vm960_vm1, %v1178_v0  ;;  %1012 = vst.msk [vmem:[%s1836_s3 + $0xcc] sm:$0xf] %vm960_vm1, %v1210_v1  ;;  %v474_v6 = vadd.f32 %v1280_v4, %v1511_v33  ;;  %v602_v7 = vadd.f32 %v1312_v5, %v1511_v33  ;;  %v465_v8 = vpop.f32.mrb[21].mxu0  ;;  %v593_v9 = vpop.f32.mrb[21].mxu1 }
 0x103   :  { %978 = vst.msk [vmem:[%s1836_s3 + $0x44] sm:$0xf] %vm960_vm1, %v1176_v2  ;;  %1010 = vst.msk [vmem:[%s1836_s3 + $0xc4] sm:$0xf] %vm960_vm1, %v1208_v3  ;;  %v466_v10 = vadd.f32 %v1511_v33, %v465_v8  ;;  %v594_v11 = vadd.f32 %v1511_v33, %v593_v9  ;;  %v1281_v12 = vpop.f32.mrb[22].mxu0  ;;  %v1313_v13 = vpop.f32.mrb[22].mxu1 }
 0x104   :  { %v662_v14 = vmax.f32 %v474_v6, 0.0  ;;  %v694_v15 = vmax.f32 %v602_v7, 0.0  ;;  %v477_v16 = vadd.f32 %v1281_v12, %v1511_v33  ;;  %v605_v17 = vadd.f32 %v1313_v13, %v1511_v33  ;;  %v468_v18 = vpop.f32.mrb[23].mxu0  ;;  %v596_v19 = vpop.f32.mrb[23].mxu1 }
 0x105   :  { %v660_v20 = vmax.f32 %v466_v10, 0.0  ;;  %v692_v21 = vmax.f32 %v594_v11, 0.0  ;;  %v469_v22 = vadd.f32 %v1511_v33, %v468_v18  ;;  %v597_v23 = vadd.f32 %v1511_v33, %v596_v19 }
 0x106   :  { %v1181_v24 = vpack.c.bf16 %v662_v14, %v662_v14  ;;  %v1213_v25 = vpack.c.bf16 %v694_v15, %v694_v15  ;;  %v663_v26 = vmax.f32 %v477_v16, 0.0  ;;  %v695_v27 = vmax.f32 %v605_v17, 0.0 }
 0x107   :  { %v1179_v28 = vpack.c.bf16 %v660_v20, %v660_v20  ;;  %v1211_v29 = vpack.c.bf16 %v692_v21, %v692_v21  ;;  %v661_v30 = vmax.f32 %v469_v22, 0.0  ;;  %v693_v31 = vmax.f32 %v597_v23, 0.0 }
 0x108   :  { %983 = vst.msk [vmem:[%s1836_s3 + $0x58] sm:$0xf] %vm960_vm1, %v1181_v24  ;;  %1015 = vst.msk [vmem:[%s1836_s3 + $0xd8] sm:$0xf] %vm960_vm1, %v1213_v25  ;;  %v1182_v32 = vpack.c.bf16 %v663_v26, %v663_v26  ;;  %v1214_v34 = vpack.c.bf16 %v695_v27, %v695_v27 }
 0x109   :  { %981 = vst.msk [vmem:[%s1836_s3 + $0x50] sm:$0xf] %vm960_vm1, %v1179_v28  ;;  %1013 = vst.msk [vmem:[%s1836_s3 + $0xd0] sm:$0xf] %vm960_vm1, %v1211_v29  ;;  %v1180_v35 = vpack.c.bf16 %v661_v30, %v661_v30  ;;  %v1212_v36 = vpack.c.bf16 %v693_v31, %v693_v31  ;;  %v1284_v37 = vpop.f32.mrb[24].mxu0  ;;  %v1316_v38 = vpop.f32.mrb[24].mxu1 }
 0x10a   :  { %984 = vst.msk [vmem:[%s1836_s3 + $0x5c] sm:$0xf] %vm960_vm1, %v1182_v32  ;;  %1016 = vst.msk [vmem:[%s1836_s3 + $0xdc] sm:$0xf] %vm960_vm1, %v1214_v34  ;;  %v490_v39 = vadd.f32 %v1284_v37, %v1511_v33  ;;  %v618_v40 = vadd.f32 %v1316_v38, %v1511_v33  ;;  %v481_v41 = vpop.f32.mrb[25].mxu0  ;;  %v609_v42 = vpop.f32.mrb[25].mxu1 }
 0x10b   :  { %982 = vst.msk [vmem:[%s1836_s3 + $0x54] sm:$0xf] %vm960_vm1, %v1180_v35  ;;  %1014 = vst.msk [vmem:[%s1836_s3 + $0xd4] sm:$0xf] %vm960_vm1, %v1212_v36  ;;  %v482_v43 = vadd.f32 %v1511_v33, %v481_v41  ;;  %v610_v44 = vadd.f32 %v1511_v33, %v609_v42  ;;  %v1285_v45 = vpop.f32.mrb[26].mxu0  ;;  %v1317_v46 = vpop.f32.mrb[26].mxu1 }
 0x10c   :  { %v666_v47 = vmax.f32 %v490_v39, 0.0  ;;  %v698_v48 = vmax.f32 %v618_v40, 0.0  ;;  %v493_v49 = vadd.f32 %v1285_v45, %v1511_v33  ;;  %v621_v50 = vadd.f32 %v1317_v46, %v1511_v33  ;;  %v484_v51 = vpop.f32.mrb[27].mxu0  ;;  %v612_v52 = vpop.f32.mrb[27].mxu1 }
 0x10d   :  { %v664_v53 = vmax.f32 %v482_v43, 0.0  ;;  %v696_v54 = vmax.f32 %v610_v44, 0.0  ;;  %v485_v55 = vadd.f32 %v1511_v33, %v484_v51  ;;  %v613_v56 = vadd.f32 %v1511_v33, %v612_v52 }
 0x10e   :  { %v1185_v57 = vpack.c.bf16 %v666_v47, %v666_v47  ;;  %v1217_v58 = vpack.c.bf16 %v698_v48, %v698_v48  ;;  %v667_v59 = vmax.f32 %v493_v49, 0.0  ;;  %v699_v60 = vmax.f32 %v621_v50, 0.0 }
 0x10f   :  { %v1183_v61 = vpack.c.bf16 %v664_v53, %v664_v53  ;;  %v1215_v62 = vpack.c.bf16 %v696_v54, %v696_v54  ;;  %v665_v63 = vmax.f32 %v485_v55, 0.0  ;;  %v697_v0 = vmax.f32 %v613_v56, 0.0 }
 0x110   :  { %987 = vst.msk [vmem:[%s1836_s3 + $0x68] sm:$0xf] %vm960_vm1, %v1185_v57  ;;  %1019 = vst.msk [vmem:[%s1836_s3 + $0xe8] sm:$0xf] %vm960_vm1, %v1217_v58  ;;  %v1186_v1 = vpack.c.bf16 %v667_v59, %v667_v59  ;;  %v1218_v2 = vpack.c.bf16 %v699_v60, %v699_v60 }
 0x111   :  { %985 = vst.msk [vmem:[%s1836_s3 + $0x60] sm:$0xf] %vm960_vm1, %v1183_v61  ;;  %1017 = vst.msk [vmem:[%s1836_s3 + $0xe0] sm:$0xf] %vm960_vm1, %v1215_v62  ;;  %v1184_v3 = vpack.c.bf16 %v665_v63, %v665_v63  ;;  %v1216_v4 = vpack.c.bf16 %v697_v0, %v697_v0  ;;  %v1288_v5 = vpop.f32.mrb[28].mxu0  ;;  %v1320_v6 = vpop.f32.mrb[28].mxu1 }
 0x112   :  { %988 = vst.msk [vmem:[%s1836_s3 + $0x6c] sm:$0xf] %vm960_vm1, %v1186_v1  ;;  %1020 = vst.msk [vmem:[%s1836_s3 + $0xec] sm:$0xf] %vm960_vm1, %v1218_v2  ;;  %v506_v7 = vadd.f32 %v1288_v5, %v1511_v33  ;;  %v634_v8 = vadd.f32 %v1320_v6, %v1511_v33  ;;  %v497_v9 = vpop.f32.mrb[29].mxu0  ;;  %v625_v10 = vpop.f32.mrb[29].mxu1 }
 0x113   :  { %986 = vst.msk [vmem:[%s1836_s3 + $0x64] sm:$0xf] %vm960_vm1, %v1184_v3  ;;  %1018 = vst.msk [vmem:[%s1836_s3 + $0xe4] sm:$0xf] %vm960_vm1, %v1216_v4  ;;  %v498_v11 = vadd.f32 %v1511_v33, %v497_v9  ;;  %v626_v12 = vadd.f32 %v1511_v33, %v625_v10  ;;  %v1289_v13 = vpop.f32.mrb[30].mxu0  ;;  %v1321_v14 = vpop.f32.mrb[30].mxu1 }
 0x114   :  { %v670_v15 = vmax.f32 %v506_v7, 0.0  ;;  %v702_v16 = vmax.f32 %v634_v8, 0.0  ;;  %v509_v17 = vadd.f32 %v1289_v13, %v1511_v33  ;;  %v637_v18 = vadd.f32 %v1321_v14, %v1511_v33  ;;  %v500_v19 = vpop.f32.mrb[31].mxu0  ;;  %v628_v20 = vpop.f32.mrb[31].mxu1 }
 0x115   :  { %v668_v21 = vmax.f32 %v498_v11, 0.0  ;;  %v700_v22 = vmax.f32 %v626_v12, 0.0  ;;  %v501_v23 = vadd.f32 %v1511_v33, %v500_v19  ;;  %v629_v24 = vadd.f32 %v1511_v33, %v628_v20 }
 0x116   :  { %v1189_v25 = vpack.c.bf16 %v670_v15, %v670_v15  ;;  %v1221_v26 = vpack.c.bf16 %v702_v16, %v702_v16  ;;  %v671_v27 = vmax.f32 %v509_v17, 0.0  ;;  %v703_v28 = vmax.f32 %v637_v18, 0.0 }
 0x117   :  { %v1187_v29 = vpack.c.bf16 %v668_v21, %v668_v21  ;;  %v1219_v30 = vpack.c.bf16 %v700_v22, %v700_v22  ;;  %v669_v31 = vmax.f32 %v501_v23, 0.0  ;;  %v701_v32 = vmax.f32 %v629_v24, 0.0 }
 0x118   :  { %991 = vst.msk [vmem:[%s1836_s3 + $0x78] sm:$0xf] %vm960_vm1, %v1189_v25  ;;  %1023 = vst.msk [vmem:[%s1836_s3 + $0xf8] sm:$0xf] %vm960_vm1, %v1221_v26  ;;  %v1190_v34 = vpack.c.bf16 %v671_v27, %v671_v27  ;;  %v1222_v33 = vpack.c.bf16 %v703_v28, %v703_v28 }
 0x119   :  { %989 = vst.msk [vmem:[%s1836_s3 + $0x70] sm:$0xf] %vm960_vm1, %v1187_v29  ;;  %1021 = vst.msk [vmem:[%s1836_s3 + $0xf0] sm:$0xf] %vm960_vm1, %v1219_v30  ;;  %v1188_v35 = vpack.c.bf16 %v669_v31, %v669_v31  ;;  %v1220_v36 = vpack.c.bf16 %v701_v32, %v701_v32 }
 0x11a   :  { %992 = vst.msk [vmem:[%s1836_s3 + $0x7c] sm:$0xf] %vm960_vm1, %v1190_v34  ;;  %1024 = vst.msk [vmem:[%s1836_s3 + $0xfc] sm:$0xf] %vm960_vm1, %v1222_v33 }
 0x11b   :  { %990 = vst.msk [vmem:[%s1836_s3 + $0x74] sm:$0xf] %vm960_vm1, %v1188_v35  ;;  %1022 = vst.msk [vmem:[%s1836_s3 + $0xf4] sm:$0xf] %vm960_vm1, %v1220_v36 }

// kernel: bottleneck_forward.5
= control target key start
LH: loop header
LB: loop body
LE: loop exit
PB: predicated region body
PF: predicated region fallthrough
CT: control target
= control target key end

     0   :  { %vm347_vm0 = vcmask 1041408   ;;  %vm250_vm1 = vcmask 31744   ;;  %vm832_vm2 = vcmask 130048   ;;  %s1774_s1 = inlined_call_operand.vmem [shape: bf16[4,16], index: 1, kind: input, shape index: {}]   ;;  %s1775_s0 = inlined_call_operand.vmem [shape: bf16[512,4], index: 0, kind: input, shape index: {}]   ;;  %s1776_s2 = inlined_call_operand.vmem [shape: f32[1,16], index: 2, kind: input, shape index: {}]   ;;  %s1777_s3 = inlined_call_operand.vmem [shape: f32[512,16], index: 3, kind: input, shape index: {}]   ;;  %s1778_s4 = inlined_call_operand.vmem [shape: f32[512,16], index: 4, kind: output, shape index: {}]  }
   0x1   :  { %v82_v0 = vld [vmem:[%s1774_s1] sm:$0x3]  ;;  %v1071_v4 = vld [vmem:[%s1775_s0 + $0x8] sm:$0xff]   ;;  %v1073_v6 = vld [vmem:[%s1775_s0 + $0x10] sm:$0xff]  }
   0x2   :  { %1067 = vmatprep.subr.msk.bf16.mxu0 %vm347_vm0, %v82_v0  ;;  %1068 = vmatprep.subr.msk.bf16.mxu1 %vm347_vm0, %v82_v0  ;;  %v349_v1 = vsel %vm347_vm0, %v82_v0, 0  ;;  %v1069_v2 = vld [vmem:[%s1775_s0] sm:$0xff]   ;;  %v1072_v5 = vld [vmem:[%s1775_s0 + $0x88] sm:$0xff]   ;;  %v1074_v7 = vld [vmem:[%s1775_s0 + $0x90] sm:$0xff]  }
   0x3   :  { %1000 = vmatpush3.bf16.msra.mxu0 %v349_v1  ;;  %1066 = vmatpush3.bf16.msra.mxu1 %v349_v1  ;;  %v1070_v3 = vld [vmem:[%s1775_s0 + $0x80] sm:$0xff]   ;;  %v1075_v8 = vld [vmem:[%s1775_s0 + $0x18] sm:$0xff]   ;;  %v1079_v12 = vld [vmem:[%s1775_s0 + $0x28] sm:$0xff]  }
   0x4   :  { %1001 = vmatprep.mubr.msk.bf16.mxu0 %vm250_vm1, %v1069_v2  ;;  %1033 = vmatprep.mubr.msk.bf16.mxu1 %vm250_vm1, %v1070_v3  ;;  %v1076_v9 = vld [vmem:[%s1775_s0 + $0x98] sm:$0xff]   ;;  %v1077_v10 = vld [vmem:[%s1775_s0 + $0x20] sm:$0xff]   ;;  %v1080_v13 = vld [vmem:[%s1775_s0 + $0xa8] sm:$0xff]  }
   0x5   :  { %v1078_v11 = vld [vmem:[%s1775_s0 + $0xa0] sm:$0xff]   ;;  %v1081_v14 = vld [vmem:[%s1775_s0 + $0x30] sm:$0xff]   ;;  %v1083_v16 = vld [vmem:[%s1775_s0 + $0x38] sm:$0xff]  }
   0x6   :  { %1002 = vmatmul.mubr.msk.bf16.vlgmr.msra.gmra.mrb[0].mxu0 %vm250_vm1, %v1071_v4  ;;  %1034 = vmatmul.mubr.msk.bf16.vlgmr.msra.gmra.mrb[0].mxu1 %vm250_vm1, %v1072_v5  ;;  %v1082_v15 = vld [vmem:[%s1775_s0 + $0xb0] sm:$0xff]   ;;  %v1084_v17 = vld [vmem:[%s1775_s0 + $0xb8] sm:$0xff]   ;;  %v1085_v18 = vld [vmem:[%s1775_s0 + $0x40] sm:$0xff]  }
   0x7   :  { %1005 = vmatprep.mubr.msk.bf16.mxu0 %vm250_vm1, %v1073_v6  ;;  %1037 = vmatprep.mubr.msk.bf16.mxu1 %vm250_vm1, %v1074_v7  ;;  %v1086_v19 = vld [vmem:[%s1775_s0 + $0xc0] sm:$0xff]   ;;  %v1087_v20 = vld [vmem:[%s1775_s0 + $0x48] sm:$0xff]   ;;  %v1089_v22 = vld [vmem:[%s1775_s0 + $0x50] sm:$0xff]  }
   0x8   :  { %v1088_v21 = vld [vmem:[%s1775_s0 + $0xc8] sm:$0xff]   ;;  %v1090_v23 = vld [vmem:[%s1775_s0 + $0xd0] sm:$0xff]   ;;  %v1091_v24 = vld [vmem:[%s1775_s0 + $0x58] sm:$0xff]  }
   0x9   :  { %v1092_v25 = vld [vmem:[%s1775_s0 + $0xd8] sm:$0xff]   ;;  %v1093_v26 = vld [vmem:[%s1775_s0 + $0x60] sm:$0xff]   ;;  %v1095_v28 = vld [vmem:[%s1775_s0 + $0x68] sm:$0xff]  }
   0xa   :  { %v1094_v27 = vld [vmem:[%s1775_s0 + $0xe0] sm:$0xff]   ;;  %v1096_v29 = vld [vmem:[%s1775_s0 + $0xe8] sm:$0xff]   ;;  %v1097_v30 = vld [vmem:[%s1775_s0 + $0x70] sm:$0xff]  }
   0xb   :  { %v1098_v31 = vld [vmem:[%s1775_s0 + $0xf0] sm:$0xff]   ;;  %v1099_v32 = vld [vmem:[%s1775_s0 + $0x78] sm:$0xff]   ;;  %v1260_v34 = vld [vmem:[%s1776_s2] ss:$0 sm:$0xff] }
   0xc   :  { %v1100_v33 = vld [vmem:[%s1775_s0 + $0xf8] sm:$0xff]   ;;  %v642_v36 = vld [vmem:[%s1777_s3 + $0x10] sm:$0xff]  ;;  %v640_v41 = vld [vmem:[%s1777_s3] sm:$0xff] }
   0xd   :  { %v674_v39 = vld [vmem:[%s1777_s3 + $0x110] sm:$0xff]  ;;  %v672_v45 = vld [vmem:[%s1777_s3 + $0x100] sm:$0xff]  ;;  %v643_v47 = vld [vmem:[%s1777_s3 + $0x18] sm:$0xff] }
   0xe   :  { %1006 = vmatmul.mubr.msk.bf16.gmra.mrb[4].mxu0 %vm250_vm1, %v1075_v8  ;;  %1038 = vmatmul.mubr.msk.bf16.gmra.mrb[4].mxu1 %vm250_vm1, %v1076_v9  ;;  %v675_v52 = vld [vmem:[%s1777_s3 + $0x118] sm:$0xff]  ;;  %v641_v54 = vld [vmem:[%s1777_s3 + $0x8] sm:$0xff] }
   0xf   :  { %1009 = vmatprep.mubr.msk.bf16.mxu0 %vm250_vm1, %v1077_v10  ;;  %1041 = vmatprep.mubr.msk.bf16.mxu1 %vm250_vm1, %v1078_v11  ;;  %v673_v60 = vld [vmem:[%s1777_s3 + $0x108] sm:$0xff]  ;;  %v646_v11 = vld [vmem:[%s1777_s3 + $0x30] sm:$0xff] }
  0x16   :  { %1010 = vmatmul.mubr.msk.bf16.gmra.mrb[8].mxu0 %vm250_vm1, %v1079_v12  ;;  %1042 = vmatmul.mubr.msk.bf16.gmra.mrb[8].mxu1 %vm250_vm1, %v1080_v13 }
  0x17   :  { %1013 = vmatprep.mubr.msk.bf16.mxu0 %vm250_vm1, %v1081_v14  ;;  %1045 = vmatprep.mubr.msk.bf16.mxu1 %vm250_vm1, %v1082_v15  ;;  %v678_v15 = vld [vmem:[%s1777_s3 + $0x130] sm:$0xff] }
  0x1e   :  { %1014 = vmatmul.mubr.msk.bf16.gmra.mrb[12].mxu0 %vm250_vm1, %v1083_v16  ;;  %1046 = vmatmul.mubr.msk.bf16.gmra.mrb[12].mxu1 %vm250_vm1, %v1084_v17  ;;  %v644_v17 = vld [vmem:[%s1777_s3 + $0x20] sm:$0xff] }
  0x1f   :  { %1017 = vmatprep.mubr.msk.bf16.mxu0 %vm250_vm1, %v1085_v18  ;;  %1049 = vmatprep.mubr.msk.bf16.mxu1 %vm250_vm1, %v1086_v19 }
  0x26   :  { %1018 = vmatmul.mubr.msk.bf16.gmra.mrb[16].mxu0 %vm250_vm1, %v1087_v20  ;;  %1050 = vmatmul.mubr.msk.bf16.gmra.mrb[16].mxu1 %vm250_vm1, %v1088_v21  ;;  %v676_v21 = vld [vmem:[%s1777_s3 + $0x120] sm:$0xff] }
  0x27   :  { %1021 = vmatprep.mubr.msk.bf16.mxu0 %vm250_vm1, %v1089_v22  ;;  %1053 = vmatprep.mubr.msk.bf16.mxu1 %vm250_vm1, %v1090_v23  ;;  %v647_v23 = vld [vmem:[%s1777_s3 + $0x38] sm:$0xff] }
  0x2e   :  { %1022 = vmatmul.mubr.msk.bf16.gmra.mrb[20].mxu0 %vm250_vm1, %v1091_v24  ;;  %1054 = vmatmul.mubr.msk.bf16.gmra.mrb[20].mxu1 %vm250_vm1, %v1092_v25 }
  0x2f   :  { %1025 = vmatprep.mubr.msk.bf16.mxu0 %vm250_vm1, %v1093_v26  ;;  %1057 = vmatprep.mubr.msk.bf16.mxu1 %vm250_vm1, %v1094_v27 }
  0x36   :  { %1026 = vmatmul.mubr.msk.bf16.gmra.mrb[24].mxu0 %vm250_vm1, %v1095_v28  ;;  %1058 = vmatmul.mubr.msk.bf16.gmra.mrb[24].mxu1 %vm250_vm1, %v1096_v29  ;;  %v679_v28 = vld [vmem:[%s1777_s3 + $0x138] sm:$0xff] }
  0x37   :  { %1029 = vmatprep.mubr.msk.bf16.mxu0 %vm250_vm1, %v1097_v30  ;;  %1061 = vmatprep.mubr.msk.bf16.mxu1 %vm250_vm1, %v1098_v31  ;;  %v645_v30 = vld [vmem:[%s1777_s3 + $0x28] sm:$0xff] }
  0x3e   :  { %1030 = vmatmul.mubr.msk.bf16.gmra.mrb[28].mxu0 %vm250_vm1, %v1099_v32  ;;  %1062 = vmatmul.mubr.msk.bf16.gmra.mrb[28].mxu1 %vm250_vm1, %v1100_v33 }
  0xd9   :  { %v1003_v35 = vpop.f32.mrb[0].mxu0  ;;  %v1035_v38 = vpop.f32.mrb[0].mxu1 }
  0xda   :  { %v394_v37 = vadd.f32 %v1003_v35, %v1260_v34  ;;  %v385_v40 = vpop.f32.mrb[1].mxu0  ;;  %v522_v42 = vadd.f32 %v1035_v38, %v1260_v34  ;;  %v513_v44 = vpop.f32.mrb[1].mxu1 }
  0xdb   :  { %v386_v43 = vadd.f32 %v1260_v34, %v385_v40  ;;  %v1004_v46 = vpop.f32.mrb[2].mxu0  ;;  %v514_v49 = vadd.f32 %v1260_v34, %v513_v44  ;;  %v1036_v51 = vpop.f32.mrb[2].mxu1 }
  0xdc   :  { %v706_v48 = vadd.f32 %v642_v36, %v394_v37  ;;  %v397_v50 = vadd.f32 %v1004_v46, %v1260_v34  ;;  %v388_v53 = vpop.f32.mrb[3].mxu0  ;;  %v738_v55 = vadd.f32 %v674_v39, %v522_v42  ;;  %v525_v57 = vadd.f32 %v1036_v51, %v1260_v34  ;;  %v516_v59 = vpop.f32.mrb[3].mxu1  ;;  %v677_v37 = vld [vmem:[%s1777_s3 + $0x128] sm:$0xff] }
  0xdd   :  { %v704_v56 = vadd.f32 %v640_v41, %v386_v43  ;;  %v389_v58 = vadd.f32 %v1260_v34, %v388_v53  ;;  %v736_v62 = vadd.f32 %v672_v45, %v514_v49  ;;  %v517_v0 = vadd.f32 %v1260_v34, %v516_v59 }
  0xde   :  { %v770_v61 = vmax.f32 %v706_v48, 0.0  ;;  %v707_v63 = vadd.f32 %v643_v47, %v397_v50  ;;  %v802_v1 = vmax.f32 %v738_v55, 0.0  ;;  %v739_v3 = vadd.f32 %v675_v52, %v525_v57  ;;  %v650_v52 = vld [vmem:[%s1777_s3 + $0x50] sm:$0xff] }
  0xdf   :  { %v768_v2 = vmax.f32 %v704_v56, 0.0  ;;  %v705_v4 = vadd.f32 %v641_v54, %v389_v58  ;;  %v800_v5 = vmax.f32 %v736_v62, 0.0  ;;  %v737_v7 = vadd.f32 %v673_v60, %v517_v0  ;;  %v682_v56 = vld [vmem:[%s1777_s3 + $0x150] sm:$0xff]  ;;  %v648_v58 = vld [vmem:[%s1777_s3 + $0x40] sm:$0xff]  ;;  %v651_v0 = vld [vmem:[%s1777_s3 + $0x58] sm:$0xff] }
  0xe0   :  { %835 = vst.msk [vmem:[%s1778_s4 + $0x10] sm:$0xff] %vm832_vm2, %v770_v61  ;;  %v771_v6 = vmax.f32 %v707_v63, 0.0  ;;  %867 = vst.msk [vmem:[%s1778_s4 + $0x110] sm:$0xff] %vm832_vm2, %v802_v1  ;;  %v803_v8 = vmax.f32 %v739_v3, 0.0  ;;  %v680_v62 = vld [vmem:[%s1777_s3 + $0x140] sm:$0xff] }
  0xe1   :  { %833 = vst.msk [vmem:[%s1778_s4] sm:$0xff] %vm832_vm2, %v768_v2  ;;  %v769_v9 = vmax.f32 %v705_v4, 0.0  ;;  %v1007_v10 = vpop.f32.mrb[4].mxu0  ;;  %865 = vst.msk [vmem:[%s1778_s4 + $0x100] sm:$0xff] %vm832_vm2, %v800_v5  ;;  %v801_v12 = vmax.f32 %v737_v7, 0.0  ;;  %v1039_v14 = vpop.f32.mrb[4].mxu1 }
  0xe2   :  { %836 = vst.msk [vmem:[%s1778_s4 + $0x18] sm:$0xff] %vm832_vm2, %v771_v6  ;;  %v410_v13 = vadd.f32 %v1007_v10, %v1260_v34  ;;  %v401_v16 = vpop.f32.mrb[5].mxu0  ;;  %868 = vst.msk [vmem:[%s1778_s4 + $0x118] sm:$0xff] %vm832_vm2, %v803_v8  ;;  %v538_v18 = vadd.f32 %v1039_v14, %v1260_v34  ;;  %v529_v20 = vpop.f32.mrb[5].mxu1  ;;  %v683_v5 = vld [vmem:[%s1777_s3 + $0x158] sm:$0xff]  ;;  %v649_v7 = vld [vmem:[%s1777_s3 + $0x48] sm:$0xff] }
  0xe3   :  { %834 = vst.msk [vmem:[%s1778_s4 + $0x8] sm:$0xff] %vm832_vm2, %v769_v9  ;;  %v402_v19 = vadd.f32 %v1260_v34, %v401_v16  ;;  %v1008_v22 = vpop.f32.mrb[6].mxu0  ;;  %866 = vst.msk [vmem:[%s1778_s4 + $0x108] sm:$0xff] %vm832_vm2, %v801_v12  ;;  %v530_v25 = vadd.f32 %v1260_v34, %v529_v20  ;;  %v1040_v27 = vpop.f32.mrb[6].mxu1 }
  0xe4   :  { %v710_v24 = vadd.f32 %v646_v11, %v410_v13  ;;  %v413_v26 = vadd.f32 %v1008_v22, %v1260_v34  ;;  %v404_v29 = vpop.f32.mrb[7].mxu0  ;;  %v742_v31 = vadd.f32 %v678_v15, %v538_v18  ;;  %v541_v33 = vadd.f32 %v1040_v27, %v1260_v34  ;;  %v532_v36 = vpop.f32.mrb[7].mxu1  ;;  %v681_v13 = vld [vmem:[%s1777_s3 + $0x148] sm:$0xff] }
  0xe5   :  { %v708_v32 = vadd.f32 %v644_v17, %v402_v19  ;;  %v405_v35 = vadd.f32 %v1260_v34, %v404_v29  ;;  %v740_v39 = vadd.f32 %v676_v21, %v530_v25  ;;  %v533_v41 = vadd.f32 %v1260_v34, %v532_v36 }
  0xe6   :  { %v774_v38 = vmax.f32 %v710_v24, 0.0  ;;  %v711_v40 = vadd.f32 %v647_v23, %v413_v26  ;;  %v806_v42 = vmax.f32 %v742_v31, 0.0  ;;  %v743_v44 = vadd.f32 %v679_v28, %v541_v33  ;;  %v654_v28 = vld [vmem:[%s1777_s3 + $0x70] sm:$0xff] }
  0xe7   :  { %v772_v43 = vmax.f32 %v708_v32, 0.0  ;;  %v709_v45 = vadd.f32 %v645_v30, %v405_v35  ;;  %v804_v46 = vmax.f32 %v740_v39, 0.0  ;;  %v741_v48 = vadd.f32 %v677_v37, %v533_v41  ;;  %v686_v32 = vld [vmem:[%s1777_s3 + $0x170] sm:$0xff]  ;;  %v652_v35 = vld [vmem:[%s1777_s3 + $0x60] sm:$0xff]  ;;  %v655_v41 = vld [vmem:[%s1777_s3 + $0x78] sm:$0xff] }
  0xe8   :  { %839 = vst.msk [vmem:[%s1778_s4 + $0x30] sm:$0xff] %vm832_vm2, %v774_v38  ;;  %v775_v47 = vmax.f32 %v711_v40, 0.0  ;;  %871 = vst.msk [vmem:[%s1778_s4 + $0x130] sm:$0xff] %vm832_vm2, %v806_v42  ;;  %v807_v49 = vmax.f32 %v743_v44, 0.0  ;;  %v684_v39 = vld [vmem:[%s1777_s3 + $0x160] sm:$0xff] }
  0xe9   :  { %837 = vst.msk [vmem:[%s1778_s4 + $0x20] sm:$0xff] %vm832_vm2, %v772_v43  ;;  %v773_v50 = vmax.f32 %v709_v45, 0.0  ;;  %v1011_v51 = vpop.f32.mrb[8].mxu0  ;;  %869 = vst.msk [vmem:[%s1778_s4 + $0x120] sm:$0xff] %vm832_vm2, %v804_v46  ;;  %v805_v53 = vmax.f32 %v741_v48, 0.0  ;;  %v1043_v55 = vpop.f32.mrb[8].mxu1 }
  0xea   :  { %840 = vst.msk [vmem:[%s1778_s4 + $0x38] sm:$0xff] %vm832_vm2, %v775_v47  ;;  %v426_v54 = vadd.f32 %v1011_v51, %v1260_v34  ;;  %v417_v57 = vpop.f32.mrb[9].mxu0  ;;  %872 = vst.msk [vmem:[%s1778_s4 + $0x138] sm:$0xff] %vm832_vm2, %v807_v49  ;;  %v554_v59 = vadd.f32 %v1043_v55, %v1260_v34  ;;  %v545_v61 = vpop.f32.mrb[9].mxu1  ;;  %v687_v46 = vld [vmem:[%s1777_s3 + $0x178] sm:$0xff]  ;;  %v653_v48 = vld [vmem:[%s1777_s3 + $0x68] sm:$0xff] }
  0xeb   :  { %838 = vst.msk [vmem:[%s1778_s4 + $0x28] sm:$0xff] %vm832_vm2, %v773_v50  ;;  %v418_v60 = vadd.f32 %v1260_v34, %v417_v57  ;;  %v1012_v63 = vpop.f32.mrb[10].mxu0  ;;  %870 = vst.msk [vmem:[%s1778_s4 + $0x128] sm:$0xff] %vm832_vm2, %v805_v53  ;;  %v546_v2 = vadd.f32 %v1260_v34, %v545_v61  ;;  %v1044_v4 = vpop.f32.mrb[10].mxu1 }
  0xec   :  { %v714_v1 = vadd.f32 %v650_v52, %v426_v54  ;;  %v429_v3 = vadd.f32 %v1012_v63, %v1260_v34  ;;  %v420_v6 = vpop.f32.mrb[11].mxu0  ;;  %v746_v8 = vadd.f32 %v682_v56, %v554_v59  ;;  %v557_v10 = vadd.f32 %v1044_v4, %v1260_v34  ;;  %v548_v12 = vpop.f32.mrb[11].mxu1  ;;  %v685_v54 = vld [vmem:[%s1777_s3 + $0x168] sm:$0xff] }
  0xed   :  { %v712_v9 = vadd.f32 %v648_v58, %v418_v60  ;;  %v421_v11 = vadd.f32 %v1260_v34, %v420_v6  ;;  %v744_v15 = vadd.f32 %v680_v62, %v546_v2  ;;  %v549_v17 = vadd.f32 %v1260_v34, %v548_v12 }
  0xee   :  { %v778_v14 = vmax.f32 %v714_v1, 0.0  ;;  %v715_v16 = vadd.f32 %v651_v0, %v429_v3  ;;  %v810_v18 = vmax.f32 %v746_v8, 0.0  ;;  %v747_v20 = vadd.f32 %v683_v5, %v557_v10  ;;  %v658_v5 = vld [vmem:[%s1777_s3 + $0x90] sm:$0xff] }
  0xef   :  { %v776_v19 = vmax.f32 %v712_v9, 0.0  ;;  %v713_v21 = vadd.f32 %v649_v7, %v421_v11  ;;  %v808_v22 = vmax.f32 %v744_v15, 0.0  ;;  %v745_v24 = vadd.f32 %v681_v13, %v549_v17  ;;  %v690_v9 = vld [vmem:[%s1777_s3 + $0x190] sm:$0xff]  ;;  %v656_v11 = vld [vmem:[%s1777_s3 + $0x80] sm:$0xff]  ;;  %v659_v17 = vld [vmem:[%s1777_s3 + $0x98] sm:$0xff] }
  0xf0   :  { %843 = vst.msk [vmem:[%s1778_s4 + $0x50] sm:$0xff] %vm832_vm2, %v778_v14  ;;  %v779_v23 = vmax.f32 %v715_v16, 0.0  ;;  %875 = vst.msk [vmem:[%s1778_s4 + $0x150] sm:$0xff] %vm832_vm2, %v810_v18  ;;  %v811_v25 = vmax.f32 %v747_v20, 0.0  ;;  %v688_v15 = vld [vmem:[%s1777_s3 + $0x180] sm:$0xff] }
  0xf1   :  { %841 = vst.msk [vmem:[%s1778_s4 + $0x40] sm:$0xff] %vm832_vm2, %v776_v19  ;;  %v777_v26 = vmax.f32 %v713_v21, 0.0  ;;  %v1015_v27 = vpop.f32.mrb[12].mxu0  ;;  %873 = vst.msk [vmem:[%s1778_s4 + $0x140] sm:$0xff] %vm832_vm2, %v808_v22  ;;  %v809_v29 = vmax.f32 %v745_v24, 0.0  ;;  %v1047_v31 = vpop.f32.mrb[12].mxu1 }
  0xf2   :  { %844 = vst.msk [vmem:[%s1778_s4 + $0x58] sm:$0xff] %vm832_vm2, %v779_v23  ;;  %v442_v30 = vadd.f32 %v1015_v27, %v1260_v34  ;;  %v433_v33 = vpop.f32.mrb[13].mxu0  ;;  %876 = vst.msk [vmem:[%s1778_s4 + $0x158] sm:$0xff] %vm832_vm2, %v811_v25  ;;  %v570_v36 = vadd.f32 %v1047_v31, %v1260_v34  ;;  %v561_v38 = vpop.f32.mrb[13].mxu1  ;;  %v691_v22 = vld [vmem:[%s1777_s3 + $0x198] sm:$0xff]  ;;  %v657_v24 = vld [vmem:[%s1777_s3 + $0x88] sm:$0xff] }
  0xf3   :  { %842 = vst.msk [vmem:[%s1778_s4 + $0x48] sm:$0xff] %vm832_vm2, %v777_v26  ;;  %v434_v37 = vadd.f32 %v1260_v34, %v433_v33  ;;  %v1016_v40 = vpop.f32.mrb[14].mxu0  ;;  %874 = vst.msk [vmem:[%s1778_s4 + $0x148] sm:$0xff] %vm832_vm2, %v809_v29  ;;  %v562_v43 = vadd.f32 %v1260_v34, %v561_v38  ;;  %v1048_v45 = vpop.f32.mrb[14].mxu1 }
  0xf4   :  { %v718_v42 = vadd.f32 %v654_v28, %v442_v30  ;;  %v445_v44 = vadd.f32 %v1016_v40, %v1260_v34  ;;  %v436_v47 = vpop.f32.mrb[15].mxu0  ;;  %v750_v49 = vadd.f32 %v686_v32, %v570_v36  ;;  %v573_v51 = vadd.f32 %v1048_v45, %v1260_v34  ;;  %v564_v53 = vpop.f32.mrb[15].mxu1  ;;  %v689_v30 = vld [vmem:[%s1777_s3 + $0x188] sm:$0xff] }
  0xf5   :  { %v716_v50 = vadd.f32 %v652_v35, %v434_v37  ;;  %v437_v52 = vadd.f32 %v1260_v34, %v436_v47  ;;  %v748_v56 = vadd.f32 %v684_v39, %v562_v43  ;;  %v565_v58 = vadd.f32 %v1260_v34, %v564_v53 }
  0xf6   :  { %v782_v55 = vmax.f32 %v718_v42, 0.0  ;;  %v719_v57 = vadd.f32 %v655_v41, %v445_v44  ;;  %v814_v59 = vmax.f32 %v750_v49, 0.0  ;;  %v751_v61 = vadd.f32 %v687_v46, %v573_v51  ;;  %v662_v46 = vld [vmem:[%s1777_s3 + $0xb0] sm:$0xff] }
  0xf7   :  { %v780_v60 = vmax.f32 %v716_v50, 0.0  ;;  %v717_v62 = vadd.f32 %v653_v48, %v437_v52  ;;  %v812_v63 = vmax.f32 %v748_v56, 0.0  ;;  %v749_v1 = vadd.f32 %v685_v54, %v565_v58  ;;  %v694_v50 = vld [vmem:[%s1777_s3 + $0x1b0] sm:$0xff]  ;;  %v660_v52 = vld [vmem:[%s1777_s3 + $0xa0] sm:$0xff]  ;;  %v663_v58 = vld [vmem:[%s1777_s3 + $0xb8] sm:$0xff] }
  0xf8   :  { %847 = vst.msk [vmem:[%s1778_s4 + $0x70] sm:$0xff] %vm832_vm2, %v782_v55  ;;  %v783_v0 = vmax.f32 %v719_v57, 0.0  ;;  %879 = vst.msk [vmem:[%s1778_s4 + $0x170] sm:$0xff] %vm832_vm2, %v814_v59  ;;  %v815_v2 = vmax.f32 %v751_v61, 0.0  ;;  %v692_v56 = vld [vmem:[%s1777_s3 + $0x1a0] sm:$0xff] }
  0xf9   :  { %845 = vst.msk [vmem:[%s1778_s4 + $0x60] sm:$0xff] %vm832_vm2, %v780_v60  ;;  %v781_v3 = vmax.f32 %v717_v62, 0.0  ;;  %v1019_v4 = vpop.f32.mrb[16].mxu0  ;;  %877 = vst.msk [vmem:[%s1778_s4 + $0x160] sm:$0xff] %vm832_vm2, %v812_v63  ;;  %v813_v6 = vmax.f32 %v749_v1, 0.0  ;;  %v1051_v8 = vpop.f32.mrb[16].mxu1 }
  0xfa   :  { %848 = vst.msk [vmem:[%s1778_s4 + $0x78] sm:$0xff] %vm832_vm2, %v783_v0  ;;  %v458_v7 = vadd.f32 %v1019_v4, %v1260_v34  ;;  %v449_v10 = vpop.f32.mrb[17].mxu0  ;;  %880 = vst.msk [vmem:[%s1778_s4 + $0x178] sm:$0xff] %vm832_vm2, %v815_v2  ;;  %v586_v12 = vadd.f32 %v1051_v8, %v1260_v34  ;;  %v577_v14 = vpop.f32.mrb[17].mxu1  ;;  %v695_v63 = vld [vmem:[%s1777_s3 + $0x1b8] sm:$0xff]  ;;  %v661_v1 = vld [vmem:[%s1777_s3 + $0xa8] sm:$0xff] }
  0xfb   :  { %846 = vst.msk [vmem:[%s1778_s4 + $0x68] sm:$0xff] %vm832_vm2, %v781_v3  ;;  %v450_v13 = vadd.f32 %v1260_v34, %v449_v10  ;;  %v1020_v16 = vpop.f32.mrb[18].mxu0  ;;  %878 = vst.msk [vmem:[%s1778_s4 + $0x168] sm:$0xff] %vm832_vm2, %v813_v6  ;;  %v578_v19 = vadd.f32 %v1260_v34, %v577_v14  ;;  %v1052_v21 = vpop.f32.mrb[18].mxu1 }
  0xfc   :  { %v722_v18 = vadd.f32 %v658_v5, %v458_v7  ;;  %v461_v20 = vadd.f32 %v1020_v16, %v1260_v34  ;;  %v452_v23 = vpop.f32.mrb[19].mxu0  ;;  %v754_v25 = vadd.f32 %v690_v9, %v586_v12  ;;  %v589_v27 = vadd.f32 %v1052_v21, %v1260_v34  ;;  %v580_v29 = vpop.f32.mrb[19].mxu1  ;;  %v693_v7 = vld [vmem:[%s1777_s3 + $0x1a8] sm:$0xff] }
  0xfd   :  { %v720_v26 = vadd.f32 %v656_v11, %v450_v13  ;;  %v453_v28 = vadd.f32 %v1260_v34, %v452_v23  ;;  %v752_v32 = vadd.f32 %v688_v15, %v578_v19  ;;  %v581_v35 = vadd.f32 %v1260_v34, %v580_v29 }
  0xfe   :  { %v786_v31 = vmax.f32 %v722_v18, 0.0  ;;  %v723_v33 = vadd.f32 %v659_v17, %v461_v20  ;;  %v818_v36 = vmax.f32 %v754_v25, 0.0  ;;  %v755_v38 = vadd.f32 %v691_v22, %v589_v27  ;;  %v666_v22 = vld [vmem:[%s1777_s3 + $0xd0] sm:$0xff] }
  0xff   :  { %v784_v37 = vmax.f32 %v720_v26, 0.0  ;;  %v721_v39 = vadd.f32 %v657_v24, %v453_v28  ;;  %v816_v40 = vmax.f32 %v752_v32, 0.0  ;;  %v753_v42 = vadd.f32 %v689_v30, %v581_v35  ;;  %v698_v26 = vld [vmem:[%s1777_s3 + $0x1d0] sm:$0xff]  ;;  %v664_v28 = vld [vmem:[%s1777_s3 + $0xc0] sm:$0xff]  ;;  %v667_v35 = vld [vmem:[%s1777_s3 + $0xd8] sm:$0xff] }
 0x100   :  { %851 = vst.msk [vmem:[%s1778_s4 + $0x90] sm:$0xff] %vm832_vm2, %v786_v31  ;;  %v787_v41 = vmax.f32 %v723_v33, 0.0  ;;  %883 = vst.msk [vmem:[%s1778_s4 + $0x190] sm:$0xff] %vm832_vm2, %v818_v36  ;;  %v819_v43 = vmax.f32 %v755_v38, 0.0  ;;  %v696_v32 = vld [vmem:[%s1777_s3 + $0x1c0] sm:$0xff] }
 0x101   :  { %849 = vst.msk [vmem:[%s1778_s4 + $0x80] sm:$0xff] %vm832_vm2, %v784_v37  ;;  %v785_v44 = vmax.f32 %v721_v39, 0.0  ;;  %v1023_v45 = vpop.f32.mrb[20].mxu0  ;;  %881 = vst.msk [vmem:[%s1778_s4 + $0x180] sm:$0xff] %vm832_vm2, %v816_v40  ;;  %v817_v47 = vmax.f32 %v753_v42, 0.0  ;;  %v1055_v49 = vpop.f32.mrb[20].mxu1 }
 0x102   :  { %852 = vst.msk [vmem:[%s1778_s4 + $0x98] sm:$0xff] %vm832_vm2, %v787_v41  ;;  %v474_v48 = vadd.f32 %v1023_v45, %v1260_v34  ;;  %v465_v51 = vpop.f32.mrb[21].mxu0  ;;  %884 = vst.msk [vmem:[%s1778_s4 + $0x198] sm:$0xff] %vm832_vm2, %v819_v43  ;;  %v602_v53 = vadd.f32 %v1055_v49, %v1260_v34  ;;  %v593_v55 = vpop.f32.mrb[21].mxu1  ;;  %v699_v40 = vld [vmem:[%s1777_s3 + $0x1d8] sm:$0xff]  ;;  %v665_v42 = vld [vmem:[%s1777_s3 + $0xc8] sm:$0xff] }
 0x103   :  { %850 = vst.msk [vmem:[%s1778_s4 + $0x88] sm:$0xff] %vm832_vm2, %v785_v44  ;;  %v466_v54 = vadd.f32 %v1260_v34, %v465_v51  ;;  %v1024_v57 = vpop.f32.mrb[22].mxu0  ;;  %882 = vst.msk [vmem:[%s1778_s4 + $0x188] sm:$0xff] %vm832_vm2, %v817_v47  ;;  %v594_v60 = vadd.f32 %v1260_v34, %v593_v55  ;;  %v1056_v62 = vpop.f32.mrb[22].mxu1 }
 0x104   :  { %v726_v59 = vadd.f32 %v662_v46, %v474_v48  ;;  %v477_v61 = vadd.f32 %v1024_v57, %v1260_v34  ;;  %v468_v0 = vpop.f32.mrb[23].mxu0  ;;  %v758_v2 = vadd.f32 %v694_v50, %v602_v53  ;;  %v605_v4 = vadd.f32 %v1056_v62, %v1260_v34  ;;  %v596_v6 = vpop.f32.mrb[23].mxu1  ;;  %v697_v48 = vld [vmem:[%s1777_s3 + $0x1c8] sm:$0xff] }
 0x105   :  { %v724_v3 = vadd.f32 %v660_v52, %v466_v54  ;;  %v469_v5 = vadd.f32 %v1260_v34, %v468_v0  ;;  %v756_v9 = vadd.f32 %v692_v56, %v594_v60  ;;  %v597_v11 = vadd.f32 %v1260_v34, %v596_v6 }
 0x106   :  { %v790_v8 = vmax.f32 %v726_v59, 0.0  ;;  %v727_v10 = vadd.f32 %v663_v58, %v477_v61  ;;  %v822_v12 = vmax.f32 %v758_v2, 0.0  ;;  %v759_v14 = vadd.f32 %v695_v63, %v605_v4  ;;  %v670_v63 = vld [vmem:[%s1777_s3 + $0xf0] sm:$0xff] }
 0x107   :  { %v788_v13 = vmax.f32 %v724_v3, 0.0  ;;  %v725_v15 = vadd.f32 %v661_v1, %v469_v5  ;;  %v820_v16 = vmax.f32 %v756_v9, 0.0  ;;  %v757_v18 = vadd.f32 %v693_v7, %v597_v11  ;;  %v702_v3 = vld [vmem:[%s1777_s3 + $0x1f0] sm:$0xff]  ;;  %v668_v5 = vld [vmem:[%s1777_s3 + $0xe0] sm:$0xff]  ;;  %v671_v11 = vld [vmem:[%s1777_s3 + $0xf8] sm:$0xff] }
 0x108   :  { %855 = vst.msk [vmem:[%s1778_s4 + $0xb0] sm:$0xff] %vm832_vm2, %v790_v8  ;;  %v791_v17 = vmax.f32 %v727_v10, 0.0  ;;  %887 = vst.msk [vmem:[%s1778_s4 + $0x1b0] sm:$0xff] %vm832_vm2, %v822_v12  ;;  %v823_v19 = vmax.f32 %v759_v14, 0.0  ;;  %v700_v9 = vld [vmem:[%s1777_s3 + $0x1e0] sm:$0xff] }
 0x109   :  { %853 = vst.msk [vmem:[%s1778_s4 + $0xa0] sm:$0xff] %vm832_vm2, %v788_v13  ;;  %v789_v20 = vmax.f32 %v725_v15, 0.0  ;;  %v1027_v21 = vpop.f32.mrb[24].mxu0  ;;  %885 = vst.msk [vmem:[%s1778_s4 + $0x1a0] sm:$0xff] %vm832_vm2, %v820_v16  ;;  %v821_v23 = vmax.f32 %v757_v18, 0.0  ;;  %v1059_v25 = vpop.f32.mrb[24].mxu1 }
 0x10a   :  { %856 = vst.msk [vmem:[%s1778_s4 + $0xb8] sm:$0xff] %vm832_vm2, %v791_v17  ;;  %v490_v24 = vadd.f32 %v1027_v21, %v1260_v34  ;;  %v481_v27 = vpop.f32.mrb[25].mxu0  ;;  %888 = vst.msk [vmem:[%s1778_s4 + $0x1b8] sm:$0xff] %vm832_vm2, %v823_v19  ;;  %v618_v29 = vadd.f32 %v1059_v25, %v1260_v34  ;;  %v609_v31 = vpop.f32.mrb[25].mxu1  ;;  %v703_v16 = vld [vmem:[%s1777_s3 + $0x1f8] sm:$0xff]  ;;  %v669_v18 = vld [vmem:[%s1777_s3 + $0xe8] sm:$0xff] }
 0x10b   :  { %854 = vst.msk [vmem:[%s1778_s4 + $0xa8] sm:$0xff] %vm832_vm2, %v789_v20  ;;  %v482_v30 = vadd.f32 %v1260_v34, %v481_v27  ;;  %v1028_v33 = vpop.f32.mrb[26].mxu0  ;;  %886 = vst.msk [vmem:[%s1778_s4 + $0x1a8] sm:$0xff] %vm832_vm2, %v821_v23  ;;  %v610_v37 = vadd.f32 %v1260_v34, %v609_v31  ;;  %v1060_v39 = vpop.f32.mrb[26].mxu1 }
 0x10c   :  { %v730_v36 = vadd.f32 %v666_v22, %v490_v24  ;;  %v493_v38 = vadd.f32 %v1028_v33, %v1260_v34  ;;  %v484_v41 = vpop.f32.mrb[27].mxu0  ;;  %v762_v43 = vadd.f32 %v698_v26, %v618_v29  ;;  %v621_v45 = vadd.f32 %v1060_v39, %v1260_v34  ;;  %v612_v47 = vpop.f32.mrb[27].mxu1  ;;  %v701_v24 = vld [vmem:[%s1777_s3 + $0x1e8] sm:$0xff] }
 0x10d   :  { %v728_v44 = vadd.f32 %v664_v28, %v482_v30  ;;  %v485_v46 = vadd.f32 %v1260_v34, %v484_v41  ;;  %v760_v50 = vadd.f32 %v696_v32, %v610_v37  ;;  %v613_v52 = vadd.f32 %v1260_v34, %v612_v47 }
 0x10e   :  { %v794_v49 = vmax.f32 %v730_v36, 0.0  ;;  %v731_v51 = vadd.f32 %v667_v35, %v493_v38  ;;  %v826_v53 = vmax.f32 %v762_v43, 0.0  ;;  %v763_v55 = vadd.f32 %v699_v40, %v621_v45 }
 0x10f   :  { %v792_v54 = vmax.f32 %v728_v44, 0.0  ;;  %v729_v56 = vadd.f32 %v665_v42, %v485_v46  ;;  %v824_v57 = vmax.f32 %v760_v50, 0.0  ;;  %v761_v59 = vadd.f32 %v697_v48, %v613_v52 }
 0x110   :  { %859 = vst.msk [vmem:[%s1778_s4 + $0xd0] sm:$0xff] %vm832_vm2, %v794_v49  ;;  %v795_v58 = vmax.f32 %v731_v51, 0.0  ;;  %891 = vst.msk [vmem:[%s1778_s4 + $0x1d0] sm:$0xff] %vm832_vm2, %v826_v53  ;;  %v827_v60 = vmax.f32 %v763_v55, 0.0 }
 0x111   :  { %857 = vst.msk [vmem:[%s1778_s4 + $0xc0] sm:$0xff] %vm832_vm2, %v792_v54  ;;  %v793_v61 = vmax.f32 %v729_v56, 0.0  ;;  %v1031_v62 = vpop.f32.mrb[28].mxu0  ;;  %889 = vst.msk [vmem:[%s1778_s4 + $0x1c0] sm:$0xff] %vm832_vm2, %v824_v57  ;;  %v825_v0 = vmax.f32 %v761_v59, 0.0  ;;  %v1063_v2 = vpop.f32.mrb[28].mxu1 }
 0x112   :  { %860 = vst.msk [vmem:[%s1778_s4 + $0xd8] sm:$0xff] %vm832_vm2, %v795_v58  ;;  %v506_v1 = vadd.f32 %v1031_v62, %v1260_v34  ;;  %v497_v4 = vpop.f32.mrb[29].mxu0  ;;  %892 = vst.msk [vmem:[%s1778_s4 + $0x1d8] sm:$0xff] %vm832_vm2, %v827_v60  ;;  %v634_v6 = vadd.f32 %v1063_v2, %v1260_v34  ;;  %v625_v8 = vpop.f32.mrb[29].mxu1 }
 0x113   :  { %858 = vst.msk [vmem:[%s1778_s4 + $0xc8] sm:$0xff] %vm832_vm2, %v793_v61  ;;  %v498_v7 = vadd.f32 %v1260_v34, %v497_v4  ;;  %v1032_v10 = vpop.f32.mrb[30].mxu0  ;;  %890 = vst.msk [vmem:[%s1778_s4 + $0x1c8] sm:$0xff] %vm832_vm2, %v825_v0  ;;  %v626_v13 = vadd.f32 %v1260_v34, %v625_v8  ;;  %v1064_v15 = vpop.f32.mrb[30].mxu1 }
 0x114   :  { %v734_v12 = vadd.f32 %v670_v63, %v506_v1  ;;  %v509_v14 = vadd.f32 %v1032_v10, %v1260_v34  ;;  %v500_v17 = vpop.f32.mrb[31].mxu0  ;;  %v766_v19 = vadd.f32 %v702_v3, %v634_v6  ;;  %v637_v21 = vadd.f32 %v1064_v15, %v1260_v34  ;;  %v628_v23 = vpop.f32.mrb[31].mxu1 }
 0x115   :  { %v732_v20 = vadd.f32 %v668_v5, %v498_v7  ;;  %v501_v22 = vadd.f32 %v1260_v34, %v500_v17  ;;  %v764_v26 = vadd.f32 %v700_v9, %v626_v13  ;;  %v629_v28 = vadd.f32 %v1260_v34, %v628_v23 }
 0x116   :  { %v798_v25 = vmax.f32 %v734_v12, 0.0  ;;  %v735_v27 = vadd.f32 %v671_v11, %v509_v14  ;;  %v830_v29 = vmax.f32 %v766_v19, 0.0  ;;  %v767_v31 = vadd.f32 %v703_v16, %v637_v21 }
 0x117   :  { %v796_v30 = vmax.f32 %v732_v20, 0.0  ;;  %v733_v32 = vadd.f32 %v669_v18, %v501_v22  ;;  %v828_v33 = vmax.f32 %v764_v26, 0.0  ;;  %v765_v36 = vadd.f32 %v701_v24, %v629_v28 }
 0x118   :  { %863 = vst.msk [vmem:[%s1778_s4 + $0xf0] sm:$0xff] %vm832_vm2, %v798_v25  ;;  %v799_v35 = vmax.f32 %v735_v27, 0.0  ;;  %895 = vst.msk [vmem:[%s1778_s4 + $0x1f0] sm:$0xff] %vm832_vm2, %v830_v29  ;;  %v831_v34 = vmax.f32 %v767_v31, 0.0 }
 0x119   :  { %861 = vst.msk [vmem:[%s1778_s4 + $0xe0] sm:$0xff] %vm832_vm2, %v796_v30  ;;  %v797_v37 = vmax.f32 %v733_v32, 0.0  ;;  %893 = vst.msk [vmem:[%s1778_s4 + $0x1e0] sm:$0xff] %vm832_vm2, %v828_v33  ;;  %v829_v38 = vmax.f32 %v765_v36, 0.0 }
 0x11a   :  { %864 = vst.msk [vmem:[%s1778_s4 + $0xf8] sm:$0xff] %vm832_vm2, %v799_v35  ;;  %896 = vst.msk [vmem:[%s1778_s4 + $0x1f8] sm:$0xff] %vm832_vm2, %v831_v34 }
 0x11b   :  { %862 = vst.msk [vmem:[%s1778_s4 + $0xe8] sm:$0xff] %vm832_vm2, %v797_v37  ;;  %894 = vst.msk [vmem:[%s1778_s4 + $0x1e8] sm:$0xff] %vm832_vm2, %v829_v38 }

// kernel: bottleneck_forward.4
= control target key start
LH: loop header
LB: loop body
LE: loop exit
PB: predicated region body
PF: predicated region fallthrough
CT: control target
= control target key end

     0   :  { %s6634_s12 = smov 0   ;;  %s6636_s13 = smov 0   ;;  %s8489_s0 = inlined_call_operand.vmem [shape: bf16[2,18,18,4], index: 0, kind: input, shape index: {}]   ;;  %s8490_s1 = inlined_call_operand.vmem [shape: bf16[9,4,4], index: 1, kind: input, shape index: {}]   ;;  %s8491_s2 = inlined_call_operand.vmem [shape: f32[1,4], index: 2, kind: input, shape index: {}]   ;;  %s8492_s3 = inlined_call_operand.vmem [shape: bf16[2,256,4], index: 3, kind: output, shape index: {}]  }
   0x1   :  { %s6638_s14 = smov 0  }
   0x2 LB: > { %s25_s15 = sadd.s32 1, %s6608_s13  ;;  %p5125_p0 = scmp.ge.s32.totalorder %s6612_s14, 1  ;;  %s6612_s14 = sphi %s6638_s14, %s13_s14   ;;  %s6608_s13 = sphi %s6636_s13, %s8561_s13   ;;  %s6604_s12 = sphi %s6634_s12, %s8560_s12  }
   0x3   : > { %p27_p1 = scmp.ge.s32.totalorder %s25_s15, 2  ;;  %p168_p2 = scmp.lt.s32.totalorder %s6612_s14, 3 }
   0x5   : > { %s8563_s15 = smov (%p27_p1, %s25_s15), 0  ;;  %p169_p3 = pnand %p5125_p0, %p168_p2 }
   0x7   : > { %172 = sbr.rel (%p169_p3) target bundleno = 590 (0x24e), region = 32 }
   0xe   : > { %v5129_v0 = vld [vmem:[%s8490_s1 + $0x2] sm:$0x3]  ;;  %vm758_vm0 = vcmask 1041408   ;;  %v5356_v1 = vld [vmem:[%s8490_s1 + $0x8] sm:$0x3]  ;;  %p202_p4 = scmp.lt.s32.totalorder %s6604_s12, 1 }
   0xf   : > { %6450 = vmatprep.subr.msk.bf16.mxu1 %vm758_vm0, %v5129_v0  ;;  %6454 = vmatprep.subr.msk.bf16.mxu0 %vm758_vm0, %v5356_v1  ;;  %v760_v2 = vsel %vm758_vm0, %v5129_v0, 0  ;;  %v6662_v3 = vsel %vm758_vm0, %v5356_v1, 0  ;;  %v255_v4 = vld [vmem:[%s8490_s1] sm:$0x3]  ;;  %v5421_v5 = vld [vmem:[%s8490_s1 + $0xa] sm:$0x3] }
  0x10   : > { %8506 = vst [vmem:[#allocation2_spill] sm:$0xff] %v6662_v3  ;;  %5887 = vmatpush3.bf16.msra.mxu1 %v760_v2  ;;  %6023 = vmatpush3.bf16.msra.mxu0 %v6662_v3  ;;  %s8565_s12 = smov (!%p202_p4, %s6604_s12), 1  ;;  %vm272_vm1 = vsmask.f32 3328  ;;  %vm273_vm2 = vsmask.f32 7440 }
  0x11   : > { %6451 = vmatprep.subr.msk.bf16.mxu1 %vm758_vm0, %v255_v4  ;;  %6456 = vmatprep.subr.msk.bf16.mxu0 %vm758_vm0, %v5421_v5  ;;  %s6460_s24 = smul.u32 216, %s8565_s12  ;;  %vm709_vm3 = vcmask 31744   ;;  %v6692_v17 = vsel %vm758_vm0, %v255_v4, 0  ;;  %v6698_v26 = vld [vmem:[%s8490_s1 + $0xc] sm:$0x3]  ;;  %vm6705_vm4 = vmor %vm272_vm1, %vm273_vm2  ;;  %v6711_v37 = vsel %vm758_vm0, %v5421_v5, 0 }
  0x12   : > { %v6715_v41 = vsel %vm758_vm0, %v6698_v26, 0  ;;  %vm1263_vm5 = vcmask 1042432   ;;  %vm1264_vm6 = vcmask 1046532   ;;  %s5700_s21 = sshll.u32 %s8565_s12, 7  ;;  %vm4981_vm8 = vcmask 27648  }
  0x13   : > { %s6679_s27 = scalar_lea.vmem %s8489_s0, %s6460_s24  ;;  %vm6931_vm7 = vmor %vm1263_vm5, %vm1264_vm6  ;;  %s8379_s24 = scalar_lea.vmem %s8492_s3, %s5700_s21 }
  0x14   : > { %v223_v6 = vld [vmem:[%s6679_s27] sm:$0xf]  ;;  %v224_v7 = vld [vmem:[%s6679_s27 + $0x4] sm:$0xf]  ;;  %v256_v8 = vld [vmem:[%s6679_s27 + $0x8] sm:$0x1] }
  0x15   : > { %v276_v9 = vshrl.u32 %v223_v6, 16  ;;  %v279_v10 = vshll.u32 %v223_v6, 16  ;;  %v285_v11 = vshll.u32 %v224_v7, 16  ;;  %v289_v12 = vshrl.u32 %v224_v7, 16  ;;  %v5308_v13 = vld [vmem:[%s6679_s27 + $0xc] sm:$0xf] }
  0x16   : > { %v295_v14 = vshll.u32 %v256_v8, 16  ;;  %v6686_v15 = vld [vmem:[%s6679_s27 + $0x10] sm:$0xf]  ;;  %v6689_v16 = vld [vmem:[%s6679_s27 + $0x14] sm:$0x1]  ;;  %v2080_v23 = vshrl.u32 %v5308_v13, 16 }
  0x17   : > { %v278_v18 = vrot.slane %v276_v9, 4  ;;  %v281_v19 = vrot.slane %v279_v10, 5  ;;  %v287_v20 = vrot.slane %v285_v11, 5  ;;  %v291_v21 = vrot.slane %v289_v12, 4  ;;  %v225_v31 = vld [vmem:[%s6679_s27 + $0xc] sm:$0xf] }
  0x18   : > { %v297_v22 = vrot.slane %v295_v14, 5  ;;  %v2083_v24 = vshll.u32 %v5308_v13, 16  ;;  %v2089_v25 = vshll.u32 %v6686_v15, 16  ;;  %v2093_v29 = vshrl.u32 %v6686_v15, 16  ;;  %v226_v36 = vld [vmem:[%s6679_s27 + $0x10] sm:$0xf] }
  0x19   : > { %v282_v27 = vor.u32 %v281_v19, %v278_v18  ;;  %v292_v28 = vor.u32 %v291_v21, %v287_v20  ;;  %v2099_v30 = vshll.u32 %v6689_v16, 16  ;;  %v2082_v33 = vrot.slane %v2080_v23, 4  ;;  %v257_v44 = vld [vmem:[%s6679_s27 + $0x14] sm:$0x1]  ;;  %v5311_v55 = vld [vmem:[%s6679_s27 + $0x18] sm:$0xf] }
  0x1a   : > { %v2085_v34 = vrot.slane %v2083_v24, 5  ;;  %v2091_v35 = vrot.slane %v2089_v25, 5  ;;  %v2095_v40 = vrot.slane %v2093_v29, 4  ;;  %v300_v45 = vshrl.u32 %v225_v31, 16  ;;  %v6724_v60 = vld [vmem:[%s6679_s27 + $0x1c] sm:$0xf] }
  0x1b   : > { %v283_v38 = vrot.slane %v282_v27, 4  ;;  %v293_v39 = vrot.slane %v292_v28, 4  ;;  %v2101_v43 = vrot.slane %v2099_v30, 5  ;;  %v303_v46 = vshll.u32 %v225_v31, 16  ;;  %v6732_v1 = vld [vmem:[%s6679_s27 + $0x20] sm:$0x1] }
  0x1c   : > { %v2086_v42 = vor.u32 %v2085_v34, %v2082_v33  ;;  %v2096_v49 = vor.u32 %v2095_v40, %v2091_v35  ;;  %v309_v50 = vshll.u32 %v226_v36, 16  ;;  %v302_v53 = vrot.slane %v300_v45, 4  ;;  %v227_v18 = vld [vmem:[%s6679_s27 + $0x18] sm:$0xf]  ;;  %v228_v23 = vld [vmem:[%s6679_s27 + $0x1c] sm:$0xf] }
  0x1d   : > { %v288_v47 = vsel %vm6705_vm4, %v283_v38, %v287_v20  ;;  %v298_v48 = vsel %vm6705_vm4, %v293_v39, %v297_v22  ;;  %v305_v54 = vrot.slane %v303_v46, 5  ;;  %v313_v58 = vshrl.u32 %v226_v36, 16  ;;  %v258_v31 = vld [vmem:[%s6679_s27 + $0x20] sm:$0x1]  ;;  %v5314_v40 = vld [vmem:[%s6679_s27 + $0x24] sm:$0xf] }
  0x1e   : > { %v5130_v51 = vcombine.low %v288_v47, %v298_v48  ;;  %v2087_v52 = vrot.slane %v2086_v42, 4  ;;  %v2097_v56 = vrot.slane %v2096_v49, 4  ;;  %v311_v57 = vrot.slane %v309_v50, 5  ;;  %v6755_v46 = vld [vmem:[%s6679_s27 + $0x28] sm:$0xf] }
  0x1f   : > { %v319_v59 = vshll.u32 %v257_v44, 16  ;;  %v2823_v62 = vrot.slane %v6686_v15, 5  ;;  %v2826_v63 = vrot.slane %v6689_v16, 5  ;;  %v306_v0 = vor.u32 %v305_v54, %v302_v53  ;;  %v6764_v54 = vld [vmem:[%s6679_s27 + $0x2c] sm:$0x1] }
  0x20   : > { %5888 = vmatprep.mubr.msk.bf16.mxu1 %vm709_vm3, %v5130_v51  ;;  %v2092_v61 = vsel %vm6705_vm4, %v2087_v52, %v2091_v35  ;;  %v2102_v2 = vsel %vm6705_vm4, %v2097_v56, %v2101_v43  ;;  %v315_v4 = vrot.slane %v313_v58, 4  ;;  %v2104_v6 = vshrl.u32 %v5311_v55, 16  ;;  %v5210_v51 = vld [vmem:[%s8490_s1 + $0x4] sm:$0x3]  ;;  %v6964_v16 = vld [vmem:[%s6679_s27 + $0x7c] sm:$0xf] }
  0x21   : > { %v321_v5 = vrot.slane %v319_v59, 5  ;;  %v5357_v7 = vcombine.low %v2092_v61, %v2102_v2  ;;  %v307_v8 = vrot.slane %v306_v0, 4  ;;  %v2107_v9 = vshll.u32 %v5311_v55, 16  ;;  %v229_v0 = vld [vmem:[%s6679_s27 + $0x24] sm:$0xf] }
  0x22   : > { %v2113_v10 = vshll.u32 %v6724_v60, 16  ;;  %v316_v11 = vor.u32 %v315_v4, %v311_v57  ;;  %v2106_v12 = vrot.slane %v2104_v6, 4  ;;  %v2117_v13 = vshrl.u32 %v6724_v60, 16 }
  0x23   : > { %v2123_v14 = vshll.u32 %v6732_v1, 16  ;;  %6024 = vmatprep.mubr.msk.bf16.mxu0 %vm709_vm3, %v5357_v7  ;;  %v312_v19 = vsel %vm6705_vm4, %v307_v8, %v311_v57  ;;  %v2109_v20 = vrot.slane %v2107_v9, 5  ;;  %v2830_v22 = vrot.slane %v6724_v60, 5  ;;  %v230_v7 = vld [vmem:[%s6679_s27 + $0x28] sm:$0xf] }
  0x24   : > { %v2115_v21 = vrot.slane %v2113_v10, 5  ;;  %v317_v24 = vrot.slane %v316_v11, 4  ;;  %v2119_v25 = vrot.slane %v2117_v13, 4  ;;  %v2833_v28 = vrot.slane %v6732_v1, 5  ;;  %v259_v13 = vld [vmem:[%s6679_s27 + $0x2c] sm:$0x1] }
  0x25   : > { %v2125_v27 = vrot.slane %v2123_v14, 5  ;;  %v2110_v29 = vor.u32 %v2109_v20, %v2106_v12  ;;  %v6748_v30 = vrot.slane %v2830_v22, 4  ;;  %v324_v33 = vshrl.u32 %v227_v18, 16 }
  0x26   : > { %v327_v34 = vshll.u32 %v227_v18, 16  ;;  %v322_v35 = vsel %vm6705_vm4, %v317_v24, %v321_v5  ;;  %v2120_v36 = vor.u32 %v2119_v25, %v2115_v21  ;;  %v333_v38 = vshll.u32 %v228_v23, 16  ;;  %v5317_v24 = vld [vmem:[%s6679_s27 + $0x30] sm:$0xf] }
  0x27   : > { %v337_v39 = vshrl.u32 %v228_v23, 16  ;;  %v5131_v42 = vcombine.low %v312_v19, %v322_v35  ;;  %v2111_v43 = vrot.slane %v2110_v29, 4  ;;  %v326_v44 = vrot.slane %v324_v33, 4  ;;  %v6784_v33 = vld [vmem:[%s6679_s27 + $0x34] sm:$0xf] }
  0x28   : > { %v329_v45 = vrot.slane %v327_v34, 5  ;;  %v2121_v47 = vrot.slane %v2120_v36, 4  ;;  %v335_v48 = vrot.slane %v333_v38, 5  ;;  %v343_v50 = vshll.u32 %v258_v31, 16 }
  0x29   : > { %v339_v49 = vrot.slane %v337_v39, 4  ;;  %5889 = vmatmul.mubr.msk.bf16.vlgmr.msra.gmra.mrb[0].mxu1 %vm709_vm3, %v5131_v42  ;;  %v2116_v52 = vsel %vm6705_vm4, %v2111_v43, %v2115_v21  ;;  %v2128_v55 = vshrl.u32 %v5314_v40, 16  ;;  %v2131_v56 = vshll.u32 %v5314_v40, 16  ;;  %v6792_v40 = vld [vmem:[%s6679_s27 + $0x38] sm:$0x1] }
  0x2a   : > { %v330_v53 = vor.u32 %v329_v45, %v326_v44  ;;  %5921 = vmatpush3.bf16.msra.mxu1 %v6692_v17  ;;  %v2126_v57 = vsel %vm6705_vm4, %v2121_v47, %v2125_v27  ;;  %v345_v59 = vrot.slane %v343_v50, 5  ;;  %v2137_v61 = vshll.u32 %v6755_v46, 16 }
  0x2b   : > { %v340_v58 = vor.u32 %v339_v49, %v335_v48  ;;  %v5358_v2 = vcombine.low %v2116_v52, %v2126_v57  ;;  %v2130_v5 = vrot.slane %v2128_v55, 4  ;;  %v2133_v6 = vrot.slane %v2131_v56, 5  ;;  %6452 = vmatprep.subr.msk.bf16.mxu1 %vm758_vm0, %v5210_v51  ;;  %v231_v52 = vld [vmem:[%s6679_s27 + $0x30] sm:$0xf] }
  0x2c   : > { %v331_v4 = vrot.slane %v330_v53, 4  ;;  %v2139_v9 = vrot.slane %v2137_v61, 5  ;;  %v2141_v17 = vshrl.u32 %v6755_v46, 16  ;;  %v2147_v10 = vshll.u32 %v6764_v54, 16 }
  0x2d   : > { %v341_v8 = vrot.slane %v340_v58, 4  ;;  %6025 = vmatmul.mubr.msk.bf16.vlgmr.msra.gmra.mrb[0].mxu0 %vm709_vm3, %v5358_v2  ;;  %v2134_v12 = vor.u32 %v2133_v6, %v2130_v5  ;;  %v348_v14 = vshrl.u32 %v229_v0, 16  ;;  %v351_v18 = vshll.u32 %v229_v0, 16  ;;  %v232_v58 = vld [vmem:[%s6679_s27 + $0x34] sm:$0xf] }
  0x2e   : > { %v336_v11 = vsel %vm6705_vm4, %v331_v4, %v335_v48  ;;  %6057 = vmatpush3.bf16.msra.mxu0 %v6711_v37  ;;  %v2143_v20 = vrot.slane %v2141_v17, 4  ;;  %v2149_v21 = vrot.slane %v2147_v10, 5  ;;  %v357_v23 = vshll.u32 %v230_v7, 16  ;;  %v260_v4 = vld [vmem:[%s6679_s27 + $0x38] sm:$0x1] }
  0x2f   : > { %v346_v19 = vsel %vm6705_vm4, %v341_v8, %v345_v59  ;;  %v2135_v27 = vrot.slane %v2134_v12, 4  ;;  %v350_v29 = vrot.slane %v348_v14, 4  ;;  %v353_v31 = vrot.slane %v351_v18, 5  ;;  %6457 = vmatprep.subr.msk.bf16.mxu0 %vm758_vm0, %v6698_v26  ;;  %v5320_v12 = vld [vmem:[%s6679_s27 + $0x3c] sm:$0xf] }
  0x30   : > { %v5132_v25 = vcombine.low %v336_v11, %v346_v19  ;;  %v2144_v34 = vor.u32 %v2143_v20, %v2139_v9  ;;  %v359_v35 = vrot.slane %v357_v23, 5  ;;  %v361_v37 = vshrl.u32 %v230_v7, 16  ;;  %v6809_v20 = vld [vmem:[%s6679_s27 + $0x40] sm:$0xf] }
  0x31   : > { %v367_v36 = vshll.u32 %v259_v13, 16  ;;  %v2140_v38 = vsel %vm6705_vm4, %v2135_v27, %v2139_v9  ;;  %v354_v39 = vor.u32 %v353_v31, %v350_v29  ;;  %v2152_v42 = vshrl.u32 %v5317_v24, 16 }
  0x32   : > { %5892 = vmatprep.mubr.msk.bf16.mxu1 %vm709_vm3, %v5132_v25  ;;  %v2155_v43 = vshll.u32 %v5317_v24, 16  ;;  %v2145_v44 = vrot.slane %v2144_v34, 4  ;;  %v363_v45 = vrot.slane %v361_v37, 4  ;;  %v2161_v26 = vshll.u32 %v6784_v33, 16  ;;  %v6814_v34 = vld [vmem:[%s6679_s27 + $0x44] sm:$0x1] }
  0x33   : > { %v369_v47 = vrot.slane %v367_v36, 5  ;;  %v355_v48 = vrot.slane %v354_v39, 4  ;;  %v2154_v49 = vrot.slane %v2152_v42, 4  ;;  %v2165_v51 = vshrl.u32 %v6784_v33, 16  ;;  %v233_v42 = vld [vmem:[%s6679_s27 + $0x3c] sm:$0xf] }
  0x34   : > { %v2157_v50 = vrot.slane %v2155_v43, 5  ;;  %v2150_v53 = vsel %vm6705_vm4, %v2145_v44, %v2149_v21  ;;  %v364_v55 = vor.u32 %v363_v45, %v359_v35  ;;  %v2163_v56 = vrot.slane %v2161_v26, 5  ;;  %v234_v26 = vld [vmem:[%s6679_s27 + $0x40] sm:$0xf] }
  0x35   : > { %v2171_v57 = vshll.u32 %v6792_v40, 16  ;;  %v5359_v59 = vcombine.low %v2140_v38, %v2150_v53  ;;  %v360_v61 = vsel %vm6705_vm4, %v355_v48, %v359_v35  ;;  %v2167_v2 = vrot.slane %v2165_v51, 4 }
  0x36   : > { %v2158_v0 = vor.u32 %v2157_v50, %v2154_v49  ;;  %v365_v5 = vrot.slane %v364_v55, 4  ;;  %v372_v7 = vshrl.u32 %v231_v52, 16  ;;  %v375_v8 = vshll.u32 %v231_v52, 16 }
  0x37   : > { %v2173_v6 = vrot.slane %v2171_v57, 5  ;;  %6028 = vmatprep.mubr.msk.bf16.mxu0 %vm709_vm3, %v5359_v59  ;;  %v2168_v17 = vor.u32 %v2167_v2, %v2163_v56  ;;  %v381_v10 = vshll.u32 %v232_v58, 16  ;;  %v385_v11 = vshrl.u32 %v232_v58, 16  ;;  %v5323_v2 = vld [vmem:[%s6679_s27 + $0x48] sm:$0xf] }
  0x38   : > { %v2159_v9 = vrot.slane %v2158_v0, 4  ;;  %v370_v13 = vsel %vm6705_vm4, %v365_v5, %v369_v47  ;;  %v374_v14 = vrot.slane %v372_v7, 4  ;;  %v377_v18 = vrot.slane %v375_v8, 5  ;;  %v6832_v8 = vld [vmem:[%s6679_s27 + $0x4c] sm:$0xf] }
  0x39   : > { %v391_v19 = vshll.u32 %v260_v4, 16  ;;  %v5133_v21 = vcombine.low %v360_v61, %v370_v13  ;;  %v2169_v24 = vrot.slane %v2168_v17, 4  ;;  %v383_v25 = vrot.slane %v381_v10, 5  ;;  %v261_v61 = vld [vmem:[%s6679_s27 + $0x44] sm:$0x1] }
  0x3a   : > { %v2164_v23 = vsel %vm6705_vm4, %v2159_v9, %v2163_v56  ;;  %v378_v27 = vor.u32 %v377_v18, %v374_v14  ;;  %v387_v29 = vrot.slane %v385_v11, 4  ;;  %v2176_v35 = vshrl.u32 %v5320_v12, 16 }
  0x3b   : > { %v393_v31 = vrot.slane %v391_v19, 5  ;;  %5893 = vmatmul.mubr.msk.bf16.gmra.mrb[4].mxu1 %vm709_vm3, %v5133_v21  ;;  %v2174_v37 = vsel %vm6705_vm4, %v2169_v24, %v2173_v6  ;;  %v2179_v36 = vshll.u32 %v5320_v12, 16  ;;  %v2185_v38 = vshll.u32 %v6809_v20, 16 }
  0x3c   : > { %v2189_v39 = vshrl.u32 %v6809_v20, 16  ;;  %v5360_v43 = vcombine.low %v2164_v23, %v2174_v37  ;;  %v379_v44 = vrot.slane %v378_v27, 4  ;;  %v388_v45 = vor.u32 %v387_v29, %v383_v25  ;;  %v6840_v23 = vld [vmem:[%s6679_s27 + $0x50] sm:$0x1]  ;;  %v6844_v27 = vld [vmem:[%s6679_s27 + $0x48] sm:$0xf] }
  0x3d   : > { %v2178_v47 = vrot.slane %v2176_v35, 4  ;;  %v2181_v48 = vrot.slane %v2179_v36, 5  ;;  %v2187_v49 = vrot.slane %v2185_v38, 5  ;;  %v2195_v51 = vshll.u32 %v6814_v34, 16  ;;  %v6847_v36 = vld [vmem:[%s6679_s27 + $0x4c] sm:$0xf] }
  0x3e   : > { %v2191_v50 = vrot.slane %v2189_v39, 4  ;;  %6029 = vmatmul.mubr.msk.bf16.gmra.mrb[4].mxu0 %vm709_vm3, %v5360_v43  ;;  %v384_v52 = vsel %vm6705_vm4, %v379_v44, %v383_v25  ;;  %v389_v53 = vrot.slane %v388_v45, 4  ;;  %v396_v55 = vshrl.u32 %v233_v42, 16 }
  0x3f   : > { %v399_v56 = vshll.u32 %v233_v42, 16  ;;  %v2182_v57 = vor.u32 %v2181_v48, %v2178_v47  ;;  %v2197_v59 = vrot.slane %v2195_v51, 5  ;;  %v405_v0 = vshll.u32 %v234_v26, 16 }
  0x40   : > { %v2192_v58 = vor.u32 %v2191_v50, %v2187_v49  ;;  %v394_v4 = vsel %vm6705_vm4, %v389_v53, %v393_v31  ;;  %v398_v5 = vrot.slane %v396_v55, 4  ;;  %v409_v7 = vshrl.u32 %v234_v26, 16  ;;  %v262_v26 = vld [vmem:[%s6679_s27 + $0x50] sm:$0x1]  ;;  %v5326_v53 = vld [vmem:[%s6679_s27 + $0x54] sm:$0xf] }
  0x41   : > { %v401_v6 = vrot.slane %v399_v56, 5  ;;  %v5134_v9 = vcombine.low %v384_v52, %v394_v4  ;;  %v2183_v17 = vrot.slane %v2182_v57, 4  ;;  %v407_v11 = vrot.slane %v405_v0, 5  ;;  %v6863_v4 = vld [vmem:[%s6679_s27 + $0x58] sm:$0xf] }
  0x42   : > { %v2193_v10 = vrot.slane %v2192_v58, 4  ;;  %v411_v13 = vrot.slane %v409_v7, 4  ;;  %v415_v14 = vshll.u32 %v261_v61, 16  ;;  %v2200_v18 = vshrl.u32 %v5323_v2, 16 }
  0x43   : > { %v402_v12 = vor.u32 %v401_v6, %v398_v5  ;;  %5896 = vmatprep.mubr.msk.bf16.mxu1 %vm709_vm3, %v5134_v9  ;;  %v2188_v19 = vsel %vm6705_vm4, %v2183_v17, %v2187_v49  ;;  %v2203_v24 = vshll.u32 %v5323_v2, 16  ;;  %v2209_v25 = vshll.u32 %v6832_v8, 16 }
  0x44   : > { %v2198_v21 = vsel %vm6705_vm4, %v2193_v10, %v2197_v59  ;;  %v412_v35 = vor.u32 %v411_v13, %v407_v11  ;;  %v417_v37 = vrot.slane %v415_v14, 5  ;;  %v2202_v38 = vrot.slane %v2200_v18, 4 }
  0x45   : > { %v5361_v29 = vcombine.low %v2188_v19, %v2198_v21  ;;  %v403_v31 = vrot.slane %v402_v12, 4  ;;  %v2205_v39 = vrot.slane %v2203_v24, 5  ;;  %v2211_v42 = vrot.slane %v2209_v25, 5  ;;  %v6869_v12 = vld [vmem:[%s6679_s27 + $0x5c] sm:$0x1] }
  0x46   : > { %v2213_v43 = vshrl.u32 %v6832_v8, 16  ;;  %v413_v45 = vrot.slane %v412_v35, 4  ;;  %v2219_v47 = vshll.u32 %v6840_v23, 16  ;;  %v420_v48 = vshrl.u32 %v6844_v27, 16  ;;  %v6873_v24 = vld [vmem:[%s6679_s27 + $0x54] sm:$0xf] }
  0x47   : > { %6032 = vmatprep.mubr.msk.bf16.mxu0 %vm709_vm3, %v5361_v29  ;;  %v408_v44 = vsel %vm6705_vm4, %v403_v31, %v407_v11  ;;  %v2206_v49 = vor.u32 %v2205_v39, %v2202_v38  ;;  %v423_v51 = vshll.u32 %v6844_v27, 16  ;;  %v429_v52 = vshll.u32 %v6847_v36, 16 }
  0x48   : > { %v2215_v50 = vrot.slane %v2213_v43, 4  ;;  %v418_v55 = vsel %vm6705_vm4, %v413_v45, %v417_v37  ;;  %v2221_v56 = vrot.slane %v2219_v47, 5  ;;  %v422_v57 = vrot.slane %v420_v48, 4  ;;  %v6879_v37 = vld [vmem:[%s6679_s27 + $0x58] sm:$0xf] }
  0x49   : > { %v433_v58 = vshrl.u32 %v6847_v36, 16  ;;  %v5135_v59 = vcombine.low %v408_v44, %v418_v55  ;;  %v2207_v61 = vrot.slane %v2206_v49, 4  ;;  %v425_v2 = vrot.slane %v423_v51, 5 }
  0x4a   : > { %v2216_v0 = vor.u32 %v2215_v50, %v2211_v42  ;;  %v431_v5 = vrot.slane %v429_v52, 5  ;;  %v439_v7 = vshll.u32 %v262_v26, 16  ;;  %v2224_v9 = vshrl.u32 %v5326_v53, 16  ;;  %v263_v26 = vld [vmem:[%s6679_s27 + $0x5c] sm:$0x1] }
  0x4b   : > { %v435_v6 = vrot.slane %v433_v58, 4  ;;  %5897 = vmatmul.mubr.msk.bf16.gmra.mrb[8].mxu1 %vm709_vm3, %v5135_v59  ;;  %v2212_v17 = vsel %vm6705_vm4, %v2207_v61, %v2211_v42  ;;  %v426_v11 = vor.u32 %v425_v2, %v422_v57  ;;  %v2227_v13 = vshll.u32 %v5326_v53, 16  ;;  %v5329_v53 = vld [vmem:[%s6679_s27 + $0x60] sm:$0xf]  ;;  %v6893_v59 = vld [vmem:[%s6679_s27 + $0x64] sm:$0xf] }
  0x4c   : > { %v2217_v10 = vrot.slane %v2216_v0, 4  ;;  %v441_v18 = vrot.slane %v439_v7, 5  ;;  %v2226_v19 = vrot.slane %v2224_v9, 4  ;;  %v2233_v21 = vshll.u32 %v6863_v4, 16  ;;  %v6900_v9 = vld [vmem:[%s6679_s27 + $0x68] sm:$0x1] }
  0x4d   : > { %v436_v14 = vor.u32 %v435_v6, %v431_v5  ;;  %v427_v29 = vrot.slane %v426_v11, 4  ;;  %v2229_v31 = vrot.slane %v2227_v13, 5  ;;  %v2237_v35 = vshrl.u32 %v6863_v4, 16 }
  0x4e   : > { %v2222_v25 = vsel %vm6705_vm4, %v2217_v10, %v2221_v56  ;;  %v2235_v42 = vrot.slane %v2233_v21, 5  ;;  %v2243_v43 = vshll.u32 %v6869_v12, 16  ;;  %v444_v48 = vshrl.u32 %v6873_v24, 16 }
  0x4f   : > { %v5362_v38 = vcombine.low %v2212_v17, %v2222_v25  ;;  %v437_v39 = vrot.slane %v436_v14, 4  ;;  %v432_v44 = vsel %vm6705_vm4, %v427_v29, %v431_v5  ;;  %v2230_v45 = vor.u32 %v2229_v31, %v2226_v19  ;;  %v6904_v19 = vld [vmem:[%s6679_s27 + $0x60] sm:$0xf] }
  0x50   : > { %v2239_v47 = vrot.slane %v2237_v35, 4  ;;  %v2245_v50 = vrot.slane %v2243_v43, 5  ;;  %v447_v51 = vshll.u32 %v6873_v24, 16  ;;  %v453_v52 = vshll.u32 %v6879_v37, 16  ;;  %v6910_v35 = vld [vmem:[%s6679_s27 + $0x64] sm:$0xf] }
  0x51   : > { %6033 = vmatmul.mubr.msk.bf16.gmra.mrb[8].mxu0 %vm709_vm3, %v5362_v38  ;;  %v442_v49 = vsel %vm6705_vm4, %v437_v39, %v441_v18  ;;  %v2231_v56 = vrot.slane %v2230_v45, 4  ;;  %v446_v58 = vrot.slane %v444_v48, 4  ;;  %v457_v2 = vshrl.u32 %v6879_v37, 16 }
  0x52   : > { %v5136_v55 = vcombine.low %v432_v44, %v442_v49  ;;  %v2240_v57 = vor.u32 %v2239_v47, %v2235_v42  ;;  %v449_v61 = vrot.slane %v447_v51, 5  ;;  %v455_v0 = vrot.slane %v453_v52, 5 }
  0x53   : > { %v463_v5 = vshll.u32 %v263_v26, 16  ;;  %v2236_v6 = vsel %vm6705_vm4, %v2231_v56, %v2235_v42  ;;  %v2248_v17 = vshrl.u32 %v5329_v53, 16  ;;  %v2251_v10 = vshll.u32 %v5329_v53, 16 }
  0x54   : > { %5900 = vmatprep.mubr.msk.bf16.mxu1 %vm709_vm3, %v5136_v55  ;;  %v2241_v7 = vrot.slane %v2240_v57, 4  ;;  %v450_v11 = vor.u32 %v449_v61, %v446_v58  ;;  %v459_v13 = vrot.slane %v457_v2, 4  ;;  %v2257_v18 = vshll.u32 %v6893_v59, 16  ;;  %v5389_v58 = vld [vmem:[%s6679_s27 + $0xc] sm:$0xe] }
  0x55   : > { %v465_v14 = vrot.slane %v463_v5, 5  ;;  %v2250_v25 = vrot.slane %v2248_v17, 4  ;;  %v2253_v29 = vrot.slane %v2251_v10, 5  ;;  %v2261_v31 = vshrl.u32 %v6893_v59, 16 }
  0x56   : > { %v2246_v21 = vsel %vm6705_vm4, %v2241_v7, %v2245_v50  ;;  %v451_v39 = vrot.slane %v450_v11, 4  ;;  %v460_v42 = vor.u32 %v459_v13, %v455_v0  ;;  %v2259_v43 = vrot.slane %v2257_v18, 5  ;;  %v264_v50 = vld [vmem:[%s6679_s27 + $0x68] sm:$0x1] }
  0x57   : > { %v5363_v38 = vcombine.low %v2236_v6, %v2246_v21  ;;  %v2254_v44 = vor.u32 %v2253_v29, %v2250_v25  ;;  %v2263_v45 = vrot.slane %v2261_v31, 4  ;;  %v2267_v47 = vshll.u32 %v6900_v9, 16  ;;  %v6938_v29 = vld [vmem:[%s6679_s27 + $0x70] sm:$0xf] }
  0x58   : > { %v468_v26 = vshrl.u32 %v6904_v19, 16  ;;  %v456_v48 = vsel %vm6705_vm4, %v451_v39, %v455_v0  ;;  %v461_v49 = vrot.slane %v460_v42, 4  ;;  %v471_v51 = vshll.u32 %v6904_v19, 16  ;;  %v6925_v0 = vld [vmem:[%s6679_s27 + $0x6c] sm:$0xf] }
  0x59   : > { %6036 = vmatprep.mubr.msk.bf16.mxu0 %vm709_vm3, %v5363_v38  ;;  %v477_v52 = vshll.u32 %v6910_v35, 16  ;;  %v2255_v53 = vrot.slane %v2254_v44, 4  ;;  %v2264_v55 = vor.u32 %v2263_v45, %v2259_v43  ;;  %v2269_v56 = vrot.slane %v2267_v47, 5 }
  0x5a   : > { %v470_v57 = vrot.slane %v468_v26, 4  ;;  %v466_v61 = vsel %vm6705_vm4, %v461_v49, %v465_v14  ;;  %v473_v2 = vrot.slane %v471_v51, 5  ;;  %v481_v6 = vshrl.u32 %v6910_v35, 16  ;;  %v265_v26 = vld [vmem:[%s6679_s27 + $0x74] sm:$0x1] }
  0x5b   : > { %v479_v5 = vrot.slane %v477_v52, 5  ;;  %v5137_v7 = vcombine.low %v456_v48, %v466_v61  ;;  %v2260_v17 = vsel %vm6705_vm4, %v2255_v53, %v2259_v43  ;;  %v2265_v10 = vrot.slane %v2264_v55, 4  ;;  %v5390_v48 = vld [vmem:[%s6679_s27 + $0x18] sm:$0xe] }
  0x5c   : > { %v487_v11 = vshll.u32 %v264_v50, 16  ;;  %v474_v14 = vor.u32 %v473_v2, %v470_v57  ;;  %v483_v18 = vrot.slane %v481_v6, 4  ;;  %v5405_v21 = vrot.slane %v5389_v58, 9  ;;  %v6957_v53 = vld [vmem:[%s6679_s27 + $0x78] sm:$0xf] }
  0x5d   : > { %v2825_v25 = vrot.slane %v2823_v62, 4  ;;  %5901 = vmatmul.mubr.msk.bf16.gmra.mrb[12].mxu1 %vm709_vm3, %v5137_v7  ;;  %v2270_v31 = vsel %vm6705_vm4, %v2265_v10, %v2269_v56  ;;  %v492_v39 = vshrl.u32 %v6925_v0, 16  ;;  %v495_v42 = vshll.u32 %v6925_v0, 16  ;;  %v266_v57 = vld [vmem:[%s6679_s27 + $0x80] sm:$0x1] }
  0x5e   : > { %v489_v38 = vrot.slane %v487_v11, 5  ;;  %v5364_v43 = vcombine.low %v2260_v17, %v2270_v31  ;;  %v475_v44 = vrot.slane %v474_v14, 4  ;;  %v484_v45 = vor.u32 %v483_v18, %v479_v5  ;;  %v5391_v10 = vld [vmem:[%s6679_s27 + $0x24] sm:$0xe] }
  0x5f   : > { %v2824_v47 = vsel %vm6931_vm7, %v5405_v21, %v2823_v62  ;;  %v2827_v49 = vsel %vm6931_vm7, %v2825_v25, %v2826_v63  ;;  %v494_v50 = vrot.slane %v492_v39, 4  ;;  %v497_v51 = vrot.slane %v495_v42, 5  ;;  %v6983_v39 = vld [vmem:[%s6679_s27 + $0x84] sm:$0xf] }
  0x60   : > { %v501_v52 = vshll.u32 %v6938_v29, 16  ;;  %6037 = vmatmul.mubr.msk.bf16.gmra.mrb[12].mxu0 %vm709_vm3, %v5364_v43  ;;  %v480_v15 = vsel %vm6705_vm4, %v475_v44, %v479_v5  ;;  %v485_v62 = vrot.slane %v484_v45, 4  ;;  %v5422_v55 = vcombine.low %v2824_v47, %v2827_v49  ;;  %v6991_v43 = vld [vmem:[%s6679_s27 + $0x88] sm:$0xf] }
  0x61   : > { %v505_v56 = vshrl.u32 %v6938_v29, 16  ;;  %v498_v63 = vor.u32 %v497_v51, %v494_v50  ;;  %v511_v61 = vshll.u32 %v265_v26, 16  ;;  %v5406_v2 = vrot.slane %v5390_v48, 9 }
  0x62   : > { %v503_v58 = vrot.slane %v501_v52, 5  ;;  %v490_v6 = vsel %vm6705_vm4, %v485_v62, %v489_v38  ;;  %6058 = vmatprep.mubr.msk.bf16.mxu0 %vm709_vm3, %v5422_v55  ;;  %v2834_v5 = vsel %vm6931_vm7, %v6748_v30, %v2833_v28  ;;  %v516_v17 = vshrl.u32 %v6957_v53, 16  ;;  %v267_v52 = vld [vmem:[%s6679_s27 + $0x8c] sm:$0x1] }
  0x63   : > { %v507_v7 = vrot.slane %v505_v56, 4  ;;  %v5138_v11 = vcombine.low %v480_v15, %v490_v6  ;;  %v499_v14 = vrot.slane %v498_v63, 4  ;;  %v513_v18 = vrot.slane %v511_v61, 5 }
  0x64   : > { %v2831_v21 = vsel %vm6931_vm7, %v5406_v2, %v2830_v22  ;;  %v518_v38 = vrot.slane %v516_v17, 4  ;;  %v519_v1 = vshll.u32 %v6957_v53, 16  ;;  %v525_v30 = vshll.u32 %v6964_v16, 16  ;;  %v6996_v22 = vld [vmem:[%s8490_s1 + $0xe] sm:$0x3] }
  0x65   : > { %v508_v25 = vor.u32 %v507_v7, %v503_v58  ;;  %v5423_v31 = vcombine.low %v2831_v21, %v2834_v5  ;;  %5904 = vmatprep.mubr.msk.bf16.mxu1 %vm709_vm3, %v5138_v11  ;;  %v504_v28 = vsel %vm6705_vm4, %v499_v14, %v503_v58  ;;  %v529_v60 = vshrl.u32 %v6964_v16, 16  ;;  %v7015_v5 = vld [vmem:[%s6679_s27 + $0x90] sm:$0xf] }
  0x66   : > { %v535_v42 = vshll.u32 %v266_v57, 16  ;;  %v521_v45 = vrot.slane %v519_v1, 5  ;;  %v5407_v47 = vrot.slane %v5391_v10, 9  ;;  %v2837_v26 = vrot.slane %v6755_v46, 5  ;;  %v5392_v57 = vld [vmem:[%s6679_s27 + $0x30] sm:$0xe] }
  0x67   : > { %v509_v44 = vrot.slane %v508_v25, 4  ;;  %v527_v48 = vrot.slane %v525_v30, 5  ;;  %v531_v49 = vrot.slane %v529_v60, 4  ;;  %v2840_v51 = vrot.slane %v6764_v54, 5  ;;  %v7027_v30 = vld [vmem:[%s6679_s27 + $0x94] sm:$0xf] }
  0x68   : > { %v537_v50 = vrot.slane %v535_v42, 5  ;;  %6059 = vmatmul.mubr.msk.bf16.vlgmr.msra.gmra.mrb[0].mxu0 %vm709_vm3, %v5423_v31  ;;  %v522_v62 = vor.u32 %v521_v45, %v518_v38  ;;  %v2838_v55 = vsel %vm6931_vm7, %v5407_v47, %v2837_v26  ;;  %v2839_v56 = vrot.slane %v2837_v26, 4  ;;  %v268_v60 = vld [vmem:[%s6679_s27 + $0x98] sm:$0x1]  ;;  %v5393_v26 = vld [vmem:[%s6679_s27 + $0x3c] sm:$0xe] }
  0x69   : > { %v514_v15 = vsel %vm6705_vm4, %v509_v44, %v513_v18  ;;  %6091 = vmatpush3.bf16.msra.mxu0 %v6715_v41  ;;  %v532_v46 = vor.u32 %v531_v49, %v527_v48  ;;  %v540_v58 = vshrl.u32 %v6983_v39, 16  ;;  %v543_v54 = vshll.u32 %v6983_v39, 16 }
  0x6a   : > { %v5139_v63 = vcombine.low %v504_v28, %v514_v15  ;;  %v523_v61 = vrot.slane %v522_v62, 4  ;;  %v2841_v2 = vsel %vm6931_vm7, %v2839_v56, %v2840_v51  ;;  %v549_v6 = vshll.u32 %v6991_v43, 16  ;;  %6458 = vmatprep.subr.msk.bf16.mxu0 %vm758_vm0, %v6996_v22 }
  0x6b   : > { %v553_v7 = vshrl.u32 %v6991_v43, 16  ;;  %v533_v41 = vrot.slane %v532_v46, 4  ;;  %v5424_v17 = vcombine.low %v2838_v55, %v2841_v2  ;;  %v542_v10 = vrot.slane %v540_v58, 4  ;;  %v7047_v46 = vld [vmem:[%s6679_s27 + $0xa0] sm:$0xf] }
  0x6c   : > { %5905 = vmatmul.mubr.msk.bf16.gmra.mrb[16].mxu1 %vm709_vm3, %v5139_v63  ;;  %v545_v11 = vrot.slane %v543_v54, 5  ;;  %v528_v14 = vsel %vm6705_vm4, %v523_v61, %v527_v48  ;;  %v551_v18 = vrot.slane %v549_v6, 5  ;;  %v559_v25 = vshll.u32 %v267_v52, 16  ;;  %v7036_v52 = vld [vmem:[%s6679_s27 + $0x9c] sm:$0xf] }
  0x6d   : > { %v555_v21 = vrot.slane %v553_v7, 4  ;;  %v538_v31 = vsel %vm6705_vm4, %v533_v41, %v537_v50  ;;  %6062 = vmatprep.mubr.msk.bf16.mxu0 %vm709_vm3, %v5424_v17  ;;  %v5408_v1 = vrot.slane %v5392_v57, 9  ;;  %v2844_v28 = vrot.slane %v6784_v33, 5 }
  0x6e   : > { %v546_v38 = vor.u32 %v545_v11, %v542_v10  ;;  %v5140_v42 = vcombine.low %v528_v14, %v538_v31  ;;  %v561_v45 = vrot.slane %v559_v25, 5  ;;  %v2847_v47 = vrot.slane %v6792_v40, 5  ;;  %v269_v10 = vld [vmem:[%s6679_s27 + $0xa4] sm:$0x1]  ;;  %v5394_v11 = vld [vmem:[%s6679_s27 + $0x48] sm:$0xe] }
  0x6f   : > { %v556_v44 = vor.u32 %v555_v21, %v551_v18  ;;  %v2845_v49 = vsel %vm6931_vm7, %v5408_v1, %v2844_v28  ;;  %v2846_v50 = vrot.slane %v2844_v28, 4  ;;  %v564_v51 = vshrl.u32 %v7015_v5, 16 }
  0x70   : > { %v547_v48 = vrot.slane %v546_v38, 4  ;;  %5908 = vmatprep.mubr.msk.bf16.mxu1 %vm709_vm3, %v5140_v42  ;;  %v567_v15 = vshll.u32 %v7015_v5, 16  ;;  %v573_v62 = vshll.u32 %v7027_v30, 16  ;;  %v577_v40 = vshrl.u32 %v7027_v30, 16 }
  0x71   : > { %v557_v33 = vrot.slane %v556_v44, 4  ;;  %v2848_v56 = vsel %vm6931_vm7, %v2846_v50, %v2847_v47  ;;  %v566_v57 = vrot.slane %v564_v51, 4  ;;  %v583_v63 = vshll.u32 %v268_v60, 16 }
  0x72   : > { %v552_v55 = vsel %vm6705_vm4, %v547_v48, %v551_v18  ;;  %v5425_v54 = vcombine.low %v2845_v49, %v2848_v56  ;;  %v569_v61 = vrot.slane %v567_v15, 5  ;;  %v575_v2 = vrot.slane %v573_v62, 5  ;;  %v7073_v56 = vld [vmem:[%s6679_s27 + $0xac] sm:$0xf] }
  0x73   : > { %v562_v58 = vsel %vm6705_vm4, %v557_v33, %v561_v45  ;;  %v579_v7 = vrot.slane %v577_v40, 4  ;;  %v585_v41 = vrot.slane %v583_v63, 5  ;;  %v5409_v17 = vrot.slane %v5393_v26, 9  ;;  %v7068_v33 = vld [vmem:[%s6679_s27 + $0xa8] sm:$0xf] }
  0x74   : > { %v5141_v6 = vcombine.low %v552_v55, %v562_v58  ;;  %6063 = vmatmul.mubr.msk.bf16.gmra.mrb[4].mxu0 %vm709_vm3, %v5425_v54  ;;  %v570_v14 = vor.u32 %v569_v61, %v566_v57  ;;  %v2851_v18 = vrot.slane %v6809_v20, 5  ;;  %v2854_v21 = vrot.slane %v6814_v34, 5  ;;  %v270_v61 = vld [vmem:[%s6679_s27 + $0xb0] sm:$0x1] }
  0x75   : > { %v588_v25 = vshrl.u32 %v7036_v52, 16  ;;  %v580_v31 = vor.u32 %v579_v7, %v575_v2  ;;  %v591_v38 = vshll.u32 %v7036_v52, 16  ;;  %v597_v1 = vshll.u32 %v7047_v46, 16 }
  0x76   : > { %5909 = vmatmul.mubr.msk.bf16.gmra.mrb[20].mxu1 %vm709_vm3, %v5141_v6  ;;  %v601_v28 = vshrl.u32 %v7047_v46, 16  ;;  %v571_v60 = vrot.slane %v570_v14, 4  ;;  %v2852_v42 = vsel %vm6931_vm7, %v5409_v17, %v2851_v18  ;;  %v2853_v20 = vrot.slane %v2851_v18, 4  ;;  %v7088_v14 = vld [vmem:[%s6679_s27 + $0xb4] sm:$0xf] }
  0x77   : > { %v590_v44 = vrot.slane %v588_v25, 4  ;;  %v581_v34 = vrot.slane %v580_v31, 4  ;;  %v593_v45 = vrot.slane %v591_v38, 5  ;;  %v599_v47 = vrot.slane %v597_v1, 5 }
  0x78   : > { %v603_v26 = vrot.slane %v601_v28, 4  ;;  %v576_v48 = vsel %vm6705_vm4, %v571_v60, %v575_v2  ;;  %v2855_v49 = vsel %vm6931_vm7, %v2853_v20, %v2854_v21  ;;  %v607_v50 = vshll.u32 %v269_v10, 16  ;;  %v5395_v2 = vld [vmem:[%s6679_s27 + $0x54] sm:$0xe] }
  0x79   : > { %v5410_v51 = vrot.slane %v5394_v11, 9  ;;  %v586_v15 = vsel %vm6705_vm4, %v581_v34, %v585_v41  ;;  %v5426_v62 = vcombine.low %v2852_v42, %v2855_v49  ;;  %v594_v40 = vor.u32 %v593_v45, %v590_v44  ;;  %v7097_v42 = vld [vmem:[%s6679_s27 + $0xb8] sm:$0xf]  ;;  %v271_v49 = vld [vmem:[%s6679_s27 + $0xbc] sm:$0x1] }
  0x7a   : > { %v604_v55 = vor.u32 %v603_v26, %v599_v47  ;;  %v5142_v57 = vcombine.low %v576_v48, %v586_v15  ;;  %v609_v63 = vrot.slane %v607_v50, 5  ;;  %v2858_v58 = vrot.slane %v6832_v8, 5 }
  0x7b   : > { %v2861_v54 = vrot.slane %v6840_v23, 5  ;;  %6066 = vmatprep.mubr.msk.bf16.mxu0 %vm709_vm3, %v5426_v62  ;;  %v595_v6 = vrot.slane %v594_v40, 4  ;;  %v612_v41 = vshrl.u32 %v7068_v33, 16  ;;  %v615_v17 = vshll.u32 %v7068_v33, 16 }
  0x7c   : > { %v605_v7 = vrot.slane %v604_v55, 4  ;;  %5912 = vmatprep.mubr.msk.bf16.mxu1 %vm709_vm3, %v5142_v57  ;;  %v2859_v10 = vsel %vm6931_vm7, %v5410_v51, %v2858_v58  ;;  %v2860_v11 = vrot.slane %v2858_v58, 4  ;;  %v621_v8 = vshll.u32 %v7073_v56, 16  ;;  %v5396_v55 = vld [vmem:[%s6679_s27 + $0x60] sm:$0xe] }
  0x7d   : > { %v625_v23 = vshrl.u32 %v7073_v56, 16  ;;  %v600_v18 = vsel %vm6705_vm4, %v595_v6, %v599_v47  ;;  %v614_v25 = vrot.slane %v612_v41, 4  ;;  %v617_v31 = vrot.slane %v615_v17, 5  ;;  %v5397_v6 = vld [vmem:[%s6679_s27 + $0x6c] sm:$0xe] }
  0x7e   : > { %v610_v21 = vsel %vm6705_vm4, %v605_v7, %v609_v63  ;;  %v2862_v1 = vsel %vm6931_vm7, %v2860_v11, %v2861_v54  ;;  %v623_v28 = vrot.slane %v621_v8, 5  ;;  %v631_v34 = vshll.u32 %v270_v61, 16  ;;  %v5333_v11 = vld [vmem:[%s6679_s27 + $0x70] sm:$0xf]  ;;  %v5334_v8 = vld [vmem:[%s6679_s27 + $0x74] sm:$0x1] }
  0x7f   : > { %v5143_v38 = vcombine.low %v600_v18, %v610_v21  ;;  %v627_v60 = vrot.slane %v625_v23, 4  ;;  %v5427_v20 = vcombine.low %v2859_v10, %v2862_v1  ;;  %v618_v44 = vor.u32 %v617_v31, %v614_v25 }
  0x80   : > { %v5411_v45 = vrot.slane %v5395_v2, 9  ;;  %v2865_v26 = vrot.slane %v6863_v4, 5  ;;  %v2868_v48 = vrot.slane %v6869_v12, 5  ;;  %v636_v50 = vshrl.u32 %v7088_v14, 16 }
  0x81   : > { %5913 = vmatmul.mubr.msk.bf16.gmra.mrb[24].mxu1 %vm709_vm3, %v5143_v38  ;;  %v628_v47 = vor.u32 %v627_v60, %v623_v28  ;;  %6067 = vmatmul.mubr.msk.bf16.gmra.mrb[8].mxu0 %vm709_vm3, %v5427_v20  ;;  %v619_v51 = vrot.slane %v618_v44, 4  ;;  %v633_v15 = vrot.slane %v631_v34, 5  ;;  %v639_v62 = vshll.u32 %v7088_v14, 16 }
  0x82   : > { %v645_v40 = vshll.u32 %v7097_v42, 16  ;;  %v2866_v4 = vsel %vm6931_vm7, %v5411_v45, %v2865_v26  ;;  %v2867_v12 = vrot.slane %v2865_v26, 4  ;;  %v638_v63 = vrot.slane %v636_v50, 4 }
  0x83   : > { %v629_v57 = vrot.slane %v628_v47, 4  ;;  %v624_v58 = vsel %vm6705_vm4, %v619_v51, %v623_v28  ;;  %v641_v54 = vrot.slane %v639_v62, 5  ;;  %v649_v2 = vshrl.u32 %v7097_v42, 16  ;;  %v5398_v47 = vld [vmem:[%s6679_s27 + $0x78] sm:$0xe] }
  0x84   : > { %v647_v61 = vrot.slane %v645_v40, 5  ;;  %v2869_v41 = vsel %vm6931_vm7, %v2867_v12, %v2868_v48  ;;  %v655_v17 = vshll.u32 %v271_v49, 16  ;;  %v5412_v10 = vrot.slane %v5396_v55, 9  ;;  %v6533_v51 = vld [vmem:[%s6679_s27] sm:$0xf] }
  0x85   : > { %v634_v7 = vsel %vm6705_vm4, %v629_v57, %v633_v15  ;;  %v5428_v18 = vcombine.low %v2866_v4, %v2869_v41  ;;  %v642_v21 = vor.u32 %v641_v54, %v638_v63  ;;  %v651_v25 = vrot.slane %v649_v2, 4  ;;  %v7135_v15 = vld [vmem:[%s6679_s27 + $0x4] sm:$0xf]  ;;  %v7139_v40 = vld [vmem:[%s6679_s27 + $0x7c] sm:$0xf] }
  0x86   : > { %v5144_v23 = vcombine.low %v624_v58, %v634_v7  ;;  %v657_v31 = vrot.slane %v655_v17, 5  ;;  %v2872_v38 = vrot.slane %v6893_v59, 5  ;;  %v2875_v1 = vrot.slane %v6900_v9, 5  ;;  %v7142_v55 = vld [vmem:[%s6679_s27 + $0x80] sm:$0x1] }
  0x87   : > { %v5413_v28 = vrot.slane %v5397_v6, 9  ;;  %6070 = vmatprep.mubr.msk.bf16.mxu0 %vm709_vm3, %v5428_v18  ;;  %v643_v60 = vrot.slane %v642_v21, 4  ;;  %v652_v20 = vor.u32 %v651_v25, %v647_v61  ;;  %v2879_v44 = vrot.slane %v5333_v11, 5  ;;  %v5339_v57 = vld [vmem:[%s6679_s27 + $0x88] sm:$0xf] }
  0x88   : > { %5916 = vmatprep.mubr.msk.bf16.mxu1 %vm709_vm3, %v5144_v23  ;;  %v2882_v34 = vrot.slane %v5334_v8, 5  ;;  %v2873_v45 = vsel %vm6931_vm7, %v5412_v10, %v2872_v38  ;;  %v2874_v59 = vrot.slane %v2872_v38, 4  ;;  %v5162_v62 = vcombine.low %v6533_v51, %v7135_v15  ;;  %v5340_v54 = vld [vmem:[%s6679_s27 + $0x8c] sm:$0x1]  ;;  %v5342_v17 = vld [vmem:[%s6679_s27 + $0x94] sm:$0xf] }
  0x89   : > { %v648_v9 = vsel %vm6705_vm4, %v643_v60, %v647_v61  ;;  %v653_v26 = vrot.slane %v652_v20, 4  ;;  %v2880_v48 = vsel %vm6931_vm7, %v5413_v28, %v2879_v44  ;;  %v2881_v49 = vrot.slane %v2879_v44, 4  ;;  %v5399_v61 = vld [vmem:[%s6679_s27 + $0x84] sm:$0xe]  ;;  %v5400_v23 = vld [vmem:[%s6679_s27 + $0x90] sm:$0xe] }
  0x8a   : > { %v2876_v50 = vsel %vm6931_vm7, %v2874_v59, %v2875_v1  ;;  %v5414_v58 = vrot.slane %v5398_v47, 9  ;;  %v2886_v7 = vrot.slane %v7139_v40, 5  ;;  %v2889_v41 = vrot.slane %v7142_v55, 5  ;;  %v5343_v25 = vld [vmem:[%s6679_s27 + $0x98] sm:$0x1] }
  0x8b   : > { %v658_v4 = vsel %vm6705_vm4, %v653_v26, %v657_v31  ;;  %v5429_v12 = vcombine.low %v2873_v45, %v2876_v50  ;;  %v2883_v63 = vsel %vm6931_vm7, %v2881_v49, %v2882_v34  ;;  %v5415_v10 = vrot.slane %v5399_v61, 9  ;;  %v5345_v31 = vld [vmem:[%s6679_s27 + $0xa0] sm:$0xf]  ;;  %v5346_v60 = vld [vmem:[%s6679_s27 + $0xa4] sm:$0x1] }
  0x8c   : > { %v5145_v2 = vcombine.low %v648_v9, %v658_v4  ;;  %v5430_v6 = vcombine.low %v2880_v48, %v2883_v63  ;;  %v2893_v11 = vrot.slane %v5339_v57, 5  ;;  %v2896_v8 = vrot.slane %v5340_v54, 5  ;;  %v5401_v20 = vld [vmem:[%s6679_s27 + $0x9c] sm:$0xe]  ;;  %v6535_v44 = vld [vmem:[%s6679_s27 + $0xc] sm:$0xf] }
  0x8d   : > { %6071 = vmatmul.mubr.msk.bf16.gmra.mrb[12].mxu0 %vm709_vm3, %v5429_v12  ;;  %v2887_v18 = vsel %vm6931_vm7, %v5414_v58, %v2886_v7  ;;  %v2888_v21 = vrot.slane %v2886_v7, 4  ;;  %v2900_v28 = vrot.slane %v5342_v17, 5  ;;  %v7169_v34 = vld [vmem:[%s6679_s27 + $0x10] sm:$0xf]  ;;  %v6537_v47 = vld [vmem:[%s6679_s27 + $0x18] sm:$0xf] }
  0x8e   : > { %5917 = vmatmul.mubr.msk.bf16.gmra.mrb[28].mxu1 %vm709_vm3, %v5145_v2  ;;  %6074 = vmatprep.mubr.msk.bf16.mxu0 %vm709_vm3, %v5430_v6  ;;  %v2894_v38 = vsel %vm6931_vm7, %v5415_v10, %v2893_v11  ;;  %v2895_v1 = vrot.slane %v2893_v11, 4  ;;  %v5163_v45 = vcombine.low %v6535_v44, %v7169_v34  ;;  %v7176_v9 = vld [vmem:[%s6679_s27 + $0x1c] sm:$0xf]  ;;  %v5416_v48 = vrot.slane %v5400_v23, 9  ;;  %v5348_v57 = vld [vmem:[%s6679_s27 + $0xac] sm:$0xf] }
  0x8f   : > { %5922 = vmatprep.mubr.msk.bf16.mxu1 %vm709_vm3, %v5162_v62  ;;  %v2890_v59 = vsel %vm6931_vm7, %v2888_v21, %v2889_v41  ;;  %v5164_v26 = vcombine.low %v6537_v47, %v7176_v9  ;;  %v2902_v51 = vrot.slane %v2900_v28, 4  ;;  %v2903_v62 = vrot.slane %v5343_v25, 5  ;;  %v6539_v54 = vld [vmem:[%s8490_s1 + $0x4] sm:$0x3]  ;;  %v5351_v2 = vld [vmem:[%s6679_s27 + $0xb8] sm:$0xf] }
  0x90   : > { %v5431_v49 = vcombine.low %v2887_v18, %v2890_v59  ;;  %v2897_v50 = vsel %vm6931_vm7, %v2895_v1, %v2896_v8  ;;  %v5417_v12 = vrot.slane %v5401_v20, 9  ;;  %v2907_v63 = vrot.slane %v5345_v31, 5  ;;  %v7191_v7 = vld [vmem:[%s8490_s1 + $0x6] sm:$0x3]  ;;  %v5349_v10 = vld [vmem:[%s6679_s27 + $0xb0] sm:$0x1] }
  0x91   : > { %v5432_v4 = vcombine.low %v2894_v38, %v2897_v50  ;;  %v2910_v58 = vrot.slane %v5346_v60, 5  ;;  %v1477_v61 = vsel %vm758_vm0, %v6539_v54, 0  ;;  %v2901_v41 = vsel %vm6931_vm7, %v5416_v48, %v2900_v28  ;;  %v5402_v11 = vld [vmem:[%s6679_s27 + $0xa8] sm:$0xe]  ;;  %v5352_v25 = vld [vmem:[%s6679_s27 + $0xbc] sm:$0x1] }
  0x92   : > { %v2909_v6 = vrot.slane %v2907_v63, 4  ;;  %v2904_v17 = vsel %vm6931_vm7, %v2902_v51, %v2903_v62  ;;  %v2914_v8 = vrot.slane %v5348_v57, 5  ;;  %v2908_v23 = vsel %vm6931_vm7, %v5417_v12, %v2907_v63  ;;  %v5403_v31 = vld [vmem:[%s6679_s27 + $0xb4] sm:$0xe]  ;;  %v6540_v38 = vld [vmem:[%s6679_s27 + $0x24] sm:$0xf] }
  0x93   : > { %v2921_v21 = vrot.slane %v5351_v2, 5  ;;  %v7212_v1 = vld [vmem:[%s6679_s27 + $0x28] sm:$0xf]  ;;  %v5433_v60 = vcombine.low %v2901_v41, %v2904_v17  ;;  %v5418_v44 = vrot.slane %v5402_v11, 9  ;;  %v2917_v59 = vrot.slane %v5349_v10, 5 }
  0x94   : > { %v2911_v18 = vsel %vm6931_vm7, %v2909_v6, %v2910_v58  ;;  %v5165_v28 = vcombine.low %v6540_v38, %v7212_v1  ;;  %v6542_v47 = vld [vmem:[%s6679_s27 + $0x30] sm:$0xf]  ;;  %v2924_v51 = vrot.slane %v5352_v25, 5  ;;  %v5354_v62 = vld [vmem:[%s6679_s27 + $0xc4] sm:$0xf]  ;;  %v2309_v25 = vshrl.u32 %v7139_v40, 16 }
  0x95   : > { %6075 = vmatmul.mubr.msk.bf16.gmra.mrb[16].mxu0 %vm709_vm3, %v5431_v49  ;;  %v5434_v20 = vcombine.low %v2908_v23, %v2911_v18  ;;  %v5419_v49 = vrot.slane %v5403_v31, 9  ;;  %v2923_v50 = vrot.slane %v2921_v21, 4  ;;  %v2915_v57 = vsel %vm6931_vm7, %v5418_v44, %v2914_v8  ;;  %v5404_v12 = vld [vmem:[%s6679_s27 + $0xc0] sm:$0xe]  ;;  %v6544_v41 = vld [vmem:[%s6679_s27 + $0x3c] sm:$0xf] }
  0x96   : > { %5923 = vmatmul.mubr.msk.bf16.vlgmr.msra.gmra.mrb[0].mxu1 %vm709_vm3, %v5163_v45  ;;  %6078 = vmatprep.mubr.msk.bf16.mxu0 %vm709_vm3, %v5432_v4  ;;  %v2916_v45 = vrot.slane %v2914_v8, 4  ;;  %v2928_v63 = vrot.slane %v5354_v62, 5  ;;  %v5420_v6 = vrot.slane %v5404_v12, 9  ;;  %v7237_v17 = vld [vmem:[%s6679_s27 + $0x40] sm:$0xf]  ;;  %v5168_v18 = vcombine.low %v6844_v27, %v6847_v36  ;;  %v6496_v62 = vld [vmem:[%s6679_s27 + $0x24] sm:$0xff]  }
  0x97   : > { %5955 = vmatpush3.bf16.msra.mxu1 %v1477_v61  ;;  %5926 = vmatprep.mubr.msk.bf16.mxu1 %vm709_vm3, %v5164_v26  ;;  %v7217_v26 = vld [vmem:[%s6679_s27 + $0x34] sm:$0xf]  ;;  %v2922_v58 = vsel %vm6931_vm7, %v5419_v49, %v2921_v21  ;;  %v2925_v54 = vsel %vm6931_vm7, %v2923_v50, %v2924_v51  ;;  %v5355_v61 = vld [vmem:[%s6679_s27 + $0xc8] sm:$0x1]  ;;  %v5167_v10 = vcombine.low %v6544_v41, %v7237_v17  ;;  %v2305_v21 = vshll.u32 %v7139_v40, 16 }
  0x98   : > { %6453 = vmatprep.subr.msk.bf16.mxu1 %vm758_vm0, %v7191_v7  ;;  %v5166_v48 = vcombine.low %v6542_v47, %v7217_v26  ;;  %v2918_v4 = vsel %vm6931_vm7, %v2916_v45, %v2917_v59  ;;  %v5436_v11 = vcombine.low %v2922_v58, %v2925_v54  ;;  %v2930_v8 = vrot.slane %v2928_v63, 4  ;;  %v1215_v45 = vld [vmem:[%s6679_s27] sm:$0xe]  ;;  %v1216_v59 = vld [vmem:[%s6679_s27 + $0xc] sm:$0xe] }
  0x99   : > { %v5435_v2 = vcombine.low %v2915_v57, %v2918_v4  ;;  %v2931_v23 = vrot.slane %v5355_v61, 5  ;;  %v2929_v31 = vsel %vm6931_vm7, %v5420_v6, %v2928_v63  ;;  %v7252_v27 = vrot.slane %v2305_v21, 5  ;;  %v1219_v41 = vld [vmem:[%s6679_s27 + $0x30] sm:$0xe] }
  0x9a   : > { %v2311_v36 = vrot.slane %v2309_v25, 4  ;;  %v5170_v44 = vcombine.low %v6904_v19, %v6910_v35  ;;  %v2315_v47 = vshll.u32 %v7142_v55, 16  ;;  %v5194_v19 = vrot.slane %v1215_v45, 9 }
  0x9b   : > { %v2932_v38 = vsel %vm6931_vm7, %v2930_v8, %v2931_v23  ;;  %8511 = vst [vmem:[#allocation3_spill] sm:$0xff] %v7252_v27  ;;  %v5195_v35 = vrot.slane %v1216_v59, 9  ;;  %v1282_v4 = vrot.slane %v7176_v9, 5  ;;  %v1289_v12 = vrot.slane %v7212_v1, 5  ;;  %v1220_v8 = vld [vmem:[%s6679_s27 + $0x3c] sm:$0xe] }
  0x9c   : > { %v5437_v40 = vcombine.low %v2929_v31, %v2932_v38  ;;  %v2312_v49 = vor.u32 %v2311_v36, %v7252_v27  ;;  %v7272_v51 = vrot.slane %v2315_v47, 5  ;;  %v5171_v58 = vcombine.low %v6925_v0, %v6938_v29  ;;  %v1221_v31 = vld [vmem:[%s6679_s27 + $0x48] sm:$0xe]  ;;  %v6550_v59 = vld [vmem:[%s6679_s27 + $0x38] sm:$0x1] }
  0x9d   : > { %6079 = vmatmul.mubr.msk.bf16.gmra.mrb[20].mxu0 %vm709_vm3, %v5433_v60  ;;  %v5169_v60 = vcombine.low %v6873_v24, %v6879_v37  ;;  %v6547_v24 = vld [vmem:[%s6679_s27 + $0x14] sm:$0x1]  ;;  %v4117_v54 = vsel %vm758_vm0, %v6996_v22, 0  ;;  %v5172_v61 = vcombine.low %v6957_v53, %v6964_v16  ;;  %v5173_v6 = vcombine.low %v6983_v39, %v6991_v43  ;;  %v6548_v16 = vld [vmem:[%s6679_s27 + $0x20] sm:$0x1] }
  0x9e   : > { %5927 = vmatmul.mubr.msk.bf16.gmra.mrb[4].mxu1 %vm709_vm3, %v5165_v28  ;;  %6082 = vmatprep.mubr.msk.bf16.mxu0 %vm709_vm3, %v5434_v20  ;;  %v1275_v28 = vrot.slane %v7169_v34, 5  ;;  %v6494_v20 = vld [vmem:[%s6679_s27 + $0x18] sm:$0xff]   ;;  %v6546_v34 = vld [vmem:[%s6679_s27 + $0x8] sm:$0x1]  ;;  %v1278_v37 = vrot.slane %v6547_v24, 5  ;;  %8512 = vst [vmem:[#allocation4_spill] sm:$0xff] %v7272_v51  ;;  %v5174_v9 = vcombine.low %v7015_v5, %v7027_v30 }
  0x9f   : > { %5930 = vmatprep.mubr.msk.bf16.mxu1 %vm709_vm3, %v5166_v48  ;;  %v1268_v48 = vrot.slane %v7135_v15, 5  ;;  %v1271_v50 = vrot.slane %v6546_v34, 5  ;;  %v1217_v15 = vld [vmem:[%s6679_s27 + $0x18] sm:$0xe]  ;;  %v7277_v63 = vrot.slane %v2312_v49, 4  ;;  %v1285_v22 = vrot.slane %v6548_v16, 5 }
  0xa0   : > { %v1277_v55 = vrot.slane %v1275_v28, 4  ;;  %v5196_v1 = vrot.slane %v1217_v15, 9  ;;  %v7299_v29 = vsel %vm6931_vm7, %v5195_v35, %v1275_v28  ;;  %v1291_v25 = vrot.slane %v1289_v12, 4  ;;  %v5519_v24 = vld [vmem:[%s6679_s27 + $0x18] sm:$0xf] }
  0xa1   : > { %v1270_v57 = vrot.slane %v1268_v48, 4  ;;  %8513 = vst [vmem:[#allocation5_spill] sm:$0xff] %v7277_v63  ;;  %v7295_v0 = vsel %vm6931_vm7, %v5194_v19, %v1268_v48  ;;  %v1299_v47 = vrot.slane %v6550_v59, 5  ;;  %v7336_v49 = vsel %vm758_vm0, %v7191_v7, 0  ;;  %v5520_v7 = vld [vmem:[%s6679_s27 + $0x1c] sm:$0xf] }
  0xa2   : > { %v7303_v53 = vsel %vm6931_vm7, %v1277_v55, %v1278_v37  ;;  %v7340_v34 = vsel %vm6931_vm7, %v5196_v1, %v1282_v4  ;;  %v6500_v37 = vld [vmem:[%s6679_s27 + $0x3c] sm:$0xff]   ;;  %v5199_v35 = vrot.slane %v1220_v8, 9  ;;  %v6551_v55 = vld [vmem:[%s6679_s27 + $0x44] sm:$0x1]  ;;  %v3638_v8 = vshll.u32 %v5519_v24, 16 }
  0xa3   : > { %v7314_v23 = vsel %vm6931_vm7, %v1270_v57, %v1271_v50  ;;  %v1222_v50 = vld [vmem:[%s6679_s27 + $0x54] sm:$0xe]  ;;  %v1306_v15 = vrot.slane %v6551_v55, 5  ;;  %v5523_v39 = vld [vmem:[%s6679_s27 + $0x28] sm:$0xf] }
  0xa4   : > { %v6558_v5 = vld [vmem:[%s6679_s27 + $0x70] sm:$0xf] }
  0xa5   : > { %6083 = vmatmul.mubr.msk.bf16.gmra.mrb[24].mxu0 %vm709_vm3, %v5435_v2  ;;  %v1218_v2 = vld [vmem:[%s6679_s27 + $0x24] sm:$0xe]  ;;  %v1331_v30 = vrot.slane %v6558_v5, 5 }
  0xa6   : > { %5931 = vmatmul.mubr.msk.bf16.gmra.mrb[8].mxu1 %vm709_vm3, %v5167_v10  ;;  %6086 = vmatprep.mubr.msk.bf16.mxu0 %vm709_vm3, %v5436_v11  ;;  %v1296_v10 = vrot.slane %v7217_v26, 5  ;;  %v6498_v11 = vld [vmem:[%s6679_s27 + $0x30] sm:$0xff]   ;;  %v5197_v21 = vrot.slane %v1218_v2, 9 }
  0xa7   : > { %5934 = vmatprep.mubr.msk.bf16.mxu1 %vm709_vm3, %v5168_v18  ;;  %v7310_v26 = vld [vmem:[%s8490_s1 + $0x10] sm:$0x3]  ;;  %v1284_v18 = vrot.slane %v1282_v4, 4  ;;  %v1333_v48 = vrot.slane %v1331_v30, 4 }
  0xa8   : > { %v1298_v45 = vrot.slane %v1296_v10, 4  ;;  %v7347_v19 = vsel %vm6931_vm7, %v5197_v21, %v1289_v12  ;;  %v3648_v21 = vshrl.u32 %v5520_v7, 16 }
  0xa9   : > { %v7356_v4 = vsel %vm6931_vm7, %v1284_v18, %v1285_v22  ;;  %v3635_v22 = vshrl.u32 %v5519_v24, 16  ;;  %v3644_v18 = vshll.u32 %v5520_v7, 16  ;;  %v5522_v24 = vld [vmem:[%s6679_s27 + $0x24] sm:$0xf] }
  0xaa   : > { %v7369_v1 = vsel %vm6931_vm7, %v1298_v45, %v1299_v47 }
  0xab   : > { %v3637_v43 = vrot.slane %v3635_v22, 4  ;;  %v7411_v7 = vrot.slane %v3644_v18, 5  ;;  %v3662_v22 = vshll.u32 %v5522_v24, 16  ;;  %v3672_v18 = vshrl.u32 %v5523_v39, 16 }
  0xad   : > { %6087 = vmatmul.mubr.msk.bf16.gmra.mrb[28].mxu0 %vm709_vm3, %v5437_v40  ;;  %v6549_v40 = vld [vmem:[%s6679_s27 + $0x2c] sm:$0x1]  ;;  %v3664_v27 = vrot.slane %v3662_v22, 5 }
  0xae   : > { %5935 = vmatmul.mubr.msk.bf16.gmra.mrb[12].mxu1 %vm709_vm3, %v5169_v60  ;;  %6092 = vmatprep.mubr.msk.bf16.mxu0 %vm709_vm3, %v6494_v20  ;;  %v1292_v28 = vrot.slane %v6549_v40, 5  ;;  %v1303_v60 = vrot.slane %v7237_v17, 5  ;;  %v6554_v40 = vld [vmem:[%s6679_s27 + $0x50] sm:$0x1]  ;;  %v6559_v17 = vld [vmem:[%s6679_s27 + $0x74] sm:$0x1] }
  0xaf   : > { %5938 = vmatprep.mubr.msk.bf16.mxu1 %vm709_vm3, %v5170_v44  ;;  %v5198_v44 = vrot.slane %v1219_v41, 9  ;;  %v5201_v41 = vrot.slane %v1222_v50, 9  ;;  %v1223_v50 = vld [vmem:[%s6679_s27 + $0x60] sm:$0xe]  ;;  %v5524_v20 = vld [vmem:[%s6679_s27 + $0x2c] sm:$0x1] }
  0xb0   : > { %v1305_v12 = vrot.slane %v1303_v60, 4  ;;  %v7382_v45 = vsel %vm6931_vm7, %v5199_v35, %v1303_v60  ;;  %v6555_v35 = vld [vmem:[%s6679_s27 + $0x5c] sm:$0x1] }
  0xb1   : > { %v7365_v2 = vsel %vm6931_vm7, %v5198_v44, %v1296_v10  ;;  %v1320_v55 = vrot.slane %v6555_v35, 5  ;;  %v1224_v35 = vld [vmem:[%s6679_s27 + $0x6c] sm:$0xe] }
  0xb2   : > { %v7386_v59 = vsel %vm6931_vm7, %v1305_v12, %v1306_v15  ;;  %v6556_v15 = vld [vmem:[%s6679_s27 + $0x64] sm:$0xf]  ;;  %v3650_v12 = vrot.slane %v3648_v21, 4  ;;  %v5203_v5 = vrot.slane %v1224_v35, 9 }
  0xb3   : > { %v6506_v21 = vld [vmem:[%s6679_s27 + $0x60] sm:$0xff]  }
  0xb5   : > { %6093 = vmatmul.mubr.msk.bf16.vlgmr.msra.gmra.mrb[0].mxu0 %vm709_vm3, %v6496_v62  ;;  %v6552_v62 = vld [vmem:[%s6679_s27 + $0x4c] sm:$0xf] }
  0xb6   : > { %5939 = vmatmul.mubr.msk.bf16.gmra.mrb[16].mxu1 %vm709_vm3, %v5171_v58  ;;  %6125 = vmatpush3.bf16.msra.mxu0 %v4117_v54  ;;  %v1310_v57 = vrot.slane %v6552_v62, 5  ;;  %v7360_v58 = vsel %vm6931_vm7, %v1291_v25, %v1292_v28  ;;  %v5200_v54 = vrot.slane %v1221_v31, 9  ;;  %v1313_v28 = vrot.slane %v6554_v40, 5 }
  0xb7   : > { %5942 = vmatprep.mubr.msk.bf16.mxu1 %vm709_vm3, %v5172_v61  ;;  %6096 = vmatprep.mubr.msk.bf16.mxu0 %vm709_vm3, %v6498_v11  ;;  %v6502_v61 = vld [vmem:[%s6679_s27 + $0x48] sm:$0xff]   ;;  %v6553_v11 = vld [vmem:[%s6679_s27 + $0x58] sm:$0xf]  ;;  %v1324_v62 = vrot.slane %v6556_v15, 5  ;;  %v5526_v15 = vld [vmem:[%s6679_s27 + $0x34] sm:$0xf] }
  0xb8   : > { %6459 = vmatprep.subr.msk.bf16.mxu0 %vm758_vm0, %v7310_v26  ;;  %v1317_v16 = vrot.slane %v6553_v11, 5  ;;  %v1312_v31 = vrot.slane %v1310_v57, 4  ;;  %v7390_v47 = vsel %vm6931_vm7, %v5200_v54, %v1310_v57  ;;  %v5521_v57 = vld [vmem:[%s6679_s27 + $0x20] sm:$0x1]  ;;  %v5525_v54 = vld [vmem:[%s6679_s27 + $0x30] sm:$0xf] }
  0xb9   : > { %v5202_v11 = vrot.slane %v1223_v50, 9  ;;  %v3686_v50 = vshll.u32 %v5525_v54, 16  ;;  %v3654_v25 = vshll.u32 %v5521_v57, 16  ;;  %v3692_v36 = vshll.u32 %v5526_v15, 16 }
  0xba   : > { %v7401_v60 = vsel %vm6931_vm7, %v5201_v41, %v1317_v16  ;;  %v7417_v41 = vsel %vm6931_vm7, %v1312_v31, %v1313_v28  ;;  %v1326_v31 = vrot.slane %v1324_v62, 4  ;;  %v3683_v28 = vshrl.u32 %v5525_v54, 16 }
  0xbb   : > { %v7459_v35 = vrot.slane %v3692_v36, 5 }
  0xbd   : > { %6097 = vmatmul.mubr.msk.bf16.gmra.mrb[4].mxu0 %vm709_vm3, %v6500_v37  ;;  %v1319_v37 = vrot.slane %v1317_v16, 4  ;;  %v6557_v16 = vld [vmem:[%s6679_s27 + $0x68] sm:$0x1] }
  0xbe   : > { %5943 = vmatmul.mubr.msk.bf16.gmra.mrb[20].mxu1 %vm709_vm3, %v5173_v6  ;;  %6100 = vmatprep.mubr.msk.bf16.mxu0 %vm709_vm3, %v6502_v61  ;;  %v3640_v6 = vrot.slane %v3638_v8, 5  ;;  %v6504_v61 = vld [vmem:[%s6679_s27 + $0x54] sm:$0xff]   ;;  %v1327_v40 = vrot.slane %v6557_v16, 5  ;;  %v3668_v8 = vshll.u32 %v5523_v39, 16  ;;  %v3651_v16 = vor.u32 %v3650_v12, %v7411_v7 }
  0xbf   : > { %5946 = vmatprep.mubr.msk.bf16.mxu1 %vm709_vm3, %v5174_v9  ;;  %v3659_v9 = vshrl.u32 %v5522_v24, 16  ;;  %v7426_v44 = vsel %vm6931_vm7, %v1319_v37, %v1320_v55  ;;  %v1334_v24 = vrot.slane %v6559_v17, 5  ;;  %v3696_v39 = vshrl.u32 %v5526_v15, 16 }
  0xc0   : > { %v3641_v10 = vor.u32 %v3640_v6, %v3637_v43  ;;  %v7432_v37 = vrot.slane %v3668_v8, 5  ;;  %v3674_v55 = vrot.slane %v3672_v18, 4  ;;  %v8514_v43 = vcombine.low %v7036_v52, %v7047_v46  ;;  %v6560_v8 = vld [vmem:[%s6679_s27 + $0x7c] sm:$0xf]  ;;  %v7468_v18 = vld [vmem:[%s6679_s27 + $0x38] sm:$0x1] }
  0xc1   : > { %v3661_v38 = vrot.slane %v3659_v9, 4  ;;  %v7441_v17 = vsel %vm6931_vm7, %v5202_v11, %v1324_v62  ;;  %v7445_v57 = vsel %vm6931_vm7, %v1326_v31, %v1327_v40  ;;  %v3685_v6 = vrot.slane %v3683_v28, 4  ;;  %8516 = vst [vmem:[#allocation6_spill] sm:$0xff] %v7468_v18 }
  0xc2   : > { %v3688_v12 = vrot.slane %v3686_v50, 5  ;;  %v8515_v52 = vcombine.low %v7068_v33, %v7073_v56  ;;  %v3642_v46 = vrot.slane %v3641_v10, 4  ;;  %v3652_v54 = vrot.slane %v3651_v16, 4  ;;  %v6508_v33 = vld [vmem:[%s6679_s27 + $0x6c] sm:$0xff]   ;;  %v1226_v16 = vld [vmem:[%s6679_s27 + $0x84] sm:$0xe] }
  0xc3   : > { %v3678_v62 = vshll.u32 %v5524_v20, 16  ;;  %v7453_v11 = vsel %vm6931_vm7, %v5203_v5, %v1331_v30  ;;  %v7457_v40 = vsel %vm6931_vm7, %v1333_v48, %v1334_v24  ;;  %v3698_v9 = vrot.slane %v3696_v39, 4  ;;  %v6509_v48 = vld [vmem:[%s6679_s27 + $0x78] sm:$0xff]  }
  0xc4   : > { %v3665_v10 = vor.u32 %v3664_v27, %v3661_v38  ;;  %v3675_v20 = vor.u32 %v3674_v55, %v7432_v37  ;;  %v1338_v30 = vrot.slane %v6560_v8, 5  ;;  %v3689_v38 = vor.u32 %v3688_v12, %v3685_v6  ;;  %v5528_v5 = vld [vmem:[%s6679_s27 + $0x3c] sm:$0xf] }
  0xc5   : > { %6101 = vmatmul.mubr.msk.bf16.gmra.mrb[8].mxu0 %vm709_vm3, %v6504_v61  ;;  %v3656_v61 = vrot.slane %v3654_v25, 5  ;;  %v1225_v25 = vld [vmem:[%s6679_s27 + $0x78] sm:$0xe]  ;;  %v7484_v50 = vrot.slane %v3678_v62, 5  ;;  %v3699_v39 = vor.u32 %v3698_v9, %v7459_v35  ;;  %v3702_v55 = vshll.u32 %v7468_v18, 16 }
  0xc6   : > { %5947 = vmatmul.mubr.msk.bf16.gmra.mrb[24].mxu1 %vm709_vm3, %v8514_v43  ;;  %6104 = vmatprep.mubr.msk.bf16.mxu0 %vm709_vm3, %v6506_v21  ;;  %v3647_v21 = vsel %vm6705_vm4, %v3642_v46, %v7411_v7  ;;  %v5204_v24 = vrot.slane %v1225_v25, 9  ;;  %v6561_v43 = vld [vmem:[%s6679_s27 + $0x88] sm:$0xf]  ;;  %v7492_v7 = vld [vmem:[%s6679_s27 + $0x40] sm:$0xf]  ;;  %v3666_v12 = vrot.slane %v3665_v10, 4  ;;  %v8518_v62 = vcombine.low %v7088_v14, %v7097_v42 }
  0xc7   : > { %5950 = vmatprep.mubr.msk.bf16.mxu1 %vm709_vm3, %v8515_v52  ;;  %v3657_v31 = vsel %vm6705_vm4, %v3652_v54, %v3656_v61  ;;  %v1345_v6 = vrot.slane %v6561_v43, 5  ;;  %8517 = vst [vmem:[#allocation7_spill] sm:$0xff] %v7492_v7  ;;  %v3676_v52 = vrot.slane %v3675_v20, 4  ;;  %v1340_v46 = vrot.slane %v1338_v30, 4  ;;  %v6562_v54 = vld [vmem:[%s6679_s27 + $0x80] sm:$0x1] }
  0xc8   : > { %v1341_v61 = vrot.slane %v6562_v54, 5  ;;  %v3690_v9 = vrot.slane %v3689_v38, 4  ;;  %v5205_v25 = vrot.slane %v1226_v16, 9  ;;  %v3707_v8 = vshrl.u32 %v5528_v5, 16  ;;  %v6510_v10 = vld [vmem:[%s6679_s27 + $0x84] sm:$0xff]  }
  0xc9   : > { %v3710_v43 = vshll.u32 %v5528_v5, 16  ;;  %v7506_v20 = vcombine.low %v3647_v21, %v3657_v31  ;;  %v7510_v14 = vsel %vm758_vm0, %v7310_v26, 0  ;;  %v3720_v38 = vshrl.u32 %v7492_v7, 16  ;;  %v6511_v21 = vld [vmem:[%s6679_s27 + $0x90] sm:$0xff]   ;;  %v6567_v18 = vld [vmem:[%s6679_s27 + $0xa0] sm:$0xf] }
  0xca   : > { %v3700_v16 = vrot.slane %v3699_v39, 4  ;;  %v3704_v5 = vrot.slane %v3702_v55, 5  ;;  %v1347_v54 = vrot.slane %v1345_v6, 4  ;;  %v3671_v31 = vsel %vm6705_vm4, %v3666_v12, %v7432_v37 }
  0xcb   : > { %v3681_v26 = vsel %vm6705_vm4, %v3676_v52, %v7484_v50  ;;  %v7525_v39 = vsel %vm6931_vm7, %v5204_v24, %v1338_v30  ;;  %v7529_v55 = vsel %vm6931_vm7, %v1340_v46, %v1341_v61  ;;  %v3695_v37 = vsel %vm6705_vm4, %v3690_v9, %v7459_v35  ;;  %v5534_v30 = vld [vmem:[%s6679_s27 + $0x54] sm:$0xf]  ;;  %v7546_v24 = vld [vmem:[%s6679_s27 + $0x58] sm:$0xf]  ;;  %v7551_v61 = vld [vmem:[%s6679_s27 + $0x90] sm:$0xe] }
  0xcc   : > { %v7542_v12 = vsel %vm6931_vm7, %v5205_v25, %v1345_v6  ;;  %v3709_v50 = vrot.slane %v3707_v8, 4  ;;  %v3712_v52 = vrot.slane %v3710_v43, 5  ;;  %v3722_v46 = vrot.slane %v3720_v38, 4 }
  0xcd   : > { %6105 = vmatmul.mubr.msk.bf16.gmra.mrb[12].mxu0 %vm709_vm3, %v6508_v33  ;;  %v8519_v33 = vcombine.low %v7295_v0, %v7314_v23  ;;  %v6563_v0 = vld [vmem:[%s6679_s27 + $0x8c] sm:$0x1]  ;;  %v3705_v36 = vsel %vm6705_vm4, %v3700_v16, %v3704_v5  ;;  %v3755_v25 = vshrl.u32 %v5534_v30, 16  ;;  %v3758_v8 = vshll.u32 %v5534_v30, 16 }
  0xce   : > { %5951 = vmatmul.mubr.msk.bf16.gmra.mrb[28].mxu1 %vm709_vm3, %v8518_v62  ;;  %6108 = vmatprep.mubr.msk.bf16.mxu0 %vm709_vm3, %v6509_v48  ;;  %v3716_v48 = vshll.u32 %v7492_v7, 16  ;;  %v1348_v23 = vrot.slane %v6563_v0, 5  ;;  %v5531_v62 = vld [vmem:[%s6679_s27 + $0x48] sm:$0xf]  ;;  %v7535_v0 = vld [vmem:[%s6679_s27 + $0x4c] sm:$0xf]  ;;  %v8521_v38 = vcombine.low %v7299_v29, %v7303_v53  ;;  %v7569_v16 = vcombine.low %v3671_v31, %v3681_v26 }
  0xcf   : > { %5956 = vmatprep.mubr.msk.bf16.mxu1 %vm709_vm3, %v8519_v33  ;;  %v7532_v33 = vld [vmem:[%s6679_s27 + $0x44] sm:$0x1]  ;;  %v3731_v27 = vshrl.u32 %v5531_v62, 16  ;;  %v3734_v15 = vshll.u32 %v5531_v62, 16  ;;  %v3740_v6 = vshll.u32 %v7535_v0, 16  ;;  %v3744_v9 = vshrl.u32 %v7535_v0, 16 }
  0xd0   : > { %8520 = vst [vmem:[#allocation8_spill] sm:$0xff] %v7532_v33  ;;  %v7548_v28 = vrot.slane %v3716_v48, 5  ;;  %v7557_v35 = vsel %vm6931_vm7, %v1347_v54, %v1348_v23  ;;  %v3764_v43 = vshll.u32 %v7546_v24, 16  ;;  %v3768_v48 = vshrl.u32 %v7546_v24, 16  ;;  %v5537_v31 = vld [vmem:[%s6679_s27 + $0x60] sm:$0xf] }
  0xd1   : > { %v3726_v5 = vshll.u32 %v7532_v33, 16  ;;  %v5206_v54 = vrot.slane %v7551_v61, 9  ;;  %v8522_v23 = vcombine.low %v7340_v34, %v7356_v4  ;;  %v7580_v29 = vcombine.low %v3695_v37, %v3705_v36  ;;  %v6512_v26 = vld [vmem:[%s6679_s27 + $0x9c] sm:$0xff]   ;;  %v6513_v30 = vld [vmem:[%s6679_s27 + $0xa8] sm:$0xff]  }
  0xd2   : > { %v3713_v53 = vor.u32 %v3712_v52, %v3709_v50  ;;  %v3733_v62 = vrot.slane %v3731_v27, 4  ;;  %v7591_v34 = vrot.slane %v3740_v6, 5  ;;  %v3746_v4 = vrot.slane %v3744_v9, 4  ;;  %v6564_v36 = vld [vmem:[%s8490_s1 + $0x8] sm:$0x3] }
  0xd3   : > { %v3757_v27 = vrot.slane %v3755_v25, 4  ;;  %v3760_v37 = vrot.slane %v3758_v8, 5  ;;  %v7600_v50 = vrot.slane %v3764_v43, 5  ;;  %v3770_v52 = vrot.slane %v3768_v48, 4  ;;  %v6565_v6 = vld [vmem:[%s6679_s27 + $0x94] sm:$0xf] }
  0xd4   : > { %v7606_v9 = vld [vmem:[%s6679_s27 + $0x64] sm:$0xf]  ;;  %v3779_v61 = vshrl.u32 %v5537_v31, 16  ;;  %v7608_v22 = vrot.slane %v3713_v53, 4  ;;  %v1359_v25 = vrot.slane %v6567_v18, 5  ;;  %v3747_v43 = vor.u32 %v3746_v4, %v7591_v34 }
  0xd5   : > { %6109 = vmatmul.mubr.msk.bf16.gmra.mrb[16].mxu0 %vm709_vm3, %v6510_v10  ;;  %8523 = vst [vmem:[#allocation9_spill] sm:$0xff] %v7606_v9  ;;  %v3782_v10 = vshll.u32 %v5537_v31, 16  ;;  %v3761_v31 = vor.u32 %v3760_v37, %v3757_v27  ;;  %v3771_v53 = vor.u32 %v3770_v52, %v7600_v50  ;;  %v8524_v18 = vcombine.low %v7347_v19, %v7360_v58  ;;  %v6514_v37 = vld [vmem:[%s6679_s27 + $0xb4] sm:$0xff]  }
  0xd6   : > { %5957 = vmatmul.mubr.msk.bf16.vlgmr.msra.gmra.mrb[0].mxu1 %vm709_vm3, %v8521_v38  ;;  %6112 = vmatprep.mubr.msk.bf16.mxu0 %vm709_vm3, %v6511_v21  ;;  %v3736_v21 = vrot.slane %v3734_v15, 5  ;;  %v7589_v38 = vld [vmem:[%s6679_s27 + $0x50] sm:$0x1]  ;;  %v7598_v15 = vld [vmem:[%s6679_s27 + $0x5c] sm:$0x1]  ;;  %v8525_v27 = vcombine.low %v7365_v2, %v7369_v1  ;;  %v1361_v52 = vrot.slane %v1359_v25, 4 }
  0xd7   : > { %5989 = vmatpush3.bf16.msra.mxu1 %v7336_v49  ;;  %5960 = vmatprep.mubr.msk.bf16.mxu1 %vm709_vm3, %v8522_v23  ;;  %v3723_v49 = vor.u32 %v3722_v46, %v7548_v28  ;;  %v7602_v46 = vrot.slane %v3726_v5, 5  ;;  %v1352_v23 = vrot.slane %v6565_v6, 5  ;;  %v3750_v48 = vshll.u32 %v7589_v38, 16  ;;  %v1228_v5 = vld [vmem:[%s6679_s27 + $0x9c] sm:$0xe] }
  0xd8   : > { %6455 = vmatprep.subr.msk.bf16.mxu1 %vm758_vm0, %v6564_v36  ;;  %v6566_v36 = vld [vmem:[%s6679_s27 + $0x98] sm:$0x1]  ;;  %v3737_v7 = vor.u32 %v3736_v21, %v3733_v62  ;;  %v3774_v6 = vshll.u32 %v7598_v15, 16  ;;  %v3792_v62 = vshrl.u32 %v7606_v9, 16  ;;  %v3784_v4 = vrot.slane %v3782_v10, 5 }
  0xd9   : > { %v1355_v33 = vrot.slane %v6566_v36, 5  ;;  %v3724_v8 = vrot.slane %v3723_v49, 4  ;;  %v3788_v36 = vshll.u32 %v7606_v9, 16  ;;  %v7627_v21 = vsel %vm6931_vm7, %v5206_v54, %v1352_v23  ;;  %v7638_v2 = vld [vmem:[%s6679_s27 + $0x68] sm:$0x1] }
  0xda   : > { %v3781_v49 = vrot.slane %v3779_v61, 4  ;;  %v3738_v19 = vrot.slane %v3737_v7, 4  ;;  %v5207_v58 = vrot.slane %v1228_v5, 9  ;;  %v3748_v3 = vrot.slane %v3747_v43, 4  ;;  %8526 = vst [vmem:[#allocation10_spill] sm:$0xff] %v7638_v2  ;;  %v6515_v5 = vld [vmem:[%s6679_s27 + $0xc0] sm:$0xff]  }
  0xdb   : > { %v3752_v54 = vrot.slane %v3750_v48, 5  ;;  %v3776_v63 = vrot.slane %v3774_v6, 5  ;;  %v1366_v61 = vrot.slane %v7073_v56, 5  ;;  %v3762_v10 = vrot.slane %v3761_v31, 4  ;;  %v1230_v31 = vld [vmem:[%s6679_s27 + $0xb4] sm:$0xe] }
  0xdc   : > { %v3772_v51 = vrot.slane %v3771_v53, 4  ;;  %v7640_v1 = vrot.slane %v3788_v36, 5  ;;  %v3794_v7 = vrot.slane %v3792_v62, 4  ;;  %v3719_v43 = vsel %vm6705_vm4, %v7608_v22, %v7548_v28  ;;  %v6569_v62 = vld [vmem:[%s6679_s27 + $0xb0] sm:$0x1] }
  0xdd   : > { %6113 = vmatmul.mubr.msk.bf16.gmra.mrb[20].mxu0 %vm709_vm3, %v6512_v26  ;;  %v1354_v26 = vrot.slane %v1352_v23, 4  ;;  %v1229_v23 = vld [vmem:[%s6679_s27 + $0xa8] sm:$0xe]  ;;  %v3729_v48 = vsel %vm6705_vm4, %v3724_v8, %v7602_v46  ;;  %v3785_v6 = vor.u32 %v3784_v4, %v3781_v49  ;;  %v3743_v53 = vsel %vm6705_vm4, %v3738_v19, %v7591_v34  ;;  %v5540_v46 = vld [vmem:[%s6679_s27 + $0x6c] sm:$0xf] }
  0xde   : > { %5961 = vmatmul.mubr.msk.bf16.gmra.mrb[4].mxu1 %vm709_vm3, %v8524_v18  ;;  %6116 = vmatprep.mubr.msk.bf16.mxu0 %vm709_vm3, %v6513_v30  ;;  %v6568_v18 = vld [vmem:[%s6679_s27 + $0xa4] sm:$0x1]  ;;  %v7660_v36 = vsel %vm6931_vm7, %v5207_v58, %v1359_v25  ;;  %v5208_v28 = vrot.slane %v1229_v23, 9  ;;  %v1368_v8 = vrot.slane %v1366_v61, 4  ;;  %v3798_v49 = vshll.u32 %v7638_v2, 16 }
  0xdf   : > { %5964 = vmatprep.mubr.msk.bf16.mxu1 %vm709_vm3, %v8525_v27  ;;  %v1362_v30 = vrot.slane %v6568_v18, 5  ;;  %v7652_v56 = vsel %vm6931_vm7, %v1354_v26, %v1355_v33  ;;  %v3753_v33 = vsel %vm6705_vm4, %v3748_v3, %v3752_v54  ;;  %v1369_v26 = vrot.slane %v6569_v62, 5  ;;  %v5543_v18 = vld [vmem:[%s6679_s27 + $0x78] sm:$0xf]  ;;  %v7715_v54 = vld [vmem:[%s6679_s27 + $0xbc] sm:$0x1] }
  0xe0   : > { %v3767_v34 = vsel %vm6705_vm4, %v3762_v10, %v7600_v50  ;;  %v3777_v25 = vsel %vm6705_vm4, %v3772_v51, %v3776_v63  ;;  %v3795_v4 = vor.u32 %v3794_v7, %v7640_v1  ;;  %v5209_v27 = vrot.slane %v1230_v31, 9  ;;  %v7689_v51 = vld [vmem:[%s6679_s27 + $0x70] sm:$0xf]  ;;  %v7719_v10 = vld [vmem:[%s6679_s27 + $0x7c] sm:$0xf] }
  0xe1   : > { %v7664_v22 = vsel %vm6931_vm7, %v1361_v52, %v1362_v30  ;;  %v8528_v3 = vcombine.low %v7382_v45, %v7386_v59  ;;  %v7685_v19 = vrot.slane %v3785_v6, 4  ;;  %v1373_v50 = vrot.slane %v7097_v42, 5  ;;  %8529 = vst [vmem:[#allocation12_spill] sm:$0xff] %v7689_v51  ;;  %8531 = vst [vmem:[#allocation13_spill] sm:$0xff] %v7719_v10  ;;  %v5546_v7 = vld [vmem:[%s6679_s27 + $0x84] sm:$0xf] }
  0xe2   : > { %8527 = vst [vmem:[#allocation11_spill] sm:$0xff] %v7664_v22  ;;  %v3803_v63 = vshrl.u32 %v5540_v46, 16  ;;  %v8530_v45 = vcombine.low %v7390_v47, %v7417_v41  ;;  %v7697_v58 = vcombine.low %v3743_v53, %v3753_v33  ;;  %v7703_v42 = vsel %vm6931_vm7, %v5208_v28, %v1366_v61  ;;  %v6516_v61 = vld [vmem:[%s6679_s27 + $0xcc] sm:$0xff]   ;;  %v7731_v31 = vld [vmem:[%s6679_s27 + $0x88] sm:$0xf] }
  0xe3   : > { %v7706_v30 = vcombine.low %v3767_v34, %v3777_v25  ;;  %v7710_v47 = vsel %vm6931_vm7, %v1368_v8, %v1369_v26  ;;  %v7712_v41 = vrot.slane %v3798_v49, 5  ;;  %v3812_v6 = vshll.u32 %v7689_v51, 16  ;;  %8532 = vst [vmem:[#allocation14_spill] sm:$0xff] %v7731_v31  ;;  %v5549_v62 = vld [vmem:[%s6679_s27 + $0x90] sm:$0xf] }
  0xe4   : > { %v7737_v28 = vrot.slane %v1373_v50, 4  ;;  %v7739_v33 = vrot.slane %v3803_v63, 4  ;;  %v3816_v8 = vshrl.u32 %v7689_v51, 16  ;;  %v3827_v26 = vshrl.u32 %v5543_v18, 16  ;;  %v7746_v25 = vld [vmem:[%s6679_s27 + $0x94] sm:$0xf] }
  0xe5   : > { %6117 = vmatmul.mubr.msk.bf16.gmra.mrb[24].mxu0 %vm709_vm3, %v6514_v37  ;;  %v7683_v37 = vcombine.low %v3719_v43, %v3729_v48  ;;  %v7727_v43 = vsel %vm6931_vm7, %v5209_v27, %v1373_v50  ;;  %v3806_v48 = vshll.u32 %v5540_v46, 16  ;;  %v3830_v49 = vshll.u32 %v5543_v18, 16  ;;  %8533 = vst [vmem:[#allocation15_spill] sm:$0xff] %v7746_v25  ;;  %v7784_v2 = vld [vmem:[%s6679_s27 + $0x8c] sm:$0x1] }
  0xe6   : > { %5965 = vmatmul.mubr.msk.bf16.gmra.mrb[8].mxu1 %vm709_vm3, %v8528_v3  ;;  %6120 = vmatprep.mubr.msk.bf16.mxu0 %vm709_vm3, %v6515_v5  ;;  %v7723_v5 = vrot.slane %v3795_v4, 4  ;;  %v3836_v46 = vshll.u32 %v7719_v10, 16  ;;  %v3840_v34 = vshrl.u32 %v7719_v10, 16  ;;  %v3851_v4 = vshrl.u32 %v5546_v7, 16 }
  0xe7   : > { %5968 = vmatprep.mubr.msk.bf16.mxu1 %vm709_vm3, %v8530_v45  ;;  %v3854_v27 = vshll.u32 %v5546_v7, 16  ;;  %v3860_v3 = vshll.u32 %v7731_v31, 16  ;;  %v3864_v50 = vshrl.u32 %v7731_v31, 16  ;;  %v7756_v45 = vld [vmem:[%s6679_s27 + $0x74] sm:$0x1]  ;;  %v3808_v18 = vrot.slane %v3806_v48, 5 }
  0xe8   : > { %v3875_v52 = vshrl.u32 %v5549_v62, 16  ;;  %v3878_v53 = vshll.u32 %v5549_v62, 16  ;;  %v8534_v7 = vcombine.low %v7401_v60, %v7426_v44  ;;  %v3818_v59 = vrot.slane %v3816_v8, 4  ;;  %v5552_v48 = vld [vmem:[%s6679_s27 + $0x9c] sm:$0xf] }
  0xe9   : > { %v3884_v63 = vshll.u32 %v7746_v25, 16  ;;  %v3888_v23 = vshrl.u32 %v7746_v25, 16  ;;  %v8535_v62 = vcombine.low %v7441_v17, %v7445_v57  ;;  %v7774_v44 = vld [vmem:[%s6679_s27 + $0x80] sm:$0x1]  ;;  %v3829_v60 = vrot.slane %v3827_v26, 4 }
  0xea   : > { %8536 = vst [vmem:[#allocation16_spill] sm:$0xff] %v7774_v44  ;;  %v3853_v31 = vrot.slane %v3851_v4, 4  ;;  %v3856_v8 = vrot.slane %v3854_v27, 5  ;;  %v7778_v10 = vrot.slane %v3860_v3, 5  ;;  %v3866_v51 = vrot.slane %v3864_v50, 4 }
  0xeb   : > { %v7781_v25 = vld [vmem:[%s6679_s27 + $0xa0] sm:$0xf]  ;;  %v3877_v17 = vrot.slane %v3875_v52, 4  ;;  %v3880_v57 = vrot.slane %v3878_v53, 5  ;;  %v3902_v9 = vshll.u32 %v5552_v48, 16  ;;  %v3809_v26 = vor.u32 %v3808_v18, %v7739_v33 }
  0xec   : > { %v3846_v27 = vshll.u32 %v7774_v44, 16  ;;  %v7793_v3 = vld [vmem:[%s6679_s27 + $0x98] sm:$0x1]  ;;  %v3908_v50 = vshll.u32 %v7781_v25, 16  ;;  %v3912_v52 = vshrl.u32 %v7781_v25, 16  ;;  %v3857_v22 = vor.u32 %v3856_v8, %v3853_v31 }
  0xed   : > { %6121 = vmatmul.mubr.msk.bf16.gmra.mrb[28].mxu0 %vm709_vm3, %v6516_v61  ;;  %v7764_v61 = vrot.slane %v3812_v6, 5  ;;  %v3842_v6 = vrot.slane %v3840_v34, 4  ;;  %v3890_v34 = vrot.slane %v3888_v23, 4  ;;  %v3870_v33 = vshll.u32 %v7784_v2, 16 }
  0xee   : > { %5969 = vmatmul.mubr.msk.bf16.gmra.mrb[12].mxu1 %vm709_vm3, %v8534_v7  ;;  %6126 = vmatprep.mubr.msk.bf16.mxu0 %vm709_vm3, %v7506_v20  ;;  %v3832_v7 = vrot.slane %v3830_v49, 5  ;;  %v7776_v20 = vrot.slane %v3836_v46, 5  ;;  %v3822_v49 = vshll.u32 %v7756_v45, 16  ;;  %v7788_v46 = vrot.slane %v3884_v63, 5 }
  0xef   : > { %5972 = vmatprep.mubr.msk.bf16.mxu1 %vm709_vm3, %v8535_v62  ;;  %v3899_v62 = vshrl.u32 %v5552_v48, 16  ;;  %v3819_v4 = vor.u32 %v3818_v59, %v7764_v61  ;;  %v3867_v23 = vor.u32 %v3866_v51, %v7778_v10  ;;  %v3881_v59 = vor.u32 %v3880_v57, %v3877_v17  ;;  %v7826_v57 = vld [vmem:[%s6679_s27 + $0xa4] sm:$0x1] }
  0xf0   : > { %v3833_v53 = vor.u32 %v3832_v7, %v3829_v60  ;;  %v3843_v48 = vor.u32 %v3842_v6, %v7776_v20  ;;  %v3904_v18 = vrot.slane %v3902_v9, 5  ;;  %v8537_v44 = vcombine.low %v7453_v11, %v7457_v40 }
  0xf1   : > { %v3901_v63 = vrot.slane %v3899_v62, 4  ;;  %v8538_v31 = vrot.slane %v7715_v54, 5  ;;  %v3824_v51 = vrot.slane %v3822_v49, 5  ;;  %v3891_v60 = vor.u32 %v3890_v34, %v7788_v46  ;;  %v7829_v34 = vld [vmem:[%s6679_s27 + $0xac] sm:$0xf] }
  0xf2   : > { %v3894_v9 = vshll.u32 %v7793_v3, 16  ;;  %v8539_v11 = vcombine.low %v7525_v39, %v7529_v55  ;;  %v3810_v40 = vrot.slane %v3809_v26, 4  ;;  %v7822_v54 = vrot.slane %v3908_v50, 5 }
  0xf3   : > { %v3834_v7 = vrot.slane %v3833_v53, 4  ;;  %v3844_v6 = vrot.slane %v3843_v48, 4  ;;  %v3848_v8 = vrot.slane %v3846_v27, 5  ;;  %v3872_v17 = vrot.slane %v3870_v33, 5  ;;  %v7839_v48 = vld [vmem:[%s6679_s27 + $0xb0] sm:$0x1] }
  0xf4   : > { %v3858_v39 = vrot.slane %v3857_v22, 4  ;;  %v3868_v55 = vrot.slane %v3867_v23, 4  ;;  %v3882_v62 = vrot.slane %v3881_v59, 4  ;;  %v3905_v49 = vor.u32 %v3904_v18, %v3901_v63 }
  0xf5   : > { %6127 = vmatmul.mubr.msk.bf16.vlgmr.msra.gmra.mrb[0].mxu0 %vm709_vm3, %v7569_v16  ;;  %v7812_v16 = vsel %vm6931_vm7, %v7737_v28, %v8538_v31  ;;  %v3914_v28 = vrot.slane %v3912_v52, 4  ;;  %v3896_v26 = vrot.slane %v3894_v9, 5  ;;  %v3815_v52 = vsel %vm6705_vm4, %v3810_v40, %v7764_v61 }
  0xf6   : > { %5973 = vmatmul.mubr.msk.bf16.gmra.mrb[16].mxu1 %vm709_vm3, %v8537_v44  ;;  %6159 = vmatpush3.bf16.msra.mxu0 %v7510_v14  ;;  %v3820_v14 = vrot.slane %v3819_v4, 4  ;;  %v5555_v44 = vld [vmem:[%s6679_s27 + $0xa8] sm:$0xf]  ;;  %v3918_v22 = vshll.u32 %v7826_v57, 16  ;;  %v3839_v33 = vsel %vm6705_vm4, %v3834_v7, %v7776_v20  ;;  %v3849_v23 = vsel %vm6705_vm4, %v3844_v6, %v3848_v8 }
  0xf7   : > { %5976 = vmatprep.mubr.msk.bf16.mxu1 %vm709_vm3, %v8539_v11  ;;  %6130 = vmatprep.mubr.msk.bf16.mxu0 %vm709_vm3, %v7580_v29  ;;  %v3892_v29 = vrot.slane %v3891_v60, 4  ;;  %v3923_v4 = vshrl.u32 %v5555_v44, 16  ;;  %v3926_v50 = vshll.u32 %v5555_v44, 16  ;;  %v3915_v53 = vor.u32 %v3914_v28, %v7822_v54  ;;  %v5604_v11 = vld [vmem:[%s6679_s27 + $0x48] sm:$0xe] }
  0xf8   : > { %v3825_v27 = vsel %vm6705_vm4, %v3820_v14, %v3824_v51  ;;  %v3932_v59 = vshll.u32 %v7829_v34, 16  ;;  %v3936_v61 = vshrl.u32 %v7829_v34, 16  ;;  %v3863_v63 = vsel %vm6705_vm4, %v3858_v39, %v7778_v10  ;;  %v7904_v39 = vld [vmem:[%s6679_s27 + $0xb8] sm:$0xf] }
  0xf9   : > { %v3873_v18 = vsel %vm6705_vm4, %v3868_v55, %v3872_v17  ;;  %v3887_v20 = vsel %vm6705_vm4, %v3882_v62, %v7788_v46  ;;  %v3906_v31 = vrot.slane %v3905_v49, 4  ;;  %v8540_v51 = vcombine.low %v7542_v12, %v7557_v35 }
  0xfa   : > { %v3925_v10 = vrot.slane %v3923_v4, 4  ;;  %v3928_v60 = vrot.slane %v3926_v50, 5  ;;  %v3942_v9 = vshll.u32 %v7839_v48, 16  ;;  %v8541_v46 = vcombine.low %v7627_v21, %v7652_v56  ;;  %v5558_v21 = vld [vmem:[%s6679_s27 + $0xb4] sm:$0xf] }
  0xfb   : > { %v5225_v12 = vcombine.low %v7703_v42, %v7710_v47  ;;  %v8542_v35 = vsel %vm6705_vm4, %v7723_v5, %v7712_v41  ;;  %v3916_v14 = vrot.slane %v3915_v53, 4  ;;  %v3920_v28 = vrot.slane %v3918_v22, 5  ;;  %v5606_v4 = vld [vmem:[%s6679_s27 + $0x60] sm:$0xe]  ;;  %v5607_v53 = vld [vmem:[%s6679_s27 + $0x6c] sm:$0xe] }
  0xfc   : > { %v5226_v56 = vcombine.low %v7727_v43, %v7812_v16  ;;  %v7887_v44 = vcombine.low %v3815_v52, %v3825_v27  ;;  %v7889_v42 = vrot.slane %v3932_v59, 5  ;;  %v3938_v47 = vrot.slane %v3936_v61, 4  ;;  %v8551_v16 = vld [vmem:[#allocation4_spill] sm:$0xff] }
  0xfd   : > { %6131 = vmatmul.mubr.msk.bf16.gmra.mrb[4].mxu0 %vm709_vm3, %v7683_v37  ;;  %v3897_v37 = vsel %vm6705_vm4, %v3892_v29, %v3896_v26  ;;  %v7891_v41 = vcombine.low %v3839_v33, %v3849_v23  ;;  %v7893_v5 = vcombine.low %v3863_v63, %v3873_v18  ;;  %v3911_v6 = vsel %vm6705_vm4, %v3906_v31, %v7822_v54  ;;  %v8544_v23 = vld [vmem:[#allocation11_spill] sm:$0xff]  ;;  %v5561_v63 = vld [vmem:[%s6679_s27 + $0xc0] sm:$0xf]  ;;  %v8546_v18 = vld [vmem:[#allocation9_spill] sm:$0xff] }
  0xfe   : > { %5977 = vmatmul.mubr.msk.bf16.gmra.mrb[20].mxu1 %vm709_vm3, %v8540_v51  ;;  %6134 = vmatprep.mubr.msk.bf16.mxu0 %vm709_vm3, %v7697_v58  ;;  %v8543_v58 = vsel %vm6705_vm4, %v7685_v19, %v7640_v1  ;;  %v7895_v7 = vcombine.low %v3887_v20, %v3897_v37  ;;  %v5620_v1 = vrot.slane %v5604_v11, 9  ;;  %v5605_v19 = vld [vmem:[%s6679_s27 + $0x54] sm:$0xe]  ;;  %v3929_v8 = vor.u32 %v3928_v60, %v3925_v10  ;;  %v8547_v31 = vld [vmem:[#allocation10_spill] sm:$0xff] }
  0xff   : > { %5980 = vmatprep.mubr.msk.bf16.mxu1 %vm709_vm3, %v8541_v46  ;;  %v5574_v40 = vcombine.low %v8543_v58, %v8542_v35  ;;  %v7901_v17 = vrot.slane %v3942_v9, 5  ;;  %v3947_v55 = vshrl.u32 %v5558_v21, 16  ;;  %v3921_v62 = vsel %vm6705_vm4, %v3916_v14, %v3920_v28  ;;  %v8548_v9 = vld [vmem:[#allocation12_spill] sm:$0xff]  ;;  %v7953_v35 = vld [vmem:[%s6679_s27 + $0xbc] sm:$0x1] }
 0x100   : > { %v3950_v49 = vshll.u32 %v5558_v21, 16  ;;  %v4406_v29 = vrot.slane %v7535_v0, 5  ;;  %v4409_v26 = vrot.slane %v7589_v38, 5  ;;  %v3939_v50 = vor.u32 %v3938_v47, %v7889_v42  ;;  %v7956_v58 = vld [vmem:[%s6679_s27 + $0xc4] sm:$0xf] }
 0x101   : > { %v5621_v52 = vrot.slane %v5605_v19, 9  ;;  %v4413_v54 = vrot.slane %v7546_v24, 5  ;;  %v4416_v27 = vrot.slane %v7598_v15, 5  ;;  %v3956_v22 = vshll.u32 %v7904_v39, 16  ;;  %v5608_v19 = vld [vmem:[%s6679_s27 + $0x78] sm:$0xe] }
 0x102   : > { %v3960_v33 = vshrl.u32 %v7904_v39, 16  ;;  %v7921_v0 = vsel %vm6931_vm7, %v5620_v1, %v4406_v29  ;;  %v4408_v38 = vrot.slane %v4406_v29, 4  ;;  %v8545_v59 = vcombine.low %v7660_v36, %v8544_v23  ;;  %v8549_v23 = vld [vmem:[#allocation13_spill] sm:$0xff] }
 0x103   : > { %v7928_v24 = vcombine.low %v3911_v6, %v3921_v62  ;;  %v7932_v15 = vsel %vm6931_vm7, %v5621_v52, %v4413_v54  ;;  %v5622_v61 = vrot.slane %v5606_v4, 9  ;;  %v4420_v20 = vrot.slane %v8546_v18, 5  ;;  %v6517_v6 = vld [vmem:[%s6679_s27 + $0xc] sm:$0xff]  }
 0x104   : > { %v7938_v36 = vsel %vm6931_vm7, %v4408_v38, %v4409_v26  ;;  %v4423_v51 = vrot.slane %v8547_v31, 5  ;;  %v5623_v37 = vrot.slane %v5607_v53, 9  ;;  %v4427_v11 = vrot.slane %v8548_v9, 5 }
 0x105   : > { %6135 = vmatmul.mubr.msk.bf16.gmra.mrb[8].mxu0 %vm709_vm3, %v7706_v30  ;;  %v4415_v30 = vrot.slane %v4413_v54, 4  ;;  %v5637_v10 = vcombine.low %v7921_v0, %v7938_v36  ;;  %v4430_v46 = vrot.slane %v7756_v45, 5  ;;  %v7962_v14 = vsel %vm6931_vm7, %v5622_v61, %v4420_v20 }
 0x106   : > { %5981 = vmatmul.mubr.msk.bf16.gmra.mrb[24].mxu1 %vm709_vm3, %v8545_v59  ;;  %6138 = vmatprep.mubr.msk.bf16.mxu0 %vm709_vm3, %v5574_v40  ;;  %v4422_v28 = vrot.slane %v4420_v20, 4  ;;  %v7964_v21 = vrot.slane %v3947_v55, 4  ;;  %v3971_v47 = vshrl.u32 %v5561_v63, 16  ;;  %v7968_v45 = vsel %vm6931_vm7, %v5623_v37, %v4427_v11  ;;  %v5335_v55 = vld [vmem:[%s6679_s27 + $0x78] sm:$0xf]  ;;  %v8550_v59 = vld [vmem:[#allocation16_spill] sm:$0xff] }
 0x107   : > { %5984 = vmatprep.mubr.msk.bf16.mxu1 %vm709_vm3, %v5225_v12  ;;  %v7946_v60 = vsel %vm6931_vm7, %v4415_v30, %v4416_v27  ;;  %v7950_v12 = vrot.slane %v3929_v8, 4  ;;  %v4429_v1 = vrot.slane %v4427_v11, 4  ;;  %v7972_v8 = vrot.slane %v3939_v50, 4 }
 0x108   : > { %v5638_v40 = vcombine.low %v7932_v15, %v7946_v60  ;;  %v7974_v62 = vrot.slane %v3950_v49, 5  ;;  %v3974_v29 = vshll.u32 %v5561_v63, 16  ;;  %v7978_v26 = vsel %vm6931_vm7, %v4422_v28, %v4423_v51  ;;  %v8553_v28 = vld [vmem:[#allocation14_spill] sm:$0xff] }
 0x109   : > { %v7981_v4 = vrot.slane %v3956_v22, 5  ;;  %v7983_v52 = vrot.slane %v3960_v33, 4  ;;  %v5639_v54 = vcombine.low %v7962_v14, %v7978_v26  ;;  %v7989_v27 = vsel %vm6931_vm7, %v4429_v1, %v4430_v46  ;;  %v5609_v33 = vld [vmem:[%s6679_s27 + $0x84] sm:$0xe]  ;;  %v6518_v1 = vld [vmem:[%s6679_s27 + $0x18] sm:$0xff]  }
 0x10a   : > { %v3966_v49 = vshll.u32 %v7953_v35, 16  ;;  %v3980_v50 = vshll.u32 %v7956_v58, 16  ;;  %v5640_v53 = vcombine.low %v7968_v45, %v7989_v27  ;;  %v5624_v22 = vrot.slane %v5608_v19, 9  ;;  %v6580_v60 = vld [vmem:[%s6679_s27 + $0xa0] sm:$0xf] }
 0x10b   : > { %v3973_v38 = vrot.slane %v3971_v47, 4  ;;  %v4437_v30 = vrot.slane %v8550_v59, 5  ;;  %v2296_v61 = vshrl.u32 %v5335_v55, 16  ;;  %v3976_v63 = vrot.slane %v3974_v29, 5  ;;  %v5564_v29 = vld [vmem:[%s6679_s27 + $0xcc] sm:$0xf] }
 0x10c   : > { %v3984_v18 = vshrl.u32 %v7956_v58, 16  ;;  %v2299_v43 = vshll.u32 %v5335_v55, 16  ;;  %v5625_v37 = vrot.slane %v5609_v33, 9  ;;  %v3935_v9 = vsel %vm6705_vm4, %v7950_v12, %v7889_v42  ;;  %v8032_v55 = vld [vmem:[%s6679_s27 + $0xd0] sm:$0xf] }
 0x10d   : > { %6139 = vmatmul.mubr.msk.bf16.gmra.mrb[12].mxu0 %vm709_vm3, %v7887_v44  ;;  %v4434_v44 = vrot.slane %v8549_v23, 5  ;;  %v2298_v51 = vrot.slane %v2296_v61, 4  ;;  %v3953_v11 = vor.u32 %v7974_v62, %v7964_v21  ;;  %v4441_v47 = vrot.slane %v8553_v28, 5  ;;  %v6519_v21 = vld [vmem:[%s6679_s27 + $0x24] sm:$0xff]   ;;  %v6584_v27 = vld [vmem:[%s6679_s27 + $0xac] sm:$0xf] }
 0x10e   : > { %5985 = vmatmul.mubr.msk.bf16.gmra.mrb[28].mxu1 %vm709_vm3, %v5226_v56  ;;  %6142 = vmatprep.mubr.msk.bf16.mxu0 %vm709_vm3, %v7891_v41  ;;  %v8552_v56 = vld [vmem:[#allocation5_spill] sm:$0xff]  ;;  %v2301_v46 = vrot.slane %v2299_v43, 5  ;;  %v3945_v19 = vsel %vm6705_vm4, %v7972_v8, %v7901_v17  ;;  %v4444_v12 = vrot.slane %v7784_v2, 5  ;;  %v8040_v62 = vrot.slane %v3980_v50, 5  ;;  %v5610_v8 = vld [vmem:[%s6679_s27 + $0x90] sm:$0xe] }
 0x10f   : > { %5990 = vmatprep.mubr.msk.bf16.mxu1 %vm709_vm3, %v6517_v6  ;;  %v2318_v41 = vsel %vm6705_vm4, %v8552_v56, %v8551_v16  ;;  %v8014_v20 = vsel %vm6931_vm7, %v5624_v22, %v4434_v44  ;;  %v4436_v31 = vrot.slane %v4434_v44, 4  ;;  %v3963_v6 = vor.u32 %v7983_v52, %v7981_v4  ;;  %v8046_v52 = vld [vmem:[%s6679_s27 + $0xc8] sm:$0x1]  ;;  %v8555_v16 = vld [vmem:[#allocation2_spill] sm:$0xff] }
 0x110   : > { %v3986_v22 = vrot.slane %v3984_v18, 4  ;;  %v2302_v17 = vor.u32 %v2301_v46, %v2298_v51  ;;  %v3968_v23 = vrot.slane %v3966_v49, 5  ;;  %v3977_v44 = vor.u32 %v3976_v63, %v3973_v38  ;;  %v8556_v51 = vld [vmem:[#allocation3_spill] sm:$0xff] }
 0x111   : > { %v8036_v42 = vsel %vm6931_vm7, %v4436_v31, %v4437_v30  ;;  %v8050_v59 = vsel %vm6931_vm7, %v5625_v37, %v4441_v47  ;;  %v4443_v30 = vrot.slane %v4441_v47, 4  ;;  %v3995_v2 = vshrl.u32 %v5564_v29, 16 }
 0x112   : > { %v5641_v33 = vcombine.low %v8014_v20, %v8036_v42  ;;  %v3998_v50 = vshll.u32 %v5564_v29, 16  ;;  %v4004_v61 = vshll.u32 %v8032_v55, 16  ;;  %v2303_v18 = vrot.slane %v2302_v17, 4  ;;  %v6520_v29 = vld [vmem:[%s6679_s27 + $0x30] sm:$0xff]  }
 0x113   : > { %v4008_v49 = vshrl.u32 %v8032_v55, 16  ;;  %v8061_v38 = vsel %vm6931_vm7, %v4443_v30, %v4444_v12  ;;  %v5626_v63 = vrot.slane %v5610_v8, 9  ;;  %v3987_v56 = vor.u32 %v3986_v22, %v8040_v62 }
 0x114   : > { %v3990_v31 = vshll.u32 %v8046_v52, 16  ;;  %v5642_v37 = vcombine.low %v8050_v59, %v8061_v38  ;;  %v5580_v46 = vcombine.low %v3935_v9, %v3945_v19  ;;  %v3954_v28 = vrot.slane %v3953_v11, 4  ;;  %v5611_v11 = vld [vmem:[%s6679_s27 + $0x9c] sm:$0xe] }
 0x115   : > { %6143 = vmatmul.mubr.msk.bf16.gmra.mrb[16].mxu0 %vm709_vm3, %v7893_v5  ;;  %v8554_v5 = vld [vmem:[#allocation15_spill] sm:$0xff]  ;;  %v3964_v47 = vrot.slane %v3963_v6, 4  ;;  %v3978_v12 = vrot.slane %v3977_v44, 4  ;;  %v4451_v8 = vrot.slane %v7793_v3, 5  ;;  %v3997_v30 = vrot.slane %v3995_v2, 4  ;;  %v6521_v19 = vld [vmem:[%s6679_s27 + $0x3c] sm:$0xff]  }
 0x116   : > { %5991 = vmatmul.mubr.msk.bf16.vlgmr.msra.gmra.mrb[0].mxu1 %vm709_vm3, %v6518_v1  ;;  %6146 = vmatprep.mubr.msk.bf16.mxu0 %vm709_vm3, %v7895_v7  ;;  %v4448_v43 = vrot.slane %v8554_v5, 5  ;;  %v2308_v7 = vsel %vm6705_vm4, %v2303_v18, %v8556_v51  ;;  %v4000_v18 = vrot.slane %v3998_v50, 5  ;;  %v8084_v5 = vrot.slane %v4004_v61, 5 }
 0x117   : > { %6193 = vmatpush3.bf16.msra.mxu1 %v8555_v16  ;;  %5994 = vmatprep.mubr.msk.bf16.mxu1 %vm709_vm3, %v6519_v21  ;;  %v8073_v1 = vcombine.low %v2308_v7, %v2318_v41  ;;  %v8077_v21 = vld [vmem:[%s6679_s27 + $0xd4] sm:$0x1]  ;;  %v4010_v9 = vrot.slane %v4008_v49, 4  ;;  %v3988_v41 = vrot.slane %v3987_v56, 4  ;;  %v3992_v6 = vrot.slane %v3990_v31, 5 }
 0x118   : > { %v8081_v22 = vsel %vm6931_vm7, %v5626_v63, %v4448_v43  ;;  %v4450_v17 = vrot.slane %v4448_v43, 4  ;;  %v3959_v63 = vsel %vm6705_vm4, %v3954_v28, %v7981_v4  ;;  %v3969_v2 = vsel %vm6705_vm4, %v3964_v47, %v3968_v23  ;;  %v6571_v16 = vld [vmem:[%s6679_s27 + $0x1c] sm:$0xf]  ;;  %v5612_v28 = vld [vmem:[%s6679_s27 + $0xa8] sm:$0xe] }
 0x119   : > { %v4014_v50 = vshll.u32 %v8077_v21, 16  ;;  %v5627_v61 = vrot.slane %v5611_v11, 9  ;;  %v4455_v49 = vrot.slane %v7781_v25, 5  ;;  %v3983_v4 = vsel %vm6705_vm4, %v3978_v12, %v8040_v62  ;;  %v5600_v62 = vld [vmem:[%s6679_s27 + $0x18] sm:$0xe]  ;;  %v6522_v47 = vld [vmem:[%s6679_s27 + $0x48] sm:$0xff]  }
 0x11a   : > { %v8090_v44 = vsel %vm6931_vm7, %v4450_v17, %v4451_v8  ;;  %v4011_v43 = vor.u32 %v4010_v9, %v8084_v5  ;;  %v4458_v23 = vrot.slane %v7826_v57, 5  ;;  %v3993_v25 = vsel %vm6705_vm4, %v3988_v41, %v3992_v6  ;;  %v6572_v11 = vld [vmem:[%s6679_s27 + $0x20] sm:$0x1] }
 0x11b   : > { %v5643_v3 = vcombine.low %v8081_v22, %v8090_v44  ;;  %v4378_v56 = vrot.slane %v6571_v16, 5  ;;  %v8116_v31 = vsel %vm6931_vm7, %v5627_v61, %v4455_v49  ;;  %v4457_v51 = vrot.slane %v4455_v49, 4  ;;  %v5613_v49 = vld [vmem:[%s6679_s27 + $0xb4] sm:$0xe] }
 0x11c   : > { %v5581_v7 = vcombine.low %v3959_v63, %v3969_v2  ;;  %v4012_v17 = vrot.slane %v4011_v43, 4  ;;  %v5628_v41 = vrot.slane %v5612_v28, 9  ;;  %v4462_v6 = vrot.slane %v7829_v34, 5  ;;  %v5601_v2 = vld [vmem:[%s6679_s27 + $0x24] sm:$0xe] }
 0x11d   : > { %6147 = vmatmul.mubr.msk.bf16.gmra.mrb[20].mxu0 %vm709_vm3, %v7928_v24  ;;  %v4001_v24 = vor.u32 %v4000_v18, %v3997_v30  ;;  %v8121_v57 = vsel %vm6931_vm7, %v4457_v51, %v4458_v23  ;;  %v6523_v30 = vld [vmem:[%s6679_s27 + $0x54] sm:$0xff]   ;;  %v5616_v18 = vrot.slane %v5600_v62, 9  ;;  %v4380_v9 = vrot.slane %v4378_v56, 4  ;;  %v6575_v28 = vld [vmem:[%s6679_s27 + $0x2c] sm:$0x1] }
 0x11e   : > { %5995 = vmatmul.mubr.msk.bf16.gmra.mrb[4].mxu1 %vm709_vm3, %v6520_v29  ;;  %6150 = vmatprep.mubr.msk.bf16.mxu0 %vm709_vm3, %v5580_v46  ;;  %v4016_v46 = vrot.slane %v4014_v50, 5  ;;  %v5582_v29 = vcombine.low %v3983_v4, %v3993_v25  ;;  %v5644_v8 = vcombine.low %v8116_v31, %v8121_v57  ;;  %v4465_v63 = vrot.slane %v7839_v48, 5  ;;  %v6573_v50 = vld [vmem:[%s6679_s27 + $0x28] sm:$0xf]  ;;  %v5602_v25 = vld [vmem:[%s6679_s27 + $0x30] sm:$0xe] }
 0x11f   : > { %5998 = vmatprep.mubr.msk.bf16.mxu1 %vm709_vm3, %v6521_v19  ;;  %v4002_v12 = vrot.slane %v4001_v24, 4  ;;  %v4381_v19 = vrot.slane %v6572_v11, 5  ;;  %v4385_v61 = vrot.slane %v6573_v50, 5  ;;  %v8144_v48 = vsel %vm6931_vm7, %v5628_v41, %v4462_v6  ;;  %v6525_v11 = vld [vmem:[%s6679_s27 + $0x6c] sm:$0xff]   ;;  %v8557_v41 = vld [vmem:[#allocation6_spill] sm:$0xff] }
 0x120   : > { %v4017_v34 = vsel %vm6705_vm4, %v4012_v17, %v4016_v46  ;;  %v4464_v24 = vrot.slane %v4462_v6, 4  ;;  %v4379_v43 = vsel %vm6931_vm7, %v5616_v18, %v4378_v56  ;;  %v5617_v51 = vrot.slane %v5601_v2, 9  ;;  %v5614_v50 = vld [vmem:[%s6679_s27 + $0xc0] sm:$0xe]  ;;  %v6589_v31 = vld [vmem:[%s6679_s27 + $0xc8] sm:$0x1] }
 0x121   : > { %v4007_v4 = vsel %vm6705_vm4, %v4002_v12, %v8084_v5  ;;  %v4382_v23 = vsel %vm6931_vm7, %v4380_v9, %v4381_v19  ;;  %v6574_v5 = vld [vmem:[%s6679_s27 + $0x34] sm:$0xf]  ;;  %v6524_v12 = vld [vmem:[%s6679_s27 + $0x60] sm:$0xff]   ;;  %v5618_v18 = vrot.slane %v5602_v25, 9  ;;  %v4472_v9 = vrot.slane %v7953_v35, 5 }
 0x122   : > { %v4392_v16 = vrot.slane %v6574_v5, 5  ;;  %v8155_v62 = vsel %vm6931_vm7, %v4464_v24, %v4465_v63  ;;  %v5583_v46 = vcombine.low %v4007_v4, %v4017_v34  ;;  %v5633_v17 = vcombine.low %v4379_v43, %v4382_v23  ;;  %v5603_v24 = vld [vmem:[%s6679_s27 + $0x3c] sm:$0xe] }
 0x123   : > { %v5645_v56 = vcombine.low %v8144_v48, %v8155_v62  ;;  %v4395_v6 = vrot.slane %v8557_v41, 5  ;;  %v4386_v35 = vsel %vm6931_vm7, %v5617_v51, %v4385_v61  ;;  %v5630_v5 = vrot.slane %v5614_v50, 9 }
 0x124   : > { %v4394_v19 = vrot.slane %v4392_v16, 4  ;;  %v4393_v23 = vsel %vm6931_vm7, %v5618_v18, %v4392_v16  ;;  %v4479_v51 = vrot.slane %v8046_v52, 5  ;;  %v2459_v57 = vshll.u32 %v6589_v31, 16 }
 0x125   : > { %6151 = vmatmul.mubr.msk.bf16.gmra.mrb[24].mxu0 %vm709_vm3, %v5581_v7  ;;  %v5629_v7 = vrot.slane %v5613_v49, 9 }
 0x126   : > { %5999 = vmatmul.mubr.msk.bf16.gmra.mrb[8].mxu1 %vm709_vm3, %v6522_v47  ;;  %6154 = vmatprep.mubr.msk.bf16.mxu0 %vm709_vm3, %v5582_v29  ;;  %v4388_v47 = vrot.slane %v6575_v28, 5  ;;  %v4469_v29 = vrot.slane %v7904_v39, 5  ;;  %v8558_v39 = vld [vmem:[#allocation7_spill] sm:$0xff]  ;;  %v4396_v25 = vsel %vm6931_vm7, %v4394_v19, %v4395_v6  ;;  %v5619_v28 = vrot.slane %v5603_v24, 9 }
 0x127   : > { %6002 = vmatprep.mubr.msk.bf16.mxu1 %vm709_vm3, %v6523_v30  ;;  %v4387_v30 = vrot.slane %v4385_v61, 4  ;;  %v4399_v49 = vrot.slane %v8558_v39, 5  ;;  %v4476_v61 = vrot.slane %v7956_v58, 5  ;;  %v6576_v39 = vld [vmem:[%s6679_s27 + $0x70] sm:$0xf]  ;;  %v4483_v24 = vrot.slane %v8032_v55, 5 }
 0x128   : > { %v8167_v63 = vsel %vm6931_vm7, %v5629_v7, %v4469_v29  ;;  %v4471_v2 = vrot.slane %v4469_v29, 4  ;;  %v5332_v7 = vld [vmem:[%s6679_s27 + $0x6c] sm:$0xf]  ;;  %v8559_v29 = vld [vmem:[#allocation8_spill] sm:$0xff] }
 0x129   : > { %v4389_v34 = vsel %vm6931_vm7, %v4387_v30, %v4388_v47  ;;  %v4401_v47 = vrot.slane %v4399_v49, 4  ;;  %v6526_v30 = vld [vmem:[%s6679_s27 + $0x78] sm:$0xff]   ;;  %v8198_v16 = vsel %vm6931_vm7, %v5630_v5, %v4476_v61  ;;  %v4478_v18 = vrot.slane %v4476_v61, 4 }
 0x12a   : > { %v8174_v4 = vsel %vm6931_vm7, %v4471_v2, %v4472_v9  ;;  %v5635_v9 = vcombine.low %v4393_v23, %v4396_v25  ;;  %v2272_v19 = vshrl.u32 %v5332_v7, 16  ;;  %v2275_v41 = vshll.u32 %v5332_v7, 16 }
 0x12b   : > { %v5646_v43 = vcombine.low %v8167_v63, %v8174_v4  ;;  %v8203_v58 = vsel %vm6931_vm7, %v4478_v18, %v4479_v51  ;;  %v4400_v6 = vsel %vm6931_vm7, %v5619_v28, %v4399_v49  ;;  %v4486_v49 = vrot.slane %v8077_v21, 5  ;;  %v6528_v51 = vld [vmem:[%s6679_s27 + $0x90] sm:$0xff]   ;;  %v6529_v21 = vld [vmem:[%s6679_s27 + $0x9c] sm:$0xff]  }
 0x12c   : > { %v5647_v50 = vcombine.low %v8198_v16, %v8203_v58  ;;  %v2274_v23 = vrot.slane %v2272_v19, 4  ;;  %v2277_v25 = vrot.slane %v2275_v41, 5  ;;  %v4485_v7 = vrot.slane %v4483_v24, 4 }
 0x12d   : > { %6155 = vmatmul.mubr.msk.bf16.gmra.mrb[28].mxu0 %vm709_vm3, %v5583_v46  ;;  %v5634_v46 = vcombine.low %v4386_v35, %v4389_v34  ;;  %v2281_v35 = vshll.u32 %v6576_v39, 16  ;;  %v2285_v34 = vshrl.u32 %v6576_v39, 16 }
 0x12e   : > { %6003 = vmatmul.mubr.msk.bf16.gmra.mrb[12].mxu1 %vm709_vm3, %v6524_v12  ;;  %6160 = vmatprep.mubr.msk.bf16.mxu0 %vm709_vm3, %v5633_v17  ;;  %v4402_v12 = vrot.slane %v8559_v29, 5  ;;  %v5615_v17 = vld [vmem:[%s6679_s27 + $0xcc] sm:$0xe]  ;;  %v8225_v55 = vsel %vm6931_vm7, %v4485_v7, %v4486_v49 }
 0x12f   : > { %6006 = vmatprep.mubr.msk.bf16.mxu1 %vm709_vm3, %v6525_v11  ;;  %v6527_v11 = vld [vmem:[%s6679_s27 + $0x84] sm:$0xff]   ;;  %v5631_v52 = vrot.slane %v5615_v17, 9  ;;  %v2287_v28 = vrot.slane %v2285_v34, 4  ;;  %v6577_v17 = vld [vmem:[%s6679_s27 + $0x74] sm:$0x1] }
 0x130   : > { %v4403_v2 = vsel %vm6931_vm7, %v4401_v47, %v4402_v12  ;;  %v5338_v47 = vld [vmem:[%s6679_s27 + $0x84] sm:$0xf]  ;;  %v2278_v12 = vor.u32 %v2277_v25, %v2274_v23  ;;  %v6531_v34 = vld [vmem:[%s6679_s27 + $0xb4] sm:$0xff]  }
 0x131   : > { %v8220_v5 = vsel %vm6931_vm7, %v5631_v52, %v4483_v24  ;;  %v5636_v61 = vcombine.low %v4400_v6, %v4403_v2  ;;  %v2323_v18 = vshll.u32 %v5338_v47, 16  ;;  %v5341_v6 = vld [vmem:[%s6679_s27 + $0x90] sm:$0xf]  ;;  %v6530_v2 = vld [vmem:[%s6679_s27 + $0xa8] sm:$0xff]  }
 0x132   : > { %v5648_v29 = vcombine.low %v8220_v5, %v8225_v55  ;;  %v2279_v52 = vrot.slane %v2278_v12, 4  ;;  %v2344_v23 = vshrl.u32 %v5341_v6, 16  ;;  %v2347_v25 = vshll.u32 %v5341_v6, 16 }
 0x133   : > { %v2377_v12 = vshll.u32 %v6580_v60, 16 }
 0x134   : > { %v2349_v14 = vrot.slane %v2347_v25, 5  ;;  %v6583_v25 = vld [vmem:[%s6679_s27 + $0xa4] sm:$0x1] }
 0x135   : > { %6161 = vmatmul.mubr.msk.bf16.vlgmr.msra.gmra.mrb[0].mxu0 %vm709_vm3, %v5634_v46  ;;  %v2283_v46 = vrot.slane %v2281_v35, 5  ;;  %v5344_v35 = vld [vmem:[%s6679_s27 + $0x9c] sm:$0xf]  ;;  %v8267_v6 = vrot.slane %v2377_v12, 5 }
 0x136   : > { %6007 = vmatmul.mubr.msk.bf16.gmra.mrb[16].mxu1 %vm709_vm3, %v6526_v30  ;;  %6164 = vmatprep.mubr.msk.bf16.mxu0 %vm709_vm3, %v5635_v9  ;;  %v2291_v30 = vshll.u32 %v6577_v17, 16  ;;  %v2320_v9 = vshrl.u32 %v5338_v47, 16  ;;  %v2371_v47 = vshll.u32 %v5344_v35, 16  ;;  %v6581_v17 = vld [vmem:[%s6679_s27 + $0x8c] sm:$0x1] }
 0x137   : > { %6010 = vmatprep.mubr.msk.bf16.mxu1 %vm709_vm3, %v6527_v11  ;;  %v2288_v13 = vor.u32 %v2287_v28, %v2283_v46  ;;  %v6578_v11 = vld [vmem:[%s6679_s27 + $0x88] sm:$0xf]  ;;  %v2284_v7 = vsel %vm6705_vm4, %v2279_v52, %v2283_v46 }
 0x138   : > { %v2329_v19 = vshll.u32 %v6578_v11, 16  ;;  %v2333_v41 = vshrl.u32 %v6578_v11, 16  ;;  %v2293_v0 = vrot.slane %v2291_v30, 5  ;;  %v2322_v36 = vrot.slane %v2320_v9, 4 }
 0x139   : > { %v2289_v39 = vrot.slane %v2288_v13, 4  ;;  %v2339_v30 = vshll.u32 %v6581_v17, 16  ;;  %v2346_v9 = vrot.slane %v2344_v23, 4  ;;  %v2373_v11 = vrot.slane %v2371_v47, 5 }
 0x13a   : > { %v8244_v24 = vrot.slane %v2329_v19, 5  ;;  %v2335_v49 = vrot.slane %v2333_v41, 4  ;;  %v6532_v19 = vld [vmem:[%s6679_s27 + $0xc0] sm:$0xff]  }
 0x13b   : > { %v2294_v46 = vsel %vm6705_vm4, %v2289_v39, %v2293_v0  ;;  %v5347_v39 = vld [vmem:[%s6679_s27 + $0xa8] sm:$0xf] }
 0x13c   : > { %v2336_v13 = vor.u32 %v2335_v49, %v8244_v24  ;;  %v5365_v41 = vcombine.low %v2284_v7, %v2294_v46  ;;  %v2387_v7 = vshll.u32 %v6583_v25, 16  ;;  %v2395_v45 = vshll.u32 %v5347_v39, 16 }
 0x13d   : > { %6165 = vmatmul.mubr.msk.bf16.gmra.mrb[4].mxu0 %vm709_vm3, %v5636_v61  ;;  %v6579_v61 = vld [vmem:[%s6679_s27 + $0x94] sm:$0xf] }
 0x13e   : > { %6011 = vmatmul.mubr.msk.bf16.gmra.mrb[20].mxu1 %vm709_vm3, %v6528_v51  ;;  %6168 = vmatprep.mubr.msk.bf16.mxu0 %vm709_vm3, %v5637_v10  ;;  %v2325_v10 = vrot.slane %v2323_v18, 5  ;;  %v2353_v51 = vshll.u32 %v6579_v61, 16  ;;  %v2357_v28 = vshrl.u32 %v6579_v61, 16  ;;  %v2337_v0 = vrot.slane %v2336_v13, 4 }
 0x13f   : > { %6014 = vmatprep.mubr.msk.bf16.mxu1 %vm709_vm3, %v6529_v21  ;;  %v2368_v21 = vshrl.u32 %v5344_v35, 16  ;;  %v6582_v35 = vld [vmem:[%s6679_s27 + $0x98] sm:$0x1]  ;;  %v2392_v61 = vshrl.u32 %v5347_v39, 16  ;;  %v5353_v39 = vld [vmem:[%s6679_s27 + $0xc0] sm:$0xf] }
 0x140   : > { %v2326_v15 = vor.u32 %v2325_v10, %v2322_v36  ;;  %v8264_v26 = vrot.slane %v2353_v51, 5  ;;  %v2341_v36 = vrot.slane %v2339_v30, 5  ;;  %v2350_v10 = vor.u32 %v2349_v14, %v2346_v9  ;;  %v5350_v51 = vld [vmem:[%s6679_s27 + $0xb4] sm:$0xf] }
 0x141   : > { %v2370_v18 = vrot.slane %v2368_v21, 4  ;;  %v2405_v21 = vshrl.u32 %v6584_v27, 16  ;;  %v2416_v20 = vshrl.u32 %v5350_v51, 16  ;;  %v2419_v42 = vshll.u32 %v5350_v51, 16 }
 0x142   : > { %v2327_v52 = vrot.slane %v2326_v15, 4  ;;  %v2342_v46 = vsel %vm6705_vm4, %v2337_v0, %v2341_v36  ;;  %v2351_v15 = vrot.slane %v2350_v10, 4  ;;  %v2389_v30 = vrot.slane %v2387_v7, 5 }
 0x143   : > { %v2374_v23 = vor.u32 %v2373_v11, %v2370_v18  ;;  %v2394_v9 = vrot.slane %v2392_v61, 4  ;;  %v2407_v11 = vrot.slane %v2405_v21, 4  ;;  %v6588_v61 = vld [vmem:[%s6679_s27 + $0xbc] sm:$0x1] }
 0x144   : > { %v2332_v47 = vsel %vm6705_vm4, %v2327_v52, %v8244_v24  ;;  %v2356_v0 = vsel %vm6705_vm4, %v2351_v15, %v8264_v26  ;;  %v2435_v22 = vshll.u32 %v6588_v61, 16 }
 0x145   : > { %6169 = vmatmul.mubr.msk.bf16.gmra.mrb[8].mxu0 %vm709_vm3, %v5638_v40  ;;  %v2381_v40 = vshrl.u32 %v6580_v60, 16  ;;  %v2375_v17 = vrot.slane %v2374_v23, 4  ;;  %v5367_v24 = vcombine.low %v2332_v47, %v2342_v46 }
 0x146   : > { %6015 = vmatmul.mubr.msk.bf16.gmra.mrb[24].mxu1 %vm709_vm3, %v6530_v2  ;;  %6172 = vmatprep.mubr.msk.bf16.mxu0 %vm709_vm3, %v5639_v54  ;;  %v2359_v54 = vrot.slane %v2357_v28, 4 }
 0x147   : > { %6018 = vmatprep.mubr.msk.bf16.mxu1 %vm709_vm3, %v6531_v34  ;;  %v2383_v2 = vrot.slane %v2381_v40, 4  ;;  %v2363_v34 = vshll.u32 %v6582_v35, 16  ;;  %v2380_v10 = vsel %vm6705_vm4, %v2375_v17, %v8267_v6  ;;  %v2461_v17 = vrot.slane %v2459_v57, 5 }
 0x148   : > { %v2360_v49 = vor.u32 %v2359_v54, %v8264_v26  ;;  %v2397_v54 = vrot.slane %v2395_v45, 5  ;;  %v6586_v26 = vld [vmem:[%s6679_s27 + $0xb0] sm:$0x1] }
 0x149   : > { %v2384_v28 = vor.u32 %v2383_v2, %v8267_v6  ;;  %v2365_v60 = vrot.slane %v2363_v34, 5  ;;  %v2411_v35 = vshll.u32 %v6586_v26, 16  ;;  %v2440_v34 = vshrl.u32 %v5353_v39, 16 }
 0x14a   : > { %v2361_v13 = vrot.slane %v2360_v49, 4  ;;  %v2398_v38 = vor.u32 %v2397_v54, %v2394_v9  ;;  %v2443_v6 = vshll.u32 %v5353_v39, 16  ;;  %v6587_v49 = vld [vmem:[%s6679_s27 + $0xc4] sm:$0xf] }
 0x14b   : > { %v2385_v14 = vrot.slane %v2384_v28, 4  ;;  %v2449_v23 = vshll.u32 %v6587_v49, 16  ;;  %v2453_v25 = vshrl.u32 %v6587_v49, 16  ;;  %v2413_v45 = vrot.slane %v2411_v35, 5 }
 0x14c   : > { %v2366_v36 = vsel %vm6705_vm4, %v2361_v13, %v2365_v60  ;;  %v2399_v51 = vrot.slane %v2398_v38, 4  ;;  %v2437_v60 = vrot.slane %v2435_v22, 5 }
 0x14d   : > { %6173 = vmatmul.mubr.msk.bf16.gmra.mrb[12].mxu0 %vm709_vm3, %v5640_v53  ;;  %v2401_v53 = vshll.u32 %v6584_v27, 16  ;;  %v2390_v59 = vsel %vm6705_vm4, %v2385_v14, %v2389_v30  ;;  %v5368_v44 = vcombine.low %v2356_v0, %v2366_v36  ;;  %v2442_v27 = vrot.slane %v2440_v34, 4 }
 0x14e   : > { %6019 = vmatmul.mubr.msk.bf16.gmra.mrb[28].mxu1 %vm709_vm3, %v6532_v19  ;;  %6176 = vmatprep.mubr.msk.bf16.mxu0 %vm709_vm3, %v5641_v33  ;;  %v6585_v33 = vld [vmem:[%s6679_s27 + $0xb8] sm:$0xf]  ;;  %v2418_v19 = vrot.slane %v2416_v20, 4  ;;  %v2451_v21 = vrot.slane %v2449_v23, 5  ;;  %v2455_v47 = vrot.slane %v2453_v25, 4 }
 0x14f   : > { %6040 = vmatprep.mubr.msk.bf16.mxu1 %vm709_vm3, %v5365_v41  ;;  %v2425_v12 = vshll.u32 %v6585_v33, 16  ;;  %v2429_v40 = vshrl.u32 %v6585_v33, 16  ;;  %v2403_v18 = vrot.slane %v2401_v53, 5  ;;  %v2421_v41 = vrot.slane %v2419_v42, 5 }
 0x150   : > { %v2445_v53 = vrot.slane %v2443_v6, 5 }
 0x151   : > { %v2427_v52 = vrot.slane %v2425_v12, 5  ;;  %v2431_v2 = vrot.slane %v2429_v40, 4  ;;  %v2404_v20 = vsel %vm6705_vm4, %v2399_v51, %v2403_v18  ;;  %v2456_v12 = vor.u32 %v2455_v47, %v2451_v21 }
 0x152   : > { %v2446_v33 = vor.u32 %v2445_v53, %v2442_v27 }
 0x153   : > { %v2432_v7 = vor.u32 %v2431_v2, %v2427_v52  ;;  %v2457_v13 = vrot.slane %v2456_v12, 4  ;;  %v8370_v2 = vld [vmem:[%s8491_s2] ss:$0 sm:$0xff] }
 0x154   : > { %v2447_v40 = vrot.slane %v2446_v33, 4 }
 0x155   : > { %6177 = vmatmul.mubr.msk.bf16.gmra.mrb[16].mxu0 %vm709_vm3, %v5642_v37  ;;  %v2408_v37 = vor.u32 %v2407_v11, %v2403_v18  ;;  %v2433_v15 = vrot.slane %v2432_v7, 4  ;;  %v2462_v9 = vsel %vm6705_vm4, %v2457_v13, %v2461_v17 }
 0x156   : > { %6041 = vmatmul.mubr.msk.bf16.vlgmr.msra.gmra.mrb[16].mxu1 %vm709_vm3, %v8073_v1  ;;  %6180 = vmatprep.mubr.msk.bf16.mxu0 %vm709_vm3, %v5643_v3  ;;  %v2422_v1 = vor.u32 %v2421_v41, %v2418_v19  ;;  %v5369_v3 = vcombine.low %v2380_v10, %v2390_v59  ;;  %v2452_v30 = vsel %vm6705_vm4, %v2447_v40, %v2451_v21 }
 0x157   : > { %6044 = vmatprep.mubr.msk.bf16.mxu1 %vm709_vm3, %v5367_v24  ;;  %v2409_v28 = vrot.slane %v2408_v37, 4  ;;  %v2438_v48 = vsel %vm6705_vm4, %v2433_v15, %v2437_v60  ;;  %v5372_v14 = vcombine.low %v2452_v30, %v2462_v9 }
 0x158   : > { %v2423_v46 = vrot.slane %v2422_v1, 4 }
 0x159   : > { %v2414_v42 = vsel %vm6705_vm4, %v2409_v28, %v2413_v45 }
 0x15a   : > { %v5370_v62 = vcombine.low %v2404_v20, %v2414_v42 }
 0x15d   : > { %6181 = vmatmul.mubr.msk.bf16.gmra.mrb[20].mxu0 %vm709_vm3, %v5644_v8  ;;  %v2428_v8 = vsel %vm6705_vm4, %v2423_v46, %v2427_v52 }
 0x15e   : > { %6045 = vmatmul.mubr.msk.bf16.gmra.mrb[20].mxu1 %vm709_vm3, %v5368_v44  ;;  %6184 = vmatprep.mubr.msk.bf16.mxu0 %vm709_vm3, %v5645_v56  ;;  %v5371_v56 = vcombine.low %v2428_v8, %v2438_v48 }
 0x15f   : > { %6048 = vmatprep.mubr.msk.bf16.mxu1 %vm709_vm3, %v5369_v3 }
 0x165   : > { %6185 = vmatmul.mubr.msk.bf16.gmra.mrb[24].mxu0 %vm709_vm3, %v5646_v43 }
 0x166   : > { %6049 = vmatmul.mubr.msk.bf16.gmra.mrb[24].mxu1 %vm709_vm3, %v5370_v62  ;;  %6188 = vmatprep.mubr.msk.bf16.mxu0 %vm709_vm3, %v5647_v50 }
 0x167   : > { %6052 = vmatprep.mubr.msk.bf16.mxu1 %vm709_vm3, %v5371_v56 }
 0x16d   : > { %6189 = vmatmul.mubr.msk.bf16.gmra.mrb[28].mxu0 %vm709_vm3, %v5648_v29 }
 0x16e   : > { %6053 = vmatmul.mubr.msk.bf16.gmra.mrb[28].mxu1 %vm709_vm3, %v5372_v14 }
 0x1e9   : > { %v5992_v63 = vpop.f32.mrb[0].mxu1 }
 0x1ea   : > { %v1872_v4 = vpop.f32.mrb[1].mxu1 }
 0x1eb   : > { %v5993_v43 = vpop.f32.mrb[2].mxu1 }
 0x1ec   : > { %v1875_v16 = vpop.f32.mrb[3].mxu1 }
 0x1f1   : > { %v5996_v58 = vpop.f32.mrb[4].mxu1 }
 0x1f2   : > { %v1888_v50 = vpop.f32.mrb[5].mxu1 }
 0x1f3   : > { %v5997_v54 = vpop.f32.mrb[6].mxu1 }
 0x1f4   : > { %v1891_v18 = vpop.f32.mrb[7].mxu1 }
 0x1f9   : > { %v6000_v11 = vpop.f32.mrb[8].mxu1 }
 0x1fa   : > { %v1904_v32 = vpop.f32.mrb[9].mxu1 }
 0x1fb   : > { %v8355_v24 = vpop.f32.mrb[10].mxu1 }
 0x1fc   : > { %v8357_v19 = vpop.f32.mrb[11].mxu1 }
 0x201   : > { %v8359_v5 = vpop.f32.mrb[12].mxu1 }
 0x202   : > { %v8361_v55 = vpop.f32.mrb[13].mxu1 }
 0x203   : > { %v8363_v29 = vpop.f32.mrb[14].mxu1 }
 0x204   : > { %v8365_v41 = vpop.f32.mrb[15].mxu1 }
 0x208   : > { %v6162_v52 = vpop.f32.mrb[0].mxu0 }
 0x209   : > { %v6194_v39 = vadd.f32 %v6162_v52, %v5992_v63  ;;  %v4623_v0 = vpop.f32.mrb[1].mxu0 }
 0x20a   : > { %v6195_v36 = vadd.f32 %v4623_v0, %v1872_v4  ;;  %v6163_v10 = vpop.f32.mrb[2].mxu0 }
 0x20b   : > { %v4791_v59 = vadd.f32 %v6194_v39, %v8370_v2  ;;  %v6196_v38 = vadd.f32 %v6163_v10, %v5993_v43  ;;  %v4626_v37 = vpop.f32.mrb[3].mxu0 }
 0x20c   : > { %v4789_v26 = vadd.f32 %v6195_v36, %v8370_v2  ;;  %v6197_v35 = vadd.f32 %v4626_v37, %v1875_v16 }
 0x20d   : > { %v4823_v34 = vmax.f32 %v4791_v59, 0.0  ;;  %v4792_v6 = vadd.f32 %v6196_v38, %v8370_v2 }
 0x20e   : > { %v4821_v49 = vmax.f32 %v4789_v26, 0.0  ;;  %v4790_v23 = vadd.f32 %v6197_v35, %v8370_v2 }
 0x20f   : > { %v5703_v25 = vpack.c.bf16 %v4823_v34, %v4823_v34  ;;  %v4824_v1 = vmax.f32 %v4792_v6, 0.0 }
 0x210   : > { %v5701_v7 = vpack.c.bf16 %v4821_v49, %v4821_v49  ;;  %v4822_v61 = vmax.f32 %v4790_v23, 0.0  ;;  %v6166_v22 = vpop.f32.mrb[4].mxu0 }
 0x211   : > { %4984 = vst.msk [vmem:[%s8379_s24 + $0x8] sm:$0xf] %vm4981_vm8, %v5703_v25  ;;  %v5704_v44 = vpack.c.bf16 %v4824_v1, %v4824_v1  ;;  %v6198_v3 = vadd.f32 %v6166_v22, %v5996_v58  ;;  %v4639_v51 = vpop.f32.mrb[5].mxu0 }
 0x212   : > { %4982 = vst.msk [vmem:[%s8379_s24] sm:$0xf] %vm4981_vm8, %v5701_v7  ;;  %v5702_v28 = vpack.c.bf16 %v4822_v61, %v4822_v61  ;;  %v6199_v45 = vadd.f32 %v4639_v51, %v1888_v50  ;;  %v6167_v27 = vpop.f32.mrb[6].mxu0 }
 0x213   : > { %4985 = vst.msk [vmem:[%s8379_s24 + $0xc] sm:$0xf] %vm4981_vm8, %v5704_v44  ;;  %v4795_v53 = vadd.f32 %v6198_v3, %v8370_v2  ;;  %v6200_v21 = vadd.f32 %v6167_v27, %v5997_v54  ;;  %v4642_v47 = vpop.f32.mrb[7].mxu0 }
 0x214   : > { %4983 = vst.msk [vmem:[%s8379_s24 + $0x4] sm:$0xf] %vm4981_vm8, %v5702_v28  ;;  %v4793_v46 = vadd.f32 %v6199_v45, %v8370_v2  ;;  %v6201_v15 = vadd.f32 %v4642_v47, %v1891_v18 }
 0x215   : > { %v4827_v60 = vmax.f32 %v4795_v53, 0.0  ;;  %v4796_v20 = vadd.f32 %v6200_v21, %v8370_v2 }
 0x216   : > { %v4825_v42 = vmax.f32 %v4793_v46, 0.0  ;;  %v4794_v33 = vadd.f32 %v6201_v15, %v8370_v2 }
 0x217   : > { %v5707_v12 = vpack.c.bf16 %v4827_v60, %v4827_v60  ;;  %v4828_v31 = vmax.f32 %v4796_v20, 0.0 }
 0x218   : > { %v5705_v57 = vpack.c.bf16 %v4825_v42, %v4825_v42  ;;  %v4826_v8 = vmax.f32 %v4794_v33, 0.0  ;;  %v6170_v48 = vpop.f32.mrb[8].mxu0 }
 0x219   : > { %4988 = vst.msk [vmem:[%s8379_s24 + $0x18] sm:$0xf] %vm4981_vm8, %v5707_v12  ;;  %v5708_v62 = vpack.c.bf16 %v4828_v31, %v4828_v31  ;;  %v6202_v56 = vadd.f32 %v6170_v48, %v6000_v11  ;;  %v4655_v40 = vpop.f32.mrb[9].mxu0 }
 0x21a   : > { %4986 = vst.msk [vmem:[%s8379_s24 + $0x10] sm:$0xf] %vm4981_vm8, %v5705_v57  ;;  %v5706_v13 = vpack.c.bf16 %v4826_v8, %v4826_v8  ;;  %v6203_v17 = vadd.f32 %v4655_v40, %v1904_v32  ;;  %v6171_v30 = vpop.f32.mrb[10].mxu0 }
 0x21b   : > { %4989 = vst.msk [vmem:[%s8379_s24 + $0x1c] sm:$0xf] %vm4981_vm8, %v5708_v62  ;;  %v4799_v9 = vadd.f32 %v6202_v56, %v8370_v2  ;;  %v6204_v14 = vadd.f32 %v6171_v30, %v8355_v24  ;;  %v4658_v63 = vpop.f32.mrb[11].mxu0 }
 0x21c   : > { %4987 = vst.msk [vmem:[%s8379_s24 + $0x14] sm:$0xf] %vm4981_vm8, %v5706_v13  ;;  %v4797_v4 = vadd.f32 %v6203_v17, %v8370_v2  ;;  %v6205_v43 = vadd.f32 %v4658_v63, %v8357_v19 }
 0x21d   : > { %v4831_v16 = vmax.f32 %v4799_v9, 0.0  ;;  %v4800_v58 = vadd.f32 %v6204_v14, %v8370_v2 }
 0x21e   : > { %v4829_v50 = vmax.f32 %v4797_v4, 0.0  ;;  %v4798_v54 = vadd.f32 %v6205_v43, %v8370_v2 }
 0x21f   : > { %v5711_v18 = vpack.c.bf16 %v4831_v16, %v4831_v16  ;;  %v4832_v11 = vmax.f32 %v4800_v58, 0.0 }
 0x220   : > { %v5709_v32 = vpack.c.bf16 %v4829_v50, %v4829_v50  ;;  %v4830_v24 = vmax.f32 %v4798_v54, 0.0  ;;  %v6174_v52 = vpop.f32.mrb[12].mxu0 }
 0x221   : > { %4992 = vst.msk [vmem:[%s8379_s24 + $0x28] sm:$0xf] %vm4981_vm8, %v5711_v18  ;;  %v5712_v39 = vpack.c.bf16 %v4832_v11, %v4832_v11  ;;  %v6206_v0 = vadd.f32 %v6174_v52, %v8359_v5  ;;  %v4671_v36 = vpop.f32.mrb[13].mxu0 }
 0x222   : > { %4990 = vst.msk [vmem:[%s8379_s24 + $0x20] sm:$0xf] %vm4981_vm8, %v5709_v32  ;;  %v5710_v19 = vpack.c.bf16 %v4830_v24, %v4830_v24  ;;  %v6207_v10 = vadd.f32 %v4671_v36, %v8361_v55  ;;  %v6175_v59 = vpop.f32.mrb[14].mxu0 }
 0x223   : > { %4993 = vst.msk [vmem:[%s8379_s24 + $0x2c] sm:$0xf] %vm4981_vm8, %v5712_v39  ;;  %v4803_v38 = vadd.f32 %v6206_v0, %v8370_v2  ;;  %v6208_v37 = vadd.f32 %v6175_v59, %v8363_v29  ;;  %v4674_v26 = vpop.f32.mrb[15].mxu0 }
 0x224   : > { %4991 = vst.msk [vmem:[%s8379_s24 + $0x24] sm:$0xf] %vm4981_vm8, %v5710_v19  ;;  %v4801_v5 = vadd.f32 %v6207_v10, %v8370_v2  ;;  %v6209_v35 = vadd.f32 %v4674_v26, %v8365_v41 }
 0x225   : > { %v4835_v34 = vmax.f32 %v4803_v38, 0.0  ;;  %v4804_v6 = vadd.f32 %v6208_v37, %v8370_v2 }
 0x226   : > { %v4833_v55 = vmax.f32 %v4801_v5, 0.0  ;;  %v4802_v49 = vadd.f32 %v6209_v35, %v8370_v2 }
 0x227   : > { %v5715_v23 = vpack.c.bf16 %v4835_v34, %v4835_v34  ;;  %v4836_v25 = vmax.f32 %v4804_v6, 0.0 }
 0x228   : > { %v5713_v1 = vpack.c.bf16 %v4833_v55, %v4833_v55  ;;  %v4834_v29 = vmax.f32 %v4802_v49, 0.0  ;;  %v6178_v7 = vpop.f32.mrb[16].mxu0 }
 0x229   : > { %4996 = vst.msk [vmem:[%s8379_s24 + $0x38] sm:$0xf] %vm4981_vm8, %v5715_v23  ;;  %v5716_v61 = vpack.c.bf16 %v4836_v25, %v4836_v25  ;;  %v6042_v22 = vpop.f32.mrb[16].mxu1  ;;  %v4687_v44 = vpop.f32.mrb[17].mxu0 }
 0x22a   : > { %4994 = vst.msk [vmem:[%s8379_s24 + $0x30] sm:$0xf] %vm4981_vm8, %v5713_v1  ;;  %v5714_v41 = vpack.c.bf16 %v4834_v29, %v4834_v29  ;;  %v6210_v3 = vadd.f32 %v6178_v7, %v6042_v22  ;;  %v2662_v51 = vpop.f32.mrb[17].mxu1  ;;  %v6179_v28 = vpop.f32.mrb[18].mxu0 }
 0x22b   : > { %4997 = vst.msk [vmem:[%s8379_s24 + $0x3c] sm:$0xf] %vm4981_vm8, %v5716_v61  ;;  %v6211_v45 = vadd.f32 %v4687_v44, %v2662_v51  ;;  %v6043_v27 = vpop.f32.mrb[18].mxu1  ;;  %v4690_v53 = vpop.f32.mrb[19].mxu0 }
 0x22c   : > { %4995 = vst.msk [vmem:[%s8379_s24 + $0x34] sm:$0xf] %vm4981_vm8, %v5714_v41  ;;  %v4807_v21 = vadd.f32 %v6210_v3, %v8370_v2  ;;  %v6212_v47 = vadd.f32 %v6179_v28, %v6043_v27  ;;  %v2665_v46 = vpop.f32.mrb[19].mxu1 }
 0x22d   : > { %v4805_v15 = vadd.f32 %v6211_v45, %v8370_v2  ;;  %v6213_v60 = vadd.f32 %v4690_v53, %v2665_v46 }
 0x22e   : > { %v4839_v20 = vmax.f32 %v4807_v21, 0.0  ;;  %v4808_v42 = vadd.f32 %v6212_v47, %v8370_v2 }
 0x22f   : > { %v4837_v33 = vmax.f32 %v4805_v15, 0.0  ;;  %v4806_v12 = vadd.f32 %v6213_v60, %v8370_v2 }
 0x230   : > { %v5719_v31 = vpack.c.bf16 %v4839_v20, %v4839_v20  ;;  %v4840_v57 = vmax.f32 %v4808_v42, 0.0  ;;  %v6182_v8 = vpop.f32.mrb[20].mxu0 }
 0x231   : > { %v5717_v48 = vpack.c.bf16 %v4837_v33, %v4837_v33  ;;  %v4838_v62 = vmax.f32 %v4806_v12, 0.0  ;;  %v6046_v56 = vpop.f32.mrb[20].mxu1  ;;  %v4703_v40 = vpop.f32.mrb[21].mxu0 }
 0x232   : > { %5000 = vst.msk [vmem:[%s8379_s24 + $0x48] sm:$0xf] %vm4981_vm8, %v5719_v31  ;;  %v5720_v13 = vpack.c.bf16 %v4840_v57, %v4840_v57  ;;  %v6214_v17 = vadd.f32 %v6182_v8, %v6046_v56  ;;  %v2678_v30 = vpop.f32.mrb[21].mxu1  ;;  %v6183_v9 = vpop.f32.mrb[22].mxu0 }
 0x233   : > { %4998 = vst.msk [vmem:[%s8379_s24 + $0x40] sm:$0xf] %vm4981_vm8, %v5717_v48  ;;  %v5718_v14 = vpack.c.bf16 %v4838_v62, %v4838_v62  ;;  %v6215_v63 = vadd.f32 %v4703_v40, %v2678_v30  ;;  %v6047_v4 = vpop.f32.mrb[22].mxu1  ;;  %v4706_v43 = vpop.f32.mrb[23].mxu0 }
 0x234   : > { %5001 = vst.msk [vmem:[%s8379_s24 + $0x4c] sm:$0xf] %vm4981_vm8, %v5720_v13  ;;  %v4811_v16 = vadd.f32 %v6214_v17, %v8370_v2  ;;  %v6216_v58 = vadd.f32 %v6183_v9, %v6047_v4  ;;  %v2681_v50 = vpop.f32.mrb[23].mxu1 }
 0x235   : > { %4999 = vst.msk [vmem:[%s8379_s24 + $0x44] sm:$0xf] %vm4981_vm8, %v5718_v14  ;;  %v4809_v54 = vadd.f32 %v6215_v63, %v8370_v2  ;;  %v6217_v18 = vadd.f32 %v4706_v43, %v2681_v50 }
 0x236   : > { %v4843_v11 = vmax.f32 %v4811_v16, 0.0  ;;  %v4812_v32 = vadd.f32 %v6216_v58, %v8370_v2 }
 0x237   : > { %v4841_v24 = vmax.f32 %v4809_v54, 0.0  ;;  %v4810_v52 = vadd.f32 %v6217_v18, %v8370_v2 }
 0x238   : > { %v5723_v39 = vpack.c.bf16 %v4843_v11, %v4843_v11  ;;  %v4844_v0 = vmax.f32 %v4812_v32, 0.0  ;;  %v6186_v36 = vpop.f32.mrb[24].mxu0 }
 0x239   : > { %v5721_v19 = vpack.c.bf16 %v4841_v24, %v4841_v24  ;;  %v4842_v10 = vmax.f32 %v4810_v52, 0.0  ;;  %v6050_v59 = vpop.f32.mrb[24].mxu1  ;;  %v4719_v38 = vpop.f32.mrb[25].mxu0 }
 0x23a   : > { %5004 = vst.msk [vmem:[%s8379_s24 + $0x58] sm:$0xf] %vm4981_vm8, %v5723_v39  ;;  %v5724_v37 = vpack.c.bf16 %v4844_v0, %v4844_v0  ;;  %v6218_v26 = vadd.f32 %v6186_v36, %v6050_v59  ;;  %v2694_v5 = vpop.f32.mrb[25].mxu1  ;;  %v6187_v35 = vpop.f32.mrb[26].mxu0 }
 0x23b   : > { %5002 = vst.msk [vmem:[%s8379_s24 + $0x50] sm:$0xf] %vm4981_vm8, %v5721_v19  ;;  %v5722_v34 = vpack.c.bf16 %v4842_v10, %v4842_v10  ;;  %v6219_v6 = vadd.f32 %v4719_v38, %v2694_v5  ;;  %v6051_v55 = vpop.f32.mrb[26].mxu1  ;;  %v4722_v49 = vpop.f32.mrb[27].mxu0 }
 0x23c   : > { %5005 = vst.msk [vmem:[%s8379_s24 + $0x5c] sm:$0xf] %vm4981_vm8, %v5724_v37  ;;  %v4815_v23 = vadd.f32 %v6218_v26, %v8370_v2  ;;  %v6220_v25 = vadd.f32 %v6187_v35, %v6051_v55  ;;  %v2697_v1 = vpop.f32.mrb[27].mxu1 }
 0x23d   : > { %5003 = vst.msk [vmem:[%s8379_s24 + $0x54] sm:$0xf] %vm4981_vm8, %v5722_v34  ;;  %v4813_v29 = vadd.f32 %v6219_v6, %v8370_v2  ;;  %v6221_v7 = vadd.f32 %v4722_v49, %v2697_v1 }
 0x23e   : > { %v4847_v61 = vmax.f32 %v4815_v23, 0.0  ;;  %v4816_v22 = vadd.f32 %v6220_v25, %v8370_v2 }
 0x23f   : > { %v4845_v44 = vmax.f32 %v4813_v29, 0.0  ;;  %v4814_v41 = vadd.f32 %v6221_v7, %v8370_v2 }
 0x240   : > { %v5727_v3 = vpack.c.bf16 %v4847_v61, %v4847_v61  ;;  %v4848_v51 = vmax.f32 %v4816_v22, 0.0  ;;  %v6190_v28 = vpop.f32.mrb[28].mxu0 }
 0x241   : > { %v5725_v45 = vpack.c.bf16 %v4845_v44, %v4845_v44  ;;  %v4846_v27 = vmax.f32 %v4814_v41, 0.0  ;;  %v6054_v53 = vpop.f32.mrb[28].mxu1  ;;  %v4735_v21 = vpop.f32.mrb[29].mxu0 }
 0x242   : > { %5008 = vst.msk [vmem:[%s8379_s24 + $0x68] sm:$0xf] %vm4981_vm8, %v5727_v3  ;;  %v5728_v47 = vpack.c.bf16 %v4848_v51, %v4848_v51  ;;  %v6222_v46 = vadd.f32 %v6190_v28, %v6054_v53  ;;  %v2710_v15 = vpop.f32.mrb[29].mxu1  ;;  %v6191_v60 = vpop.f32.mrb[30].mxu0 }
 0x243   : > { %5006 = vst.msk [vmem:[%s8379_s24 + $0x60] sm:$0xf] %vm4981_vm8, %v5725_v45  ;;  %v5726_v20 = vpack.c.bf16 %v4846_v27, %v4846_v27  ;;  %v6223_v42 = vadd.f32 %v4735_v21, %v2710_v15  ;;  %v6055_v33 = vpop.f32.mrb[30].mxu1  ;;  %v4738_v12 = vpop.f32.mrb[31].mxu0 }
 0x244   : > { %5009 = vst.msk [vmem:[%s8379_s24 + $0x6c] sm:$0xf] %vm4981_vm8, %v5728_v47  ;;  %v4819_v31 = vadd.f32 %v6222_v46, %v8370_v2  ;;  %v6224_v57 = vadd.f32 %v6191_v60, %v6055_v33  ;;  %v2713_v8 = vpop.f32.mrb[31].mxu1 }
 0x245   : > { %5007 = vst.msk [vmem:[%s8379_s24 + $0x64] sm:$0xf] %vm4981_vm8, %v5726_v20  ;;  %v4817_v48 = vadd.f32 %v6223_v42, %v8370_v2  ;;  %v6225_v62 = vadd.f32 %v4738_v12, %v2713_v8 }
 0x246   : > { %v4851_v56 = vmax.f32 %v4819_v31, 0.0  ;;  %v4820_v40 = vadd.f32 %v6224_v57, %v8370_v2 }
 0x247   : > { %v4849_v13 = vmax.f32 %v4817_v48, 0.0  ;;  %v4818_v17 = vadd.f32 %v6225_v62, %v8370_v2 }
 0x248   : > { %v5731_v30 = vpack.c.bf16 %v4851_v56, %v4851_v56  ;;  %v4852_v9 = vmax.f32 %v4820_v40, 0.0 }
 0x249   : > { %v5729_v14 = vpack.c.bf16 %v4849_v13, %v4849_v13  ;;  %v4850_v63 = vmax.f32 %v4818_v17, 0.0 }
 0x24a   : > { %5012 = vst.msk [vmem:[%s8379_s24 + $0x78] sm:$0xf] %vm4981_vm8, %v5731_v30  ;;  %v5732_v4 = vpack.c.bf16 %v4852_v9, %v4852_v9 }
 0x24b   : > { %5010 = vst.msk [vmem:[%s8379_s24 + $0x70] sm:$0xf] %vm4981_vm8, %v5729_v14  ;;  %v5730_v43 = vpack.c.bf16 %v4850_v63, %v4850_v63 }
 0x24c   : > { %5013 = vst.msk [vmem:[%s8379_s24 + $0x7c] sm:$0xf] %vm4981_vm8, %v5732_v4 }
 0x24d   : > { %5011 = vst.msk [vmem:[%s8379_s24 + $0x74] sm:$0xf] %vm4981_vm8, %v5730_v43 }
 0x24e PF: > { %s13_s14 = sadd.s32 1, %s6612_s14   ;;  %s8560_s12 = smov %s6608_s13 }
 0x24f   : > { %p10_p5 = scmp.ge.s32.totalorder %s13_s14, 4   ;;  %s8561_s13 = smov %s8563_s15 }
 0x251   :  { %12 = sbr.rel (!%p10_p5) target bundleno = 2 (0x2), region = 78 }

</bundles_post_ra>
